<compile_context>
chip_gen: v7x
topology: tpu7x:2x2x1
jax: 0.10.0
libtpu: 0.0.40
codegen_flags: <defaults>
</compile_context>

<pallas_src>
import jax
import jax.numpy as jnp
from jax.experimental import pallas as pl
from jax.experimental.pallas import tpu as pltpu

EMBED_DIM = 32                 # embedding_dim (small test size; PyTorch default is 128)
NHEAD = 4                      # unused in kernel: seq_len == 1 collapses MHA (see header)
NUM_LAYERS = 2
FF_DIM = 2048                  # nn.TransformerEncoderLayer default dim_feedforward
D_MODEL = 3 * EMBED_DIM
FEAT_DIM = 64
LN_EPS = 1e-5


def _layer_norm(v, g, b):
    mean = jnp.mean(v, axis=-1, keepdims=True)
    c = v - mean
    var = jnp.mean(c * c, axis=-1, keepdims=True)
    return c * jax.lax.rsqrt(var + LN_EPS) * g + b


def transformer_classifier_kernel(
        x_ref,
        sa_w_ref, sa_b_ref, ln1_g_ref, ln1_b_ref,
        ff1_w_ref, ff1_b_ref, ff2_w_ref, ff2_b_ref,
        ln2_g_ref, ln2_b_ref,
        fe_w_ref, fe_b_ref, cls_w_ref, cls_b_ref,
        out_ref):
    f32 = jnp.float32
    bf16 = jnp.bfloat16
    x = x_ref[...].astype(f32)                           # (TB, D) running activation, f32

    for l in range(NUM_LAYERS):                          # statically unrolled; weights stacked on axis 0
        # ---- self-attention, seq_len == 1 => softmax == 1 => attn == out_proj(V).
        # Folded in the wrapper into a single (D, D) matmul per layer. ----
        sa = (jnp.dot(x.astype(bf16), sa_w_ref[l], preferred_element_type=f32)
              + sa_b_ref[l:l + 1, :])                    # (TB, D)
        x = _layer_norm(x + sa, ln1_g_ref[l:l + 1, :], ln1_b_ref[l:l + 1, :])

        # ---- feed-forward: Linear -> ReLU -> Linear (dropout = identity).
        # ReLU fused with the bf16 downcast: only one (TB, FF) copy stays live. ----
        h = jnp.maximum(
            jnp.dot(x.astype(bf16), ff1_w_ref[l], preferred_element_type=f32)
            + ff1_b_ref[l:l + 1, :], 0.0).astype(bf16)   # (TB, FF) bf16
        ff = (jnp.dot(h, ff2_w_ref[l], preferred_element_type=f32)
              + ff2_b_ref[l:l + 1, :])                   # (TB, D) f32
        x = _layer_norm(x + ff, ln2_g_ref[l:l + 1, :], ln2_b_ref[l:l + 1, :])

    # ---- feature_extractor: Linear(3E, 64) + ReLU (Dropout = identity) ----
    feat = jnp.maximum(
        jnp.dot(x.astype(bf16), fe_w_ref[...], preferred_element_type=f32)
        + fe_b_ref[...], 0.0)                            # (TB, 64) f32
    # ---- classifier: Linear(64, 1) + Sigmoid, done on VPU+XLU (avoid N=1 MXU pass) ----
    logit = jnp.sum(feat * cls_w_ref[...], axis=-1, keepdims=True) + cls_b_ref[...]
    out_ref[...] = jax.nn.sigmoid(logit)                 # (TB, 1)


def _round_up(v, m):
    return ((v + m - 1) // m) * m


def _tile_and_vmem(B, batch_tile):
    # Physical VMEM decides the per-generation scoped limit: v5e/v6e have 128 MiB,
    # v7x only 64 MiB.  Unknown => assume the smaller (v7x-like) budget.
    try:
        phys_vmem = pltpu.get_tpu_info().vmem_capacity_bytes
    except Exception:
        phys_vmem = 64 * 1024 * 1024
    if phys_vmem >= 100 * 1024 * 1024:
        vmem_limit = 64 * 1024 * 1024                    # v5e / v6e (128 MiB physical)
    else:
        vmem_limit = 48 * 1024 * 1024                    # v7x: leave DMA headroom under 64 MiB

    # tb = rows per grid step.  Bigger tiles amortize MXU weight pushes on the
    # (tb, 2048) FF matmuls and the per-step grid overhead; ~15 MiB of live VMEM
    # at tb=1024 fits every generation.  Multiple of 16 (bf16 packed sublane tile).
    # For large batches keep >= 2 grid steps so the "parallel" axis can feed both
    # v7x TensorCores.
    if batch_tile is None:
        tb = min(1024, _round_up(B, 16))
        if B >= 64 and tb >= _round_up(B, 16):
            tb = _round_up(pl.cdiv(B, 2), 16)
    else:
        tb = min(batch_tile, _round_up(B, 16))
    tb = max(16, (tb // 16) * 16)
    return tb, vmem_limit


def transformer_classifier_forward(params, drugs, genes, diseases, *, batch_tile=None):
    # glue: embedding gathers + concat (data-dependent gather kept in plain JAX)
    x = jnp.concatenate(
        [params["drug_emb"][drugs],
         params["gene_emb"][genes],
         params["disease_emb"][diseases]], axis=1).astype(jnp.float32)   # (B, 3E)
    B = x.shape[0]

    tb, vmem_limit = _tile_and_vmem(B, batch_tile)
    B_pad = _round_up(B, tb)
    if B_pad != B:
        x = jnp.pad(x, ((0, B_pad - B), (0, 0)))
    x = x.astype(jnp.bfloat16)

    D = D_MODEL
    f32 = jnp.float32
    bf = lambda a: a.astype(jnp.bfloat16)

    # seq_len == 1 => attention is purely linear: fold out_proj(V-projection) into
    # one (D, D) matmul per layer.  Fold is done in f32, then cast to bf16.
    w_v = params["inproj_w"][:, :, 2 * D:]                               # (L, D, D)
    b_v = params["inproj_b"][:, 2 * D:]                                  # (L, D)
    sa_w = jnp.einsum("lij,ljk->lik", w_v, params["attnout_w"])          # (L, D, D)
    sa_b = jnp.einsum("lj,ljk->lk", b_v, params["attnout_w"]) + params["attnout_b"]

    weights = (
        bf(sa_w), sa_b.astype(f32),
        params["ln1_g"], params["ln1_b"],
        bf(params["ff1_w"]), params["ff1_b"],
        bf(params["ff2_w"]), params["ff2_b"],
        params["ln2_g"], params["ln2_b"],
        bf(params["fe_w"]), params["fe_b"],
        params["cls_w"].T,                               # (1, FEAT)  for VPU tail (f32)
        params["cls_b"],                                 # (1, 1)
    )

    def weight_spec(arr):
        idx = lambda i, nd=arr.ndim: (0,) * nd
        try:
            # Constant index_map => the block never changes; single-buffering halves
            # the weights' VMEM footprint (matters on v7x's 64 MiB budget).
            return pl.BlockSpec(arr.shape, idx, pipeline_mode=pl.Buffered(1))
        except (AttributeError, TypeError):
            return pl.BlockSpec(arr.shape, idx)          # older JAX: default buffering

    per_row_flops = 2 * (NUM_LAYERS * (D * D + 2 * D * FF_DIM)
                         + D * FEAT_DIM + FEAT_DIM)
    weight_bytes = sum(int(w.size) * w.dtype.itemsize for w in weights)
    cost = pl.CostEstimate(
        flops=int(B_pad * per_row_flops),
        transcendentals=int(B_pad * (2 * NUM_LAYERS + 1)),
        bytes_accessed=int(weight_bytes + x.size * x.dtype.itemsize + B_pad * 4),
    )

    out = pl.pallas_call(
        transformer_classifier_kernel,
        out_shape=jax.ShapeDtypeStruct((B_pad, 1), jnp.float32),
        grid=(B_pad // tb,),
        in_specs=[pl.BlockSpec((tb, D_MODEL), lambda i: (i, 0))]
                 + [weight_spec(w) for w in weights],
        out_specs=pl.BlockSpec((tb, 1), lambda i: (i, 0)),
        compiler_params=pltpu.CompilerParams(
            dimension_semantics=("parallel",),
            vmem_limit_bytes=vmem_limit),
        cost_estimate=cost,
    )(x, *weights)
    return out[:B, 0]                                    # matches .squeeze(1) -> (B,)


def init_params(key, num_drugs, num_genes, num_diseases):
    ks = jax.random.split(key, 15)
    def nrm(k, shape, scale=0.02):
        return (scale * jax.random.normal(k, shape)).astype(jnp.float32)
    L, D, FF = NUM_LAYERS, D_MODEL, FF_DIM
    return {
        "drug_emb":    nrm(ks[0], (num_drugs, EMBED_DIM), 1.0),
        "gene_emb":    nrm(ks[1], (num_genes, EMBED_DIM), 1.0),
        "disease_emb": nrm(ks[2], (num_diseases, EMBED_DIM), 1.0),
        # transformer layer weights, stacked on a leading layer axis,
        # pre-transposed to (in_features, out_features)
        "inproj_w":  nrm(ks[3], (L, D, 3 * D)),
        "inproj_b":  nrm(ks[4], (L, 3 * D)),
        "attnout_w": nrm(ks[5], (L, D, D)),
        "attnout_b": nrm(ks[6], (L, D)),
        "ln1_g": jnp.ones((L, D), jnp.float32),
        "ln1_b": jnp.zeros((L, D), jnp.float32),
        "ff1_w": nrm(ks[7], (L, D, FF)),
        "ff1_b": nrm(ks[8], (L, FF)),
        "ff2_w": nrm(ks[9], (L, FF, D)),
        "ff2_b": nrm(ks[10], (L, D)),
        "ln2_g": jnp.ones((L, D), jnp.float32),
        "ln2_b": jnp.zeros((L, D), jnp.float32),
        # feature_extractor (frozen in the original module) + classifier
        "fe_w":  nrm(ks[11], (D, FEAT_DIM)),
        "fe_b":  nrm(ks[12], (1, FEAT_DIM)),
        "cls_w": nrm(ks[13], (FEAT_DIM, 1)),
        "cls_b": nrm(ks[14], (1, 1)),
    }


def reference_forward(params, drugs, genes, diseases):
    """Pure-JAX f32 reference mirroring the PyTorch eval-mode forward."""
    x = jnp.concatenate(
        [params["drug_emb"][drugs], params["gene_emb"][genes],
         params["disease_emb"][diseases]], axis=1)
    for l in range(NUM_LAYERS):
        qkv = x @ params["inproj_w"][l] + params["inproj_b"][l]
        v = qkv[:, 2 * D_MODEL:]
        sa = v @ params["attnout_w"][l] + params["attnout_b"][l]
        x = _layer_norm(x + sa, params["ln1_g"][l], params["ln1_b"][l])
        h = jax.nn.relu(x @ params["ff1_w"][l] + params["ff1_b"][l])
        ff = h @ params["ff2_w"][l] + params["ff2_b"][l]
        x = _layer_norm(x + ff, params["ln2_g"][l], params["ln2_b"][l])
    feat = jax.nn.relu(x @ params["fe_w"] + params["fe_b"])
    return jax.nn.sigmoid(feat @ params["cls_w"] + params["cls_b"])[:, 0]


if __name__ == "__main__":
    key = jax.random.PRNGKey(0)
    pkey, dkey, gkey, skey = jax.random.split(key, 4)
    num_drugs, num_genes, num_diseases, B = 16, 16, 16, 8

    params = init_params(pkey, num_drugs, num_genes, num_diseases)
    drugs = jax.random.randint(dkey, (B,), 0, num_drugs, dtype=jnp.int32)
    genes = jax.random.randint(gkey, (B,), 0, num_genes, dtype=jnp.int32)
    diseases = jax.random.randint(skey, (B,), 0, num_diseases, dtype=jnp.int32)

    out = jax.block_until_ready(
        transformer_classifier_forward(params, drugs, genes, diseases))
    ref = jax.block_until_ready(
        reference_forward(params, drugs, genes, diseases))

    assert out.shape == (B,)
    assert bool(jnp.all(jnp.isfinite(out)))
    # bf16 matmul operands vs f32 reference: expect ~1e-3..1e-2 level differences
    assert bool(jnp.allclose(out, ref, atol=2e-2, rtol=2e-2)), (out, ref)
    print("KERNEL_OK")
</pallas_src>

<mosaic_0001>
module attributes {stable_mosaic.version = 11 : i64} {
  func.func @transformer_classifier_kernel(%arg0: i32, %arg1: memref<16x96xbf16, #tpu.memory_space<vmem>>, %arg2: memref<2x96x96xbf16, #tpu.memory_space<vmem>>, %arg3: memref<2x96xf32, #tpu.memory_space<vmem>>, %arg4: memref<2x96xf32, #tpu.memory_space<vmem>>, %arg5: memref<2x96xf32, #tpu.memory_space<vmem>>, %arg6: memref<2x96x2048xbf16, #tpu.memory_space<vmem>>, %arg7: memref<2x2048xf32, #tpu.memory_space<vmem>>, %arg8: memref<2x2048x96xbf16, #tpu.memory_space<vmem>>, %arg9: memref<2x96xf32, #tpu.memory_space<vmem>>, %arg10: memref<2x96xf32, #tpu.memory_space<vmem>>, %arg11: memref<2x96xf32, #tpu.memory_space<vmem>>, %arg12: memref<96x64xbf16, #tpu.memory_space<vmem>>, %arg13: memref<1x64xf32, #tpu.memory_space<vmem>>, %arg14: memref<1x64xf32, #tpu.memory_space<vmem>>, %arg15: memref<1x1xf32, #tpu.memory_space<vmem>>, %arg16: memref<16x1xf32, #tpu.memory_space<vmem>>) attributes {dimension_semantics = [#tpu.dimension_semantics<parallel>], iteration_bounds = array<i64: 1>, scalar_prefetch = 0 : i64, scratch_operands = 0 : i64, tpu.core_type = #tpu.core_type<tc>, window_params = [{transform_indices = @transform_0, window_bounds = array<i64: 16, 96>}, {pipeline_mode = #tpu.pipeline_mode<synchronous>, transform_indices = @transform_1, window_bounds = array<i64: 2, 96, 96>}, {pipeline_mode = #tpu.pipeline_mode<synchronous>, transform_indices = @transform_2, window_bounds = array<i64: 2, 96>}, {pipeline_mode = #tpu.pipeline_mode<synchronous>, transform_indices = @transform_3, window_bounds = array<i64: 2, 96>}, {pipeline_mode = #tpu.pipeline_mode<synchronous>, transform_indices = @transform_4, window_bounds = array<i64: 2, 96>}, {pipeline_mode = #tpu.pipeline_mode<synchronous>, transform_indices = @transform_5, window_bounds = array<i64: 2, 96, 2048>}, {pipeline_mode = #tpu.pipeline_mode<synchronous>, transform_indices = @transform_6, window_bounds = array<i64: 2, 2048>}, {pipeline_mode = #tpu.pipeline_mode<synchronous>, transform_indices = @transform_7, window_bounds = array<i64: 2, 2048, 96>}, {pipeline_mode = #tpu.pipeline_mode<synchronous>, transform_indices = @transform_8, window_bounds = array<i64: 2, 96>}, {pipeline_mode = #tpu.pipeline_mode<synchronous>, transform_indices = @transform_9, window_bounds = array<i64: 2, 96>}, {pipeline_mode = #tpu.pipeline_mode<synchronous>, transform_indices = @transform_10, window_bounds = array<i64: 2, 96>}, {pipeline_mode = #tpu.pipeline_mode<synchronous>, transform_indices = @transform_11, window_bounds = array<i64: 96, 64>}, {pipeline_mode = #tpu.pipeline_mode<synchronous>, transform_indices = @transform_12, window_bounds = array<i64: 1, 64>}, {pipeline_mode = #tpu.pipeline_mode<synchronous>, transform_indices = @transform_13, window_bounds = array<i64: 1, 64>}, {pipeline_mode = #tpu.pipeline_mode<synchronous>, transform_indices = @transform_14, window_bounds = array<i64: 1, 1>}, {transform_indices = @transform_15, window_bounds = array<i64: 16, 1>}]} {
    %c0 = arith.constant 0 : index
    %c0_0 = arith.constant 0 : index
    %0 = vector.load %arg1[%c0, %c0_0] : memref<16x96xbf16, #tpu.memory_space<vmem>>, vector<16x96xbf16>
    %1 = arith.extf %0 : vector<16x96xbf16> to vector<16x96xf32>
    %2 = arith.truncf %1 : vector<16x96xf32> to vector<16x96xbf16>
    %c0_1 = arith.constant 0 : index
    %c0_2 = arith.constant 0 : index
    %c0_3 = arith.constant 0 : index
    %3 = vector.load %arg2[%c0_1, %c0_2, %c0_3] : memref<2x96x96xbf16, #tpu.memory_space<vmem>>, vector<1x96x96xbf16>
    %4 = vector.shape_cast %3 : vector<1x96x96xbf16> to vector<96x96xbf16>
    %cst = arith.constant dense<0.000000e+00> : vector<16x96xf32>
    %5 = tpu.matmul %2, %4, %cst {dimension_numbers = #tpu.dot_dimension_numbers<[1], [0], [0], [1], [0, 0, 1, 1], [], []>} : vector<16x96xbf16>, vector<96x96xbf16>, vector<16x96xf32> -> vector<16x96xf32>
    %c0_4 = arith.constant 0 : index
    %c0_5 = arith.constant 0 : index
    %6 = vector.load %arg3[%c0_4, %c0_5] : memref<2x96xf32, #tpu.memory_space<vmem>>, vector<1x96xf32>
    %7 = vector.broadcast %6 : vector<1x96xf32> to vector<16x96xf32>
    %8 = arith.addf %5, %7 : vector<16x96xf32>
    %9 = arith.addf %1, %8 : vector<16x96xf32>
    %c0_6 = arith.constant 0 : index
    %c0_7 = arith.constant 0 : index
    %10 = vector.load %arg4[%c0_6, %c0_7] : memref<2x96xf32, #tpu.memory_space<vmem>>, vector<1x96xf32>
    %c0_8 = arith.constant 0 : index
    %c0_9 = arith.constant 0 : index
    %11 = vector.load %arg5[%c0_8, %c0_9] : memref<2x96xf32, #tpu.memory_space<vmem>>, vector<1x96xf32>
    %cst_10 = arith.constant dense<0.000000e+00> : vector<16xf32>
    %12 = vector.multi_reduction <add>, %9, %cst_10 [1] : vector<16x96xf32> to vector<16xf32>
    %13 = vector.shape_cast %12 : vector<16xf32> to vector<16x1xf32>
    %cst_11 = arith.constant 9.600000e+01 : f32
    %14 = vector.broadcast %cst_11 : f32 to vector<16x1xf32>
    %15 = arith.divf %13, %14 : vector<16x1xf32>
    %16 = vector.broadcast %15 : vector<16x1xf32> to vector<16x96xf32>
    %17 = arith.subf %9, %16 : vector<16x96xf32>
    %18 = arith.mulf %17, %17 : vector<16x96xf32>
    %cst_12 = arith.constant dense<0.000000e+00> : vector<16xf32>
    %19 = vector.multi_reduction <add>, %18, %cst_12 [1] : vector<16x96xf32> to vector<16xf32>
    %20 = vector.shape_cast %19 : vector<16xf32> to vector<16x1xf32>
    %cst_13 = arith.constant 9.600000e+01 : f32
    %21 = vector.broadcast %cst_13 : f32 to vector<16x1xf32>
    %22 = arith.divf %20, %21 : vector<16x1xf32>
    %cst_14 = arith.constant 9.99999974E-6 : f32
    %23 = vector.broadcast %cst_14 : f32 to vector<16x1xf32>
    %24 = arith.addf %22, %23 : vector<16x1xf32>
    %25 = math.rsqrt %24 : vector<16x1xf32>
    %26 = vector.broadcast %25 : vector<16x1xf32> to vector<16x96xf32>
    %27 = arith.mulf %17, %26 : vector<16x96xf32>
    %28 = vector.broadcast %10 : vector<1x96xf32> to vector<16x96xf32>
    %29 = arith.mulf %27, %28 : vector<16x96xf32>
    %30 = vector.broadcast %11 : vector<1x96xf32> to vector<16x96xf32>
    %31 = arith.addf %29, %30 : vector<16x96xf32>
    %32 = arith.truncf %31 : vector<16x96xf32> to vector<16x96xbf16>
    %c0_15 = arith.constant 0 : index
    %c0_16 = arith.constant 0 : index
    %c0_17 = arith.constant 0 : index
    %33 = vector.load %arg6[%c0_15, %c0_16, %c0_17] : memref<2x96x2048xbf16, #tpu.memory_space<vmem>>, vector<1x96x2048xbf16>
    %34 = vector.shape_cast %33 : vector<1x96x2048xbf16> to vector<96x2048xbf16>
    %cst_18 = arith.constant dense<0.000000e+00> : vector<16x2048xf32>
    %35 = tpu.matmul %32, %34, %cst_18 {dimension_numbers = #tpu.dot_dimension_numbers<[1], [0], [0], [1], [0, 0, 1, 1], [], []>} : vector<16x96xbf16>, vector<96x2048xbf16>, vector<16x2048xf32> -> vector<16x2048xf32>
    %c0_19 = arith.constant 0 : index
    %c0_20 = arith.constant 0 : index
    %36 = vector.load %arg7[%c0_19, %c0_20] : memref<2x2048xf32, #tpu.memory_space<vmem>>, vector<1x2048xf32>
    %37 = vector.broadcast %36 : vector<1x2048xf32> to vector<16x2048xf32>
    %38 = arith.addf %35, %37 : vector<16x2048xf32>
    %cst_21 = arith.constant 0.000000e+00 : f32
    %39 = vector.broadcast %cst_21 : f32 to vector<16x2048xf32>
    %40 = arith.maximumf %38, %39 : vector<16x2048xf32>
    %41 = arith.truncf %40 : vector<16x2048xf32> to vector<16x2048xbf16>
    %c0_22 = arith.constant 0 : index
    %c0_23 = arith.constant 0 : index
    %c0_24 = arith.constant 0 : index
    %42 = vector.load %arg8[%c0_22, %c0_23, %c0_24] : memref<2x2048x96xbf16, #tpu.memory_space<vmem>>, vector<1x2048x96xbf16>
    %43 = vector.shape_cast %42 : vector<1x2048x96xbf16> to vector<2048x96xbf16>
    %cst_25 = arith.constant dense<0.000000e+00> : vector<16x96xf32>
    %44 = tpu.matmul %41, %43, %cst_25 {dimension_numbers = #tpu.dot_dimension_numbers<[1], [0], [0], [1], [0, 0, 1, 1], [], []>} : vector<16x2048xbf16>, vector<2048x96xbf16>, vector<16x96xf32> -> vector<16x96xf32>
    %c0_26 = arith.constant 0 : index
    %c0_27 = arith.constant 0 : index
    %45 = vector.load %arg9[%c0_26, %c0_27] : memref<2x96xf32, #tpu.memory_space<vmem>>, vector<1x96xf32>
    %46 = vector.broadcast %45 : vector<1x96xf32> to vector<16x96xf32>
    %47 = arith.addf %44, %46 : vector<16x96xf32>
    %48 = arith.addf %31, %47 : vector<16x96xf32>
    %c0_28 = arith.constant 0 : index
    %c0_29 = arith.constant 0 : index
    %49 = vector.load %arg10[%c0_28, %c0_29] : memref<2x96xf32, #tpu.memory_space<vmem>>, vector<1x96xf32>
    %c0_30 = arith.constant 0 : index
    %c0_31 = arith.constant 0 : index
    %50 = vector.load %arg11[%c0_30, %c0_31] : memref<2x96xf32, #tpu.memory_space<vmem>>, vector<1x96xf32>
    %cst_32 = arith.constant dense<0.000000e+00> : vector<16xf32>
    %51 = vector.multi_reduction <add>, %48, %cst_32 [1] : vector<16x96xf32> to vector<16xf32>
    %52 = vector.shape_cast %51 : vector<16xf32> to vector<16x1xf32>
    %cst_33 = arith.constant 9.600000e+01 : f32
    %53 = vector.broadcast %cst_33 : f32 to vector<16x1xf32>
    %54 = arith.divf %52, %53 : vector<16x1xf32>
    %55 = vector.broadcast %54 : vector<16x1xf32> to vector<16x96xf32>
    %56 = arith.subf %48, %55 : vector<16x96xf32>
    %57 = arith.mulf %56, %56 : vector<16x96xf32>
    %cst_34 = arith.constant dense<0.000000e+00> : vector<16xf32>
    %58 = vector.multi_reduction <add>, %57, %cst_34 [1] : vector<16x96xf32> to vector<16xf32>
    %59 = vector.shape_cast %58 : vector<16xf32> to vector<16x1xf32>
    %cst_35 = arith.constant 9.600000e+01 : f32
    %60 = vector.broadcast %cst_35 : f32 to vector<16x1xf32>
    %61 = arith.divf %59, %60 : vector<16x1xf32>
    %cst_36 = arith.constant 9.99999974E-6 : f32
    %62 = vector.broadcast %cst_36 : f32 to vector<16x1xf32>
    %63 = arith.addf %61, %62 : vector<16x1xf32>
    %64 = math.rsqrt %63 : vector<16x1xf32>
    %65 = vector.broadcast %64 : vector<16x1xf32> to vector<16x96xf32>
    %66 = arith.mulf %56, %65 : vector<16x96xf32>
    %67 = vector.broadcast %49 : vector<1x96xf32> to vector<16x96xf32>
    %68 = arith.mulf %66, %67 : vector<16x96xf32>
    %69 = vector.broadcast %50 : vector<1x96xf32> to vector<16x96xf32>
    %70 = arith.addf %68, %69 : vector<16x96xf32>
    %71 = arith.truncf %70 : vector<16x96xf32> to vector<16x96xbf16>
    %c1 = arith.constant 1 : index
    %c0_37 = arith.constant 0 : index
    %c0_38 = arith.constant 0 : index
    %72 = vector.load %arg2[%c1, %c0_37, %c0_38] : memref<2x96x96xbf16, #tpu.memory_space<vmem>>, vector<1x96x96xbf16>
    %73 = vector.shape_cast %72 : vector<1x96x96xbf16> to vector<96x96xbf16>
    %cst_39 = arith.constant dense<0.000000e+00> : vector<16x96xf32>
    %74 = tpu.matmul %71, %73, %cst_39 {dimension_numbers = #tpu.dot_dimension_numbers<[1], [0], [0], [1], [0, 0, 1, 1], [], []>} : vector<16x96xbf16>, vector<96x96xbf16>, vector<16x96xf32> -> vector<16x96xf32>
    %c1_40 = arith.constant 1 : index
    %c0_41 = arith.constant 0 : index
    %75 = vector.load %arg3[%c1_40, %c0_41] : memref<2x96xf32, #tpu.memory_space<vmem>>, vector<1x96xf32>
    %76 = vector.broadcast %75 : vector<1x96xf32> to vector<16x96xf32>
    %77 = arith.addf %74, %76 : vector<16x96xf32>
    %78 = arith.addf %70, %77 : vector<16x96xf32>
    %c1_42 = arith.constant 1 : index
    %c0_43 = arith.constant 0 : index
    %79 = vector.load %arg4[%c1_42, %c0_43] : memref<2x96xf32, #tpu.memory_space<vmem>>, vector<1x96xf32>
    %c1_44 = arith.constant 1 : index
    %c0_45 = arith.constant 0 : index
    %80 = vector.load %arg5[%c1_44, %c0_45] : memref<2x96xf32, #tpu.memory_space<vmem>>, vector<1x96xf32>
    %cst_46 = arith.constant dense<0.000000e+00> : vector<16xf32>
    %81 = vector.multi_reduction <add>, %78, %cst_46 [1] : vector<16x96xf32> to vector<16xf32>
    %82 = vector.shape_cast %81 : vector<16xf32> to vector<16x1xf32>
    %cst_47 = arith.constant 9.600000e+01 : f32
    %83 = vector.broadcast %cst_47 : f32 to vector<16x1xf32>
    %84 = arith.divf %82, %83 : vector<16x1xf32>
    %85 = vector.broadcast %84 : vector<16x1xf32> to vector<16x96xf32>
    %86 = arith.subf %78, %85 : vector<16x96xf32>
    %87 = arith.mulf %86, %86 : vector<16x96xf32>
    %cst_48 = arith.constant dense<0.000000e+00> : vector<16xf32>
    %88 = vector.multi_reduction <add>, %87, %cst_48 [1] : vector<16x96xf32> to vector<16xf32>
    %89 = vector.shape_cast %88 : vector<16xf32> to vector<16x1xf32>
    %cst_49 = arith.constant 9.600000e+01 : f32
    %90 = vector.broadcast %cst_49 : f32 to vector<16x1xf32>
    %91 = arith.divf %89, %90 : vector<16x1xf32>
    %cst_50 = arith.constant 9.99999974E-6 : f32
    %92 = vector.broadcast %cst_50 : f32 to vector<16x1xf32>
    %93 = arith.addf %91, %92 : vector<16x1xf32>
    %94 = math.rsqrt %93 : vector<16x1xf32>
    %95 = vector.broadcast %94 : vector<16x1xf32> to vector<16x96xf32>
    %96 = arith.mulf %86, %95 : vector<16x96xf32>
    %97 = vector.broadcast %79 : vector<1x96xf32> to vector<16x96xf32>
    %98 = arith.mulf %96, %97 : vector<16x96xf32>
    %99 = vector.broadcast %80 : vector<1x96xf32> to vector<16x96xf32>
    %100 = arith.addf %98, %99 : vector<16x96xf32>
    %101 = arith.truncf %100 : vector<16x96xf32> to vector<16x96xbf16>
    %c1_51 = arith.constant 1 : index
    %c0_52 = arith.constant 0 : index
    %c0_53 = arith.constant 0 : index
    %102 = vector.load %arg6[%c1_51, %c0_52, %c0_53] : memref<2x96x2048xbf16, #tpu.memory_space<vmem>>, vector<1x96x2048xbf16>
    %103 = vector.shape_cast %102 : vector<1x96x2048xbf16> to vector<96x2048xbf16>
    %cst_54 = arith.constant dense<0.000000e+00> : vector<16x2048xf32>
    %104 = tpu.matmul %101, %103, %cst_54 {dimension_numbers = #tpu.dot_dimension_numbers<[1], [0], [0], [1], [0, 0, 1, 1], [], []>} : vector<16x96xbf16>, vector<96x2048xbf16>, vector<16x2048xf32> -> vector<16x2048xf32>
    %c1_55 = arith.constant 1 : index
    %c0_56 = arith.constant 0 : index
    %105 = vector.load %arg7[%c1_55, %c0_56] : memref<2x2048xf32, #tpu.memory_space<vmem>>, vector<1x2048xf32>
    %106 = vector.broadcast %105 : vector<1x2048xf32> to vector<16x2048xf32>
    %107 = arith.addf %104, %106 : vector<16x2048xf32>
    %cst_57 = arith.constant 0.000000e+00 : f32
    %108 = vector.broadcast %cst_57 : f32 to vector<16x2048xf32>
    %109 = arith.maximumf %107, %108 : vector<16x2048xf32>
    %110 = arith.truncf %109 : vector<16x2048xf32> to vector<16x2048xbf16>
    %c1_58 = arith.constant 1 : index
    %c0_59 = arith.constant 0 : index
    %c0_60 = arith.constant 0 : index
    %111 = vector.load %arg8[%c1_58, %c0_59, %c0_60] : memref<2x2048x96xbf16, #tpu.memory_space<vmem>>, vector<1x2048x96xbf16>
    %112 = vector.shape_cast %111 : vector<1x2048x96xbf16> to vector<2048x96xbf16>
    %cst_61 = arith.constant dense<0.000000e+00> : vector<16x96xf32>
    %113 = tpu.matmul %110, %112, %cst_61 {dimension_numbers = #tpu.dot_dimension_numbers<[1], [0], [0], [1], [0, 0, 1, 1], [], []>} : vector<16x2048xbf16>, vector<2048x96xbf16>, vector<16x96xf32> -> vector<16x96xf32>
    %c1_62 = arith.constant 1 : index
    %c0_63 = arith.constant 0 : index
    %114 = vector.load %arg9[%c1_62, %c0_63] : memref<2x96xf32, #tpu.memory_space<vmem>>, vector<1x96xf32>
    %115 = vector.broadcast %114 : vector<1x96xf32> to vector<16x96xf32>
    %116 = arith.addf %113, %115 : vector<16x96xf32>
    %117 = arith.addf %100, %116 : vector<16x96xf32>
    %c1_64 = arith.constant 1 : index
    %c0_65 = arith.constant 0 : index
    %118 = vector.load %arg10[%c1_64, %c0_65] : memref<2x96xf32, #tpu.memory_space<vmem>>, vector<1x96xf32>
    %c1_66 = arith.constant 1 : index
    %c0_67 = arith.constant 0 : index
    %119 = vector.load %arg11[%c1_66, %c0_67] : memref<2x96xf32, #tpu.memory_space<vmem>>, vector<1x96xf32>
    %cst_68 = arith.constant dense<0.000000e+00> : vector<16xf32>
    %120 = vector.multi_reduction <add>, %117, %cst_68 [1] : vector<16x96xf32> to vector<16xf32>
    %121 = vector.shape_cast %120 : vector<16xf32> to vector<16x1xf32>
    %cst_69 = arith.constant 9.600000e+01 : f32
    %122 = vector.broadcast %cst_69 : f32 to vector<16x1xf32>
    %123 = arith.divf %121, %122 : vector<16x1xf32>
    %124 = vector.broadcast %123 : vector<16x1xf32> to vector<16x96xf32>
    %125 = arith.subf %117, %124 : vector<16x96xf32>
    %126 = arith.mulf %125, %125 : vector<16x96xf32>
    %cst_70 = arith.constant dense<0.000000e+00> : vector<16xf32>
    %127 = vector.multi_reduction <add>, %126, %cst_70 [1] : vector<16x96xf32> to vector<16xf32>
    %128 = vector.shape_cast %127 : vector<16xf32> to vector<16x1xf32>
    %cst_71 = arith.constant 9.600000e+01 : f32
    %129 = vector.broadcast %cst_71 : f32 to vector<16x1xf32>
    %130 = arith.divf %128, %129 : vector<16x1xf32>
    %cst_72 = arith.constant 9.99999974E-6 : f32
    %131 = vector.broadcast %cst_72 : f32 to vector<16x1xf32>
    %132 = arith.addf %130, %131 : vector<16x1xf32>
    %133 = math.rsqrt %132 : vector<16x1xf32>
    %134 = vector.broadcast %133 : vector<16x1xf32> to vector<16x96xf32>
    %135 = arith.mulf %125, %134 : vector<16x96xf32>
    %136 = vector.broadcast %118 : vector<1x96xf32> to vector<16x96xf32>
    %137 = arith.mulf %135, %136 : vector<16x96xf32>
    %138 = vector.broadcast %119 : vector<1x96xf32> to vector<16x96xf32>
    %139 = arith.addf %137, %138 : vector<16x96xf32>
    %140 = arith.truncf %139 : vector<16x96xf32> to vector<16x96xbf16>
    %c0_73 = arith.constant 0 : index
    %c0_74 = arith.constant 0 : index
    %141 = vector.load %arg12[%c0_73, %c0_74] : memref<96x64xbf16, #tpu.memory_space<vmem>>, vector<96x64xbf16>
    %cst_75 = arith.constant dense<0.000000e+00> : vector<16x64xf32>
    %142 = tpu.matmul %140, %141, %cst_75 {dimension_numbers = #tpu.dot_dimension_numbers<[1], [0], [0], [1], [0, 0, 1, 1], [], []>} : vector<16x96xbf16>, vector<96x64xbf16>, vector<16x64xf32> -> vector<16x64xf32>
    %c0_76 = arith.constant 0 : index
    %c0_77 = arith.constant 0 : index
    %143 = vector.load %arg13[%c0_76, %c0_77] : memref<1x64xf32, #tpu.memory_space<vmem>>, vector<1x64xf32>
    %144 = vector.broadcast %143 : vector<1x64xf32> to vector<16x64xf32>
    %145 = arith.addf %142, %144 : vector<16x64xf32>
    %cst_78 = arith.constant 0.000000e+00 : f32
    %146 = vector.broadcast %cst_78 : f32 to vector<16x64xf32>
    %147 = arith.maximumf %145, %146 : vector<16x64xf32>
    %c0_79 = arith.constant 0 : index
    %c0_80 = arith.constant 0 : index
    %148 = vector.load %arg14[%c0_79, %c0_80] : memref<1x64xf32, #tpu.memory_space<vmem>>, vector<1x64xf32>
    %149 = vector.broadcast %148 : vector<1x64xf32> to vector<16x64xf32>
    %150 = arith.mulf %147, %149 : vector<16x64xf32>
    %cst_81 = arith.constant dense<0.000000e+00> : vector<16xf32>
    %151 = vector.multi_reduction <add>, %150, %cst_81 [1] : vector<16x64xf32> to vector<16xf32>
    %152 = vector.shape_cast %151 : vector<16xf32> to vector<16x1xf32>
    %c0_82 = arith.constant 0 : index
    %c0_83 = arith.constant 0 : index
    %153 = vector.load %arg15[%c0_82, %c0_83] : memref<1x1xf32, #tpu.memory_space<vmem>>, vector<1x1xf32>
    %154 = vector.broadcast %153 : vector<1x1xf32> to vector<16x1xf32>
    %155 = arith.addf %152, %154 : vector<16x1xf32>
    %156 = arith.negf %155 : vector<16x1xf32>
    %157 = math.exp %156 : vector<16x1xf32>
    %cst_84 = arith.constant 1.000000e+00 : f32
    %158 = vector.broadcast %cst_84 : f32 to vector<16x1xf32>
    %159 = arith.addf %158, %157 : vector<16x1xf32>
    %160 = arith.divf %158, %159 : vector<16x1xf32>
    %c0_85 = arith.constant 0 : index
    %c0_86 = arith.constant 0 : index
    %161 = vector.load %arg16[%c0_85, %c0_86] : memref<16x1xf32, #tpu.memory_space<vmem>>, vector<16x1xf32>
    tpu.vector_store %arg16[%c0_85, %c0_86], %160 {strides = array<i32>} : memref<16x1xf32, #tpu.memory_space<vmem>>, vector<16x1xf32>,
    return
  }
  func.func @transform_0(%arg0: i32) -> (i32, i32) {
    %c0_i32 = arith.constant 0 : i32
    %c0_i32_0 = arith.constant 0 : i32
    return %arg0, %c0_i32 : i32, i32
  }
  func.func @transform_1(%arg0: i32) -> (i32, i32, i32) {
    %c0_i32 = arith.constant 0 : i32
    %c0_i32_0 = arith.constant 0 : i32
    %c0_i32_1 = arith.constant 0 : i32
    %c0_i32_2 = arith.constant 0 : i32
    return %c0_i32, %c0_i32_0, %c0_i32_1 : i32, i32, i32
  }
  func.func @transform_2(%arg0: i32) -> (i32, i32) {
    %c0_i32 = arith.constant 0 : i32
    %c0_i32_0 = arith.constant 0 : i32
    %c0_i32_1 = arith.constant 0 : i32
    return %c0_i32, %c0_i32_0 : i32, i32
  }
  func.func @transform_3(%arg0: i32) -> (i32, i32) {
    %c0_i32 = arith.constant 0 : i32
    %c0_i32_0 = arith.constant 0 : i32
    %c0_i32_1 = arith.constant 0 : i32
    return %c0_i32, %c0_i32_0 : i32, i32
  }
  func.func @transform_4(%arg0: i32) -> (i32, i32) {
    %c0_i32 = arith.constant 0 : i32
    %c0_i32_0 = arith.constant 0 : i32
    %c0_i32_1 = arith.constant 0 : i32
    return %c0_i32, %c0_i32_0 : i32, i32
  }
  func.func @transform_5(%arg0: i32) -> (i32, i32, i32) {
    %c0_i32 = arith.constant 0 : i32
    %c0_i32_0 = arith.constant 0 : i32
    %c0_i32_1 = arith.constant 0 : i32
    %c0_i32_2 = arith.constant 0 : i32
    return %c0_i32, %c0_i32_0, %c0_i32_1 : i32, i32, i32
  }
  func.func @transform_6(%arg0: i32) -> (i32, i32) {
    %c0_i32 = arith.constant 0 : i32
    %c0_i32_0 = arith.constant 0 : i32
    %c0_i32_1 = arith.constant 0 : i32
    return %c0_i32, %c0_i32_0 : i32, i32
  }
  func.func @transform_7(%arg0: i32) -> (i32, i32, i32) {
    %c0_i32 = arith.constant 0 : i32
    %c0_i32_0 = arith.constant 0 : i32
    %c0_i32_1 = arith.constant 0 : i32
    %c0_i32_2 = arith.constant 0 : i32
    return %c0_i32, %c0_i32_0, %c0_i32_1 : i32, i32, i32
  }
  func.func @transform_8(%arg0: i32) -> (i32, i32) {
    %c0_i32 = arith.constant 0 : i32
    %c0_i32_0 = arith.constant 0 : i32
    %c0_i32_1 = arith.constant 0 : i32
    return %c0_i32, %c0_i32_0 : i32, i32
  }
  func.func @transform_9(%arg0: i32) -> (i32, i32) {
    %c0_i32 = arith.constant 0 : i32
    %c0_i32_0 = arith.constant 0 : i32
    %c0_i32_1 = arith.constant 0 : i32
    return %c0_i32, %c0_i32_0 : i32, i32
  }
  func.func @transform_10(%arg0: i32) -> (i32, i32) {
    %c0_i32 = arith.constant 0 : i32
    %c0_i32_0 = arith.constant 0 : i32
    %c0_i32_1 = arith.constant 0 : i32
    return %c0_i32, %c0_i32_0 : i32, i32
  }
  func.func @transform_11(%arg0: i32) -> (i32, i32) {
    %c0_i32 = arith.constant 0 : i32
    %c0_i32_0 = arith.constant 0 : i32
    %c0_i32_1 = arith.constant 0 : i32
    return %c0_i32, %c0_i32_0 : i32, i32
  }
  func.func @transform_12(%arg0: i32) -> (i32, i32) {
    %c0_i32 = arith.constant 0 : i32
    %c0_i32_0 = arith.constant 0 : i32
    %c0_i32_1 = arith.constant 0 : i32
    return %c0_i32, %c0_i32_0 : i32, i32
  }
  func.func @transform_13(%arg0: i32) -> (i32, i32) {
    %c0_i32 = arith.constant 0 : i32
    %c0_i32_0 = arith.constant 0 : i32
    %c0_i32_1 = arith.constant 0 : i32
    return %c0_i32, %c0_i32_0 : i32, i32
  }
  func.func @transform_14(%arg0: i32) -> (i32, i32) {
    %c0_i32 = arith.constant 0 : i32
    %c0_i32_0 = arith.constant 0 : i32
    %c0_i32_1 = arith.constant 0 : i32
    return %c0_i32, %c0_i32_0 : i32, i32
  }
  func.func @transform_15(%arg0: i32) -> (i32, i32) {
    %c0_i32 = arith.constant 0 : i32
    %c0_i32_0 = arith.constant 0 : i32
    return %arg0, %c0_i32 : i32, i32
  }
}

</mosaic_0001>

<bundles_post_ra>
// kernel: tpu_custom_call.1
= control target key start
LH: loop header
LB: loop body
LE: loop exit
PB: predicated region body
PF: predicated region fallthrough
CT: control target
= control target key end

     0   :  { %v6999_v0 = vmov 0.0   ;;  %vm7000_vm0 = vmmov 0   ;;  %vm115_vm1 = vcmask 785408   ;;  %vm5370_vm2 = vcmask 523264   ;;  %s8787_s1 = inlined_call_operand.vmem [shape: bf16[2,96,96], index: 1, kind: input, shape index: {}]   ;;  %s8788_s0 = inlined_call_operand.vmem [shape: bf16[16,96], index: 0, kind: input, shape index: {}]   ;;  %s8789_s2 = inlined_call_operand.vmem [shape: f32[2,96], index: 2, kind: input, shape index: {}]   ;;  %s8790_s5 = inlined_call_operand.vmem [shape: bf16[2,96,2048], index: 5, kind: input, shape index: {}]   ;;  %s8791_s7 = inlined_call_operand.vmem [shape: bf16[2,2048,96], index: 7, kind: input, shape index: {}]   ;;  %s8792_s3 = inlined_call_operand.vmem [shape: f32[2,96], index: 3, kind: input, shape index: {}]   ;;  %s8793_s4 = inlined_call_operand.vmem [shape: f32[2,96], index: 4, kind: input, shape index: {}]   ;;  %s8794_s6 = inlined_call_operand.vmem [shape: f32[2,2048], index: 6, kind: input, shape index: {}]   ;;  %s8795_s8 = inlined_call_operand.vmem [shape: f32[2,96], index: 8, kind: input, shape index: {}]   ;;  %s8796_s9 = inlined_call_operand.vmem [shape: f32[2,96], index: 9, kind: input, shape index: {}]   ;;  %s8797_s10 = inlined_call_operand.vmem [shape: f32[2,96], index: 10, kind: input, shape index: {}]   ;;  %s8798_s11 = inlined_call_operand.vmem [shape: bf16[96,64], index: 11, kind: input, shape index: {}]   ;;  %s8799_s14 = inlined_call_operand.<no memory space> [shape: f32[1,1], index: 14, kind: input, shape index: {}]   ;;  %s8800_s12 = inlined_call_operand.vmem [shape: f32[1,64], index: 12, kind: input, shape index: {}]   ;;  %s8801_s13 = inlined_call_operand.vmem [shape: f32[1,64], index: 13, kind: input, shape index: {}]   ;;  %s8802_s15 = inlined_call_operand.vmem [shape: f32[16,1], index: 15, kind: output, shape index: {}]  }
   0x1   :  { %6648 = vmatprep.subr.bf16.mxu0 %v6999_v0  ;;  %v6699_v1 = vld [vmem:[%s8787_s1] sm:$0xff]   ;;  %6660 = vmatprep.mubr.msk.bf16.mxu0 %vm7000_vm0, %v6999_v0  ;;  %v6700_v2 = vld [vmem:[%s8787_s1 + $0x8] sm:$0xff]   ;;  %v6701_v3 = vld [vmem:[%s8787_s1 + $0x10] sm:$0xff]   ;;  %vm5398_vm3 = vcmask 7168  }
   0x2   :  { %6649 = vmatpush3.bf16.msra.mxu0 %v6699_v1  ;;  %v6702_v4 = vld [vmem:[%s8787_s1 + $0x18] sm:$0xff]   ;;  %v6703_v5 = vld [vmem:[%s8787_s1 + $0x20] sm:$0xff]   ;;  %v6704_v6 = vld [vmem:[%s8787_s1 + $0x28] sm:$0xff]  }
   0x3   :  { %6650 = vmatprep.subr.bf16.mxu0 %v6999_v0  ;;  %v53_v7 = vld [vmem:[%s8788_s0] sm:$0xff]   ;;  %v205_v33 = vld [vmem:[%s8790_s5 + $0x8] sm:$0xff] }
   0x4   :  { %v5405_v8 = vld [vmem:[%s8789_s2] ss:$0 sm:$0xff]  ;;  %v55_v9 = vunpack.c.l.bf16 %v53_v7  ;;  %v56_v13 = vunpack.c.h.bf16 %v53_v7  ;;  %v213_v35 = vld [vmem:[%s8790_s5 + $0x48] sm:$0xff] }
   0x5   :  { %v204_v31 = vld [vmem:[%s8790_s5] sm:$0xff]  ;;  %v5419_v36 = vcombine.low %v205_v33, %v213_v35  ;;  %v5420_v37 = vcombine.high %v205_v33, %v213_v35  ;;  %v221_v41 = vld [vmem:[%s8790_s5 + $0x88] sm:$0xff] }
   0x6   :  { %6651 = vmatpush3.bf16.msra.mxu0 %v6700_v2  ;;  %v212_v32 = vld [vmem:[%s8790_s5 + $0x40] sm:$0xff]  ;;  %v229_v43 = vld [vmem:[%s8790_s5 + $0xc8] sm:$0xff] }
   0x7   :  { %6652 = vmatprep.subr.bf16.mxu0 %v6999_v0  ;;  %v5418_v34 = vcombine.high %v204_v31, %v212_v32  ;;  %v5417_v38 = vcombine.low %v204_v31, %v212_v32  ;;  %v220_v39 = vld [vmem:[%s8790_s5 + $0x80] sm:$0xff]  ;;  %v5435_v44 = vcombine.low %v221_v41, %v229_v43  ;;  %v5436_v45 = vcombine.high %v221_v41, %v229_v43  ;;  %v237_v49 = vld [vmem:[%s8790_s5 + $0x108] sm:$0xff]  ;;  %v230_v41 = vld [vmem:[%s8790_s5 + $0xd0] sm:$0xff] }
   0x8   :  { %v228_v40 = vld [vmem:[%s8790_s5 + $0xc0] sm:$0xff]  ;;  %v245_v51 = vld [vmem:[%s8790_s5 + $0x148] sm:$0xff] }
   0x9   :  { %868 = vmatprep.subr.bf16.mxu1 %v5418_v34  ;;  %v5434_v42 = vcombine.high %v220_v39, %v228_v40  ;;  %v5433_v46 = vcombine.low %v220_v39, %v228_v40  ;;  %v236_v47 = vld [vmem:[%s8790_s5 + $0x100] sm:$0xff]  ;;  %v5451_v52 = vcombine.low %v237_v49, %v245_v51  ;;  %v5452_v53 = vcombine.high %v237_v49, %v245_v51  ;;  %v253_v57 = vld [vmem:[%s8790_s5 + $0x188] sm:$0xff]  ;;  %v222_v40 = vld [vmem:[%s8790_s5 + $0x90] sm:$0xff] }
   0xa   :  { %6653 = vmatpush3.bf16.msra.mxu0 %v6701_v3  ;;  %869 = vmatpush1.bf16.msra.mxu1 %v5417_v38  ;;  %v244_v48 = vld [vmem:[%s8790_s5 + $0x140] sm:$0xff]  ;;  %v261_v59 = vld [vmem:[%s8790_s5 + $0x1c8] sm:$0xff] }
   0xb   :  { %6654 = vmatprep.subr.bf16.mxu0 %v6999_v0  ;;  %870 = vmatprep.subr.bf16.mxu1 %v5434_v42  ;;  %v5450_v50 = vcombine.high %v236_v47, %v244_v48  ;;  %v5449_v54 = vcombine.low %v236_v47, %v244_v48  ;;  %v252_v55 = vld [vmem:[%s8790_s5 + $0x180] sm:$0xff]  ;;  %v5467_v60 = vcombine.low %v253_v57, %v261_v59  ;;  %v269_v2 = vld [vmem:[%s8790_s5 + $0x208] sm:$0xff]  ;;  %v231_v42 = vld [vmem:[%s8790_s5 + $0xd8] sm:$0xff] }
   0xc   :  { %v260_v56 = vld [vmem:[%s8790_s5 + $0x1c0] sm:$0xff]  ;;  %v5468_v61 = vcombine.high %v253_v57, %v261_v59  ;;  %v239_v47 = vld [vmem:[%s8790_s5 + $0x118] sm:$0xff] }
   0xd   :  { %v5466_v58 = vcombine.high %v252_v55, %v260_v56  ;;  %v5465_v62 = vcombine.low %v252_v55, %v260_v56  ;;  %v268_v63 = vld [vmem:[%s8790_s5 + $0x200] sm:$0xff]  ;;  %v247_v48 = vld [vmem:[%s8790_s5 + $0x158] sm:$0xff]  ;;  %v262_v55 = vld [vmem:[%s8790_s5 + $0x1d0] sm:$0xff] }
   0xe   :  { %6655 = vmatpush3.bf16.msra.mxu0 %v6702_v4  ;;  %871 = vmatpush1.bf16.msra.mxu1 %v5433_v46  ;;  %v276_v1 = vld [vmem:[%s8790_s5 + $0x240] sm:$0xff]  ;;  %v277_v4 = vld [vmem:[%s8790_s5 + $0x248] sm:$0xff]  ;;  %v246_v46 = vld [vmem:[%s8790_s5 + $0x150] sm:$0xff]  ;;  %v5456_v59 = vcombine.high %v239_v47, %v247_v48 }
   0xf   :  { %6656 = vmatprep.subr.bf16.mxu0 %v6999_v0  ;;  %872 = vmatprep.subr.bf16.mxu1 %v5450_v50  ;;  %v5482_v3 = vcombine.high %v268_v63, %v276_v1  ;;  %v5414_v34 = vld [vmem:[%s8792_s3] ss:$0 sm:$0xff]  ;;  %v5438_v50 = vcombine.high %v222_v40, %v230_v41  ;;  %v255_v56 = vld [vmem:[%s8790_s5 + $0x198] sm:$0xff] }
  0x10   :  { %v263_v57 = vld [vmem:[%s8790_s5 + $0x1d8] sm:$0xff] }
  0x12   :  { %6657 = vmatpush3.bf16.msra.mxu0 %v6703_v5  ;;  %873 = vmatpush1.bf16.msra.mxu1 %v5449_v54  ;;  %v5483_v5 = vcombine.low %v269_v2, %v277_v4  ;;  %v254_v54 = vld [vmem:[%s8790_s5 + $0x190] sm:$0xff] }
  0x13   :  { %6658 = vmatprep.subr.bf16.mxu0 %v6999_v0  ;;  %874 = vmatprep.subr.bf16.mxu1 %v5466_v58 }
  0x16   :  { %6659 = vmatpush3.bf16.msra.mxu0 %v6704_v6  ;;  %875 = vmatpush1.bf16.msra.mxu1 %v5465_v62  ;;  %v5484_v6 = vcombine.high %v269_v2, %v277_v4  ;;  %v270_v62 = vld [vmem:[%s8790_s5 + $0x210] sm:$0xff]  ;;  %v279_v2 = vld [vmem:[%s8790_s5 + $0x258] sm:$0xff]  ;;  %v5472_v4 = vcombine.high %v255_v56, %v263_v57 }
  0x17   :  { %911 = vmatprep.subr.bf16.mxu0 %v5420_v37  ;;  %876 = vmatprep.subr.bf16.mxu1 %v5482_v3  ;;  %v5415_v37 = vld [vmem:[%s8793_s4] ss:$0 sm:$0xff]  ;;  %v5470_v3 = vcombine.high %v254_v54, %v262_v55 }
  0x19   :  { %6661 = vmatmul.mubr.msk.bf16.vlgmr.msra.gmra.mrb[0].mxu0 %vm115_vm1, %v53_v7  ;;  %v5481_v7 = vcombine.low %v268_v63, %v276_v1  ;;  %v278_v63 = vld [vmem:[%s8790_s5 + $0x250] sm:$0xff]  ;;  %v271_v1 = vld [vmem:[%s8790_s5 + $0x218] sm:$0xff] }
  0x1a   :  { %912 = vmatpush1.bf16.msra.mxu0 %v5419_v36 }
  0x1b   :  { %913 = vmatprep.subr.bf16.mxu0 %v5436_v45  ;;  %877 = vmatpush1.bf16.msra.mxu1 %v5481_v7  ;;  %v238_v45 = vld [vmem:[%s8790_s5 + $0x110] sm:$0xff] }
  0x1c   :  { %v5454_v58 = vcombine.high %v238_v45, %v246_v46  ;;  %v286_v7 = vld [vmem:[%s8790_s5 + $0x290] sm:$0xff] }
  0x1e   :  { %914 = vmatpush1.bf16.msra.mxu0 %v5435_v44 }
  0x1f   :  { %915 = vmatprep.subr.bf16.mxu0 %v5452_v53 }
  0x22   :  { %916 = vmatpush1.bf16.msra.mxu0 %v5451_v52  ;;  %v5437_v52 = vcombine.low %v222_v40, %v230_v41 }
  0x23   :  { %917 = vmatprep.subr.bf16.mxu0 %v5468_v61  ;;  %v5455_v61 = vcombine.low %v239_v47, %v247_v48 }
  0x26   :  { %918 = vmatpush1.bf16.msra.mxu0 %v5467_v60  ;;  %v5453_v60 = vcombine.low %v238_v45, %v246_v46  ;;  %v265_v45 = vld [vmem:[%s8790_s5 + $0x1e8] sm:$0xff] }
  0x27   :  { %919 = vmatprep.subr.bf16.mxu0 %v5484_v6  ;;  %v5471_v6 = vcombine.low %v255_v56, %v263_v57 }
  0x2a   :  { %920 = vmatpush1.bf16.msra.mxu0 %v5483_v5  ;;  %v5469_v5 = vcombine.low %v254_v54, %v262_v55  ;;  %v281_v54 = vld [vmem:[%s8790_s5 + $0x268] sm:$0xff] }
  0xec   :  { %v153_v10 = vpop.f32.mrb[0].mxu0 }
  0xed   :  { %v154_v11 = vadd.f32 %v5405_v8, %v153_v10  ;;  %v6662_v12 = vpop.f32.mrb[1].mxu0  ;;  %v285_v10 = vld [vmem:[%s8790_s5 + $0x288] sm:$0xff] }
  0xee   :  { %v156_v14 = vpop.f32.mrb[2].mxu0  ;;  %v293_v12 = vld [vmem:[%s8790_s5 + $0x2c8] sm:$0xff] }
  0xef   :  { %v157_v15 = vadd.f32 %v5405_v8, %v156_v14  ;;  %v6663_v16 = vpop.f32.mrb[3].mxu0  ;;  %v160_v17 = vadd.f32 %v154_v11, %v55_v9  ;;  %v284_v8 = vld [vmem:[%s8790_s5 + $0x280] sm:$0xff]  ;;  %v5500_v14 = vcombine.high %v285_v10, %v293_v12 }
  0xf0   :  { %v292_v9 = vld [vmem:[%s8790_s5 + $0x2c0] sm:$0xff]  ;;  %v206_v16 = vld [vmem:[%s8790_s5 + $0x10] sm:$0xff] }
  0xf1   :  { %v164_v18 = vsel %vm115_vm1, %v160_v17, 0.0  ;;  %v161_v19 = vadd.f32 %v157_v15, %v56_v13  ;;  %v5498_v11 = vcombine.high %v284_v8, %v292_v9  ;;  %v5499_v13 = vcombine.low %v285_v10, %v293_v12  ;;  %921 = vmatprep.subr.bf16.mxu0 %v5500_v14  ;;  %v295_v10 = vld [vmem:[%s8790_s5 + $0x2d8] sm:$0xff] }
  0xf2   :  { %165 = vadd.xlane.f32.xlu0 %v164_v18  ;;  %v5497_v15 = vcombine.low %v284_v8, %v292_v9  ;;  %v207_v18 = vld [vmem:[%s8790_s5 + $0x18] sm:$0xff]  ;;  %v294_v8 = vld [vmem:[%s8790_s5 + $0x2d0] sm:$0xff]  ;;  %v5488_v12 = vcombine.high %v271_v1, %v279_v2  ;;  %v5487_v14 = vcombine.low %v271_v1, %v279_v2 }
  0xf3   :  { %v167_v20 = vsel %vm115_vm1, %v161_v19, 0.0  ;;  %878 = vmatprep.subr.bf16.mxu1 %v5498_v11  ;;  %922 = vmatpush1.bf16.msra.mxu0 %v5499_v13  ;;  %v287_v9 = vld [vmem:[%s8790_s5 + $0x298] sm:$0xff]  ;;  %v5486_v11 = vcombine.high %v270_v62, %v278_v63  ;;  %v5485_v13 = vcombine.low %v270_v62, %v278_v63  ;;  %v297_v62 = vld [vmem:[%s8790_s5 + $0x2e8] sm:$0xff] }
  0xf4   :  { %879 = vmatpush1.bf16.msra.mxu1 %v5497_v15  ;;  %v208_v15 = vld [vmem:[%s8790_s5 + $0x20] sm:$0xff] }
  0xf6   :  { %168 = vadd.xlane.f32.xlu0 %v167_v20  ;;  %v215_v20 = vld [vmem:[%s8790_s5 + $0x58] sm:$0xff] }
 0x17f   :  { %v166_v21 = vpop.xlane.xlu0 %165 }
 0x180   :  { %v171_v22 = vmul.f32 0.010416667, %v166_v21 }
 0x182   :  { %v7117_v23 = vsub.f32 %v160_v17, %v171_v22  ;;  %v214_v17 = vld [vmem:[%s8790_s5 + $0x50] sm:$0xff]  ;;  %v5423_v22 = vcombine.low %v207_v18, %v215_v20 }
 0x183   :  { %v169_v24 = vpop.xlane.xlu0 %168  ;;  %v5421_v21 = vcombine.low %v206_v16, %v214_v17 }
 0x184   :  { %v172_v25 = vmul.f32 0.010416667, %v169_v24  ;;  %v175_v26 = vmul.f32 %v7117_v23, %v7117_v23  ;;  %v5424_v24 = vcombine.high %v207_v18, %v215_v20  ;;  %v217_v18 = vld [vmem:[%s8790_s5 + $0x68] sm:$0xff]  ;;  %v5504_v20 = vcombine.high %v287_v9, %v295_v10 }
 0x186   :  { %v7121_v27 = vsub.f32 %v161_v19, %v172_v25  ;;  %v177_v28 = vsel %vm115_vm1, %v175_v26, 0.0  ;;  %v5422_v19 = vcombine.high %v206_v16, %v214_v17  ;;  %v7001_v25 = vmov 0   ;;  %997 = vmatprep.subr.bf16.mxu0 %v5424_v24  ;;  %v216_v16 = vld [vmem:[%s8790_s5 + $0x60] sm:$0xff]  ;;  %v209_v17 = vld [vmem:[%s8790_s5 + $0x28] sm:$0xff] }
 0x187   :  { %178 = vadd.xlane.f32.xlu1 %v177_v28  ;;  %900 = vmatprep.mubr.bf16.mxu1 %v7001_v25  ;;  %v224_v24 = vld [vmem:[%s8790_s5 + $0xa0] sm:$0xff] }
 0x188   :  { %v176_v29 = vmul.f32 %v7121_v27, %v7121_v27  ;;  %943 = vmatprep.mubr.bf16.mxu0 %v7001_v25  ;;  %954 = vmatprep.subr.bf16.mxu1 %v5422_v19  ;;  %v5502_v19 = vcombine.high %v286_v7, %v294_v8 }
 0x18a   :  { %v180_v30 = vsel %vm115_vm1, %v176_v29, 0.0 }
 0x18b   :  { %181 = vadd.xlane.f32.xlu1 %v180_v30 }
 0x214   :  { %v179_v26 = vpop.xlane.xlu1 %178 }
 0x215   :  { %v183_v28 = vmul.f32 0.010416667, %v179_v26  ;;  %v232_v26 = vld [vmem:[%s8790_s5 + $0xe0] sm:$0xff] }
 0x216   :  { %v5441_v40 = vcombine.low %v224_v24, %v232_v26 }
 0x217   :  { %v185_v29 = vadd.f32 1e-05, %v183_v28  ;;  %v225_v28 = vld [vmem:[%s8790_s5 + $0xa8] sm:$0xff] }
 0x218   :  { %v182_v30 = vpop.xlane.xlu1 %181 }
 0x219   :  { %6975 = vrsqrt.f32 %v185_v29  ;;  %v184_v31 = vmul.f32 0.010416667, %v182_v30  ;;  %v233_v29 = vld [vmem:[%s8790_s5 + $0xe8] sm:$0xff]  ;;  %v5426_v30 = vcombine.high %v208_v15, %v216_v16 }
 0x21a   :  { %v5443_v41 = vcombine.low %v225_v28, %v233_v29 }
 0x21b   :  { %v186_v32 = vadd.f32 1e-05, %v184_v31  ;;  %v5428_v31 = vcombine.high %v209_v17, %v217_v18 }
 0x21d   :  { %6977 = vrsqrt.f32 %v186_v32  ;;  %v5425_v32 = vcombine.low %v208_v15, %v216_v16  ;;  %v235_v15 = vld [vmem:[%s8790_s5 + $0xf8] sm:$0xff] }
 0x223   :  { %v6976_v33 = vpop.eup %6975 }
 0x224   :  { %v189_v35 = vmul.f32 %v6976_v33, %v7117_v23  ;;  %v223_v23 = vld [vmem:[%s8790_s5 + $0x98] sm:$0xff]  ;;  %v5427_v33 = vcombine.low %v209_v17, %v217_v18 }
 0x225   :  { %v5440_v51 = vcombine.high %v223_v23, %v231_v42  ;;  %v5439_v53 = vcombine.low %v223_v23, %v231_v42  ;;  %v256_v23 = vld [vmem:[%s8790_s5 + $0x1a0] sm:$0xff] }
 0x226   :  { %v195_v38 = vmul.f32 %v5414_v34, %v189_v35  ;;  %v248_v35 = vld [vmem:[%s8790_s5 + $0x160] sm:$0xff] }
 0x227   :  { %v6978_v36 = vpop.eup %6977  ;;  %v264_v42 = vld [vmem:[%s8790_s5 + $0x1e0] sm:$0xff] }
 0x228   :  { %v190_v39 = vmul.f32 %v6978_v36, %v7121_v27  ;;  %v7233_v44 = vadd.f32 %v5415_v37, %v195_v38  ;;  %v241_v36 = vld [vmem:[%s8790_s5 + $0x128] sm:$0xff]  ;;  %v5442_v38 = vcombine.high %v224_v24, %v232_v26  ;;  %v5474_v55 = vcombine.high %v256_v23, %v264_v42  ;;  %v251_v24 = vld [vmem:[%s8790_s5 + $0x178] sm:$0xff] }
 0x229   :  { %v5473_v57 = vcombine.low %v256_v23, %v264_v42  ;;  %v283_v23 = vld [vmem:[%s8790_s5 + $0x278] sm:$0xff] }
 0x22a   :  { %v196_v43 = vmul.f32 %v5414_v34, %v190_v39  ;;  %v240_v34 = vld [vmem:[%s8790_s5 + $0x120] sm:$0xff]  ;;  %v5444_v39 = vcombine.high %v225_v28, %v233_v29 }
 0x22b   :  { %v5458_v46 = vcombine.high %v240_v34, %v248_v35  ;;  %v5457_v48 = vcombine.low %v240_v34, %v248_v35  ;;  %v267_v34 = vld [vmem:[%s8790_s5 + $0x1f8] sm:$0xff] }
 0x22c   :  { %v7235_v27 = vadd.f32 %v5415_v37, %v196_v43  ;;  %v249_v37 = vld [vmem:[%s8790_s5 + $0x168] sm:$0xff] }
 0x22d   :  { %v257_v43 = vld [vmem:[%s8790_s5 + $0x1a8] sm:$0xff]  ;;  %v5460_v47 = vcombine.high %v241_v36, %v249_v37 }
 0x22e   :  { %v7251_v49 = vpack.c.bf16 %v7235_v27, %v7233_v44  ;;  %v5476_v56 = vcombine.high %v257_v43, %v265_v45 }
 0x230   :  { %5513 = vmatmul.mubr.msk.bf16.vlgmr.msra.gmra.mrb[0].mxu1 %vm115_vm1, %v7251_v49  ;;  %5514 = vmatmul.mubr.msk.bf16.vlgmr.msra.gmra.mrb[4].mxu0 %vm115_vm1, %v7251_v49 }
 0x231   :  { %955 = vmatpush1.bf16.msra.mxu1 %v5421_v21  ;;  %998 = vmatpush1.bf16.msra.mxu0 %v5423_v22  ;;  %v5501_v21 = vcombine.low %v286_v7, %v294_v8  ;;  %v5503_v22 = vcombine.low %v287_v9, %v295_v10  ;;  %v219_v7 = vld [vmem:[%s8790_s5 + $0x78] sm:$0xff] }
 0x232   :  { %956 = vmatprep.subr.bf16.mxu1 %v5438_v50  ;;  %999 = vmatprep.subr.bf16.mxu0 %v5440_v51  ;;  %v5459_v50 = vcombine.low %v241_v36, %v249_v37  ;;  %v272_v51 = vld [vmem:[%s8790_s5 + $0x220] sm:$0xff] }
 0x233   :  { %986 = vmatprep.mubr.bf16.mxu1 %v7001_v25  ;;  %1029 = vmatprep.mubr.bf16.mxu0 %v7001_v25 }
 0x235   :  { %957 = vmatpush1.bf16.msra.mxu1 %v5437_v52  ;;  %1000 = vmatpush1.bf16.msra.mxu0 %v5439_v53  ;;  %v280_v52 = vld [vmem:[%s8790_s5 + $0x260] sm:$0xff]  ;;  %v273_v53 = vld [vmem:[%s8790_s5 + $0x228] sm:$0xff] }
 0x236   :  { %958 = vmatprep.subr.bf16.mxu1 %v5454_v58  ;;  %1001 = vmatprep.subr.bf16.mxu0 %v5456_v59  ;;  %v5475_v58 = vcombine.low %v257_v43, %v265_v45  ;;  %v288_v59 = vld [vmem:[%s8790_s5 + $0x2a0] sm:$0xff]  ;;  %v5490_v63 = vcombine.high %v272_v51, %v280_v52  ;;  %v5492_v1 = vcombine.high %v273_v53, %v281_v54 }
 0x237   :  { %v5489_v2 = vcombine.low %v272_v51, %v280_v52  ;;  %v299_v51 = vld [vmem:[%s8790_s5 + $0x2f8] sm:$0xff] }
 0x239   :  { %959 = vmatpush1.bf16.msra.mxu1 %v5453_v60  ;;  %1002 = vmatpush1.bf16.msra.mxu0 %v5455_v61  ;;  %v296_v60 = vld [vmem:[%s8790_s5 + $0x2e0] sm:$0xff]  ;;  %v289_v61 = vld [vmem:[%s8790_s5 + $0x2a8] sm:$0xff] }
 0x23a   :  { %960 = vmatprep.subr.bf16.mxu1 %v5470_v3  ;;  %1003 = vmatprep.subr.bf16.mxu0 %v5472_v4  ;;  %v5491_v3 = vcombine.low %v273_v53, %v281_v54  ;;  %v210_v4 = vld [vmem:[%s8790_s5 + $0x30] sm:$0xff]  ;;  %v5506_v8 = vcombine.high %v288_v59, %v296_v60  ;;  %v5508_v9 = vcombine.high %v289_v61, %v297_v62 }
 0x23b   :  { %v5505_v10 = vcombine.low %v288_v59, %v296_v60  ;;  %v6707_v59 = vld [vmem:[%s8791_s7 + $0xc0] sm:$0xff]  }
 0x23d   :  { %961 = vmatpush1.bf16.msra.mxu1 %v5469_v5  ;;  %1004 = vmatpush1.bf16.msra.mxu0 %v5471_v6  ;;  %v218_v5 = vld [vmem:[%s8790_s5 + $0x70] sm:$0xff]  ;;  %v211_v6 = vld [vmem:[%s8790_s5 + $0x38] sm:$0xff] }
 0x23e   :  { %962 = vmatprep.subr.bf16.mxu1 %v5486_v11  ;;  %1005 = vmatprep.subr.bf16.mxu0 %v5488_v12  ;;  %v5507_v11 = vcombine.low %v289_v61, %v297_v62  ;;  %v226_v12 = vld [vmem:[%s8790_s5 + $0xb0] sm:$0xff]  ;;  %v5430_v16 = vcombine.high %v210_v4, %v218_v5  ;;  %v5432_v17 = vcombine.high %v211_v6, %v219_v7  ;;  %v6708_v62 = vld [vmem:[%s8791_s7] sm:$0xff]  }
 0x23f   :  { %v5429_v18 = vcombine.low %v210_v4, %v218_v5  ;;  %v6713_v4 = vld [vmem:[%s8791_s7 + $0x88] sm:$0xff]   ;;  %v6714_v5 = vld [vmem:[%s8791_s7 + $0x50] sm:$0xff]  }
 0x241   :  { %963 = vmatpush1.bf16.msra.mxu1 %v5485_v13  ;;  %1006 = vmatpush1.bf16.msra.mxu0 %v5487_v14  ;;  %v234_v13 = vld [vmem:[%s8790_s5 + $0xf0] sm:$0xff]  ;;  %v227_v14 = vld [vmem:[%s8790_s5 + $0xb8] sm:$0xff] }
 0x242   :  { %964 = vmatprep.subr.bf16.mxu1 %v5502_v19  ;;  %1007 = vmatprep.subr.bf16.mxu0 %v5504_v20  ;;  %v5431_v19 = vcombine.low %v211_v6, %v219_v7  ;;  %v242_v20 = vld [vmem:[%s8790_s5 + $0x130] sm:$0xff]  ;;  %v5446_v26 = vcombine.high %v226_v12, %v234_v13  ;;  %v5448_v28 = vcombine.high %v227_v14, %v235_v15 }
 0x243   :  { %v5445_v29 = vcombine.low %v226_v12, %v234_v13  ;;  %v6715_v6 = vld [vmem:[%s8791_s7 + $0xd0] sm:$0xff]   ;;  %v6722_v12 = vld [vmem:[%s8791_s7 + $0x60] sm:$0xff]  }
 0x244   :  { %v6716_v7 = vld [vmem:[%s8791_s7 + $0x10] sm:$0xff]   ;;  %v6723_v13 = vld [vmem:[%s8791_s7 + $0xe0] sm:$0xff]  }
 0x245   :  { %965 = vmatpush1.bf16.msra.mxu1 %v5501_v21  ;;  %1008 = vmatpush1.bf16.msra.mxu0 %v5503_v22  ;;  %v250_v21 = vld [vmem:[%s8790_s5 + $0x170] sm:$0xff]  ;;  %v243_v22 = vld [vmem:[%s8790_s5 + $0x138] sm:$0xff] }
 0x246   :  { %1040 = vmatprep.subr.bf16.mxu1 %v5426_v30  ;;  %1083 = vmatprep.subr.bf16.mxu0 %v5428_v31  ;;  %v5447_v30 = vcombine.low %v227_v14, %v235_v15  ;;  %v258_v31 = vld [vmem:[%s8790_s5 + $0x1b0] sm:$0xff]  ;;  %v5462_v35 = vcombine.high %v242_v20, %v250_v21  ;;  %v5464_v36 = vcombine.high %v243_v22, %v251_v24  ;;  %v6724_v14 = vld [vmem:[%s8791_s7 + $0x20] sm:$0xff]  }
 0x247   :  { %v5461_v37 = vcombine.low %v242_v20, %v250_v21  ;;  %v6725_v15 = vld [vmem:[%s8791_s7 + $0xa0] sm:$0xff]   ;;  %v6730_v20 = vld [vmem:[%s8791_s7 + $0x70] sm:$0xff]  }
 0x248   :  { %5515 = vmatmul.mubr.msk.bf16.vlgmr.msra.gmra.mrb[4].mxu1 %vm115_vm1, %v7251_v49  ;;  %5516 = vmatmul.mubr.msk.bf16.vlgmr.msra.gmra.mrb[8].mxu0 %vm115_vm1, %v7251_v49  ;;  %v6731_v21 = vld [vmem:[%s8791_s7 + $0xf0] sm:$0xff]  }
 0x249   :  { %1041 = vmatpush1.bf16.msra.mxu1 %v5425_v32  ;;  %1084 = vmatpush1.bf16.msra.mxu0 %v5427_v33  ;;  %v266_v32 = vld [vmem:[%s8790_s5 + $0x1f0] sm:$0xff]  ;;  %v259_v33 = vld [vmem:[%s8790_s5 + $0x1b8] sm:$0xff] }
 0x24a   :  { %1042 = vmatprep.subr.bf16.mxu1 %v5442_v38  ;;  %1085 = vmatprep.subr.bf16.mxu0 %v5444_v39  ;;  %v5463_v38 = vcombine.low %v243_v22, %v251_v24  ;;  %v274_v39 = vld [vmem:[%s8790_s5 + $0x230] sm:$0xff]  ;;  %v5478_v42 = vcombine.high %v258_v31, %v266_v32  ;;  %v5480_v43 = vcombine.high %v259_v33, %v267_v34 }
 0x24b   :  { %1072 = vmatprep.mubr.bf16.mxu1 %v7001_v25  ;;  %1115 = vmatprep.mubr.bf16.mxu0 %v7001_v25  ;;  %v5477_v45 = vcombine.low %v258_v31, %v266_v32  ;;  %v6732_v22 = vld [vmem:[%s8791_s7 + $0x30] sm:$0xff]   ;;  %v6738_v31 = vld [vmem:[%s8791_s7 + $0x140] sm:$0xff]  }
 0x24c   :  { %v6733_v24 = vld [vmem:[%s8791_s7 + $0xb0] sm:$0xff]   ;;  %v6739_v32 = vld [vmem:[%s8791_s7 + $0x1c0] sm:$0xff]  }
 0x24d   :  { %1043 = vmatpush1.bf16.msra.mxu1 %v5441_v40  ;;  %1086 = vmatpush1.bf16.msra.mxu0 %v5443_v41  ;;  %v282_v40 = vld [vmem:[%s8790_s5 + $0x270] sm:$0xff]  ;;  %v275_v41 = vld [vmem:[%s8790_s5 + $0x238] sm:$0xff] }
 0x24e   :  { %1044 = vmatprep.subr.bf16.mxu1 %v5458_v46  ;;  %1087 = vmatprep.subr.bf16.mxu0 %v5460_v47  ;;  %v5479_v46 = vcombine.low %v259_v33, %v267_v34  ;;  %v290_v47 = vld [vmem:[%s8790_s5 + $0x2b0] sm:$0xff]  ;;  %v5494_v52 = vcombine.high %v274_v39, %v282_v40  ;;  %v5496_v53 = vcombine.high %v275_v41, %v283_v23  ;;  %v305_v33 = vlaneseq }
 0x24f   :  { %v5493_v54 = vcombine.low %v274_v39, %v282_v40 }
 0x250   :  { %v7557_v34 = vshrl.u32 %v305_v33, 7  ;;  %v6755_v33 = vld [vmem:[%s8791_s7 + $0x1e0] sm:$0xff]  }
 0x251   :  { %1045 = vmatpush1.bf16.msra.mxu1 %v5457_v48  ;;  %1088 = vmatpush1.bf16.msra.mxu0 %v5459_v50  ;;  %v298_v48 = vld [vmem:[%s8790_s5 + $0x2f0] sm:$0xff]  ;;  %v291_v50 = vld [vmem:[%s8790_s5 + $0x2b8] sm:$0xff] }
 0x252   :  { %1046 = vmatprep.subr.bf16.mxu1 %v5474_v55  ;;  %1089 = vmatprep.subr.bf16.mxu0 %v5476_v56  ;;  %v5495_v55 = vcombine.low %v275_v41, %v283_v23  ;;  %v5510_v56 = vcombine.high %v290_v47, %v298_v48  ;;  %v5509_v60 = vcombine.low %v290_v47, %v298_v48  ;;  %v7574_v39 = vsub.s32 3, %v7557_v34 }
 0x253   :  { %v5511_v61 = vcombine.low %v291_v50, %v299_v51 }
 0x255   :  { %1047 = vmatpush1.bf16.msra.mxu1 %v5473_v57  ;;  %1090 = vmatpush1.bf16.msra.mxu0 %v5475_v58  ;;  %v5512_v57 = vcombine.high %v291_v50, %v299_v51  ;;  %v6706_v58 = vld [vmem:[%s8791_s7 + $0x40] sm:$0xff]  }
 0x256   :  { %1048 = vmatprep.subr.bf16.mxu1 %v5490_v63  ;;  %1091 = vmatprep.subr.bf16.mxu0 %v5492_v1  ;;  %v6709_v63 = vld [vmem:[%s8791_s7 + $0x80] sm:$0xff]   ;;  %v6710_v1 = vld [vmem:[%s8791_s7 + $0x48] sm:$0xff]  }
 0x259   :  { %1049 = vmatpush1.bf16.msra.mxu1 %v5489_v2  ;;  %1092 = vmatpush1.bf16.msra.mxu0 %v5491_v3  ;;  %v6711_v2 = vld [vmem:[%s8791_s7 + $0xc8] sm:$0xff]  }
 0x25a   :  { %1050 = vmatprep.subr.bf16.mxu1 %v5506_v8  ;;  %1093 = vmatprep.subr.bf16.mxu0 %v5508_v9  ;;  %v6712_v3 = vld [vmem:[%s8791_s7 + $0x8] sm:$0xff]   ;;  %v6718_v8 = vld [vmem:[%s8791_s7 + $0x58] sm:$0xff]  }
 0x25b   :  { %v6719_v9 = vld [vmem:[%s8791_s7 + $0xd8] sm:$0xff]  }
 0x25d   :  { %1051 = vmatpush1.bf16.msra.mxu1 %v5505_v10  ;;  %1094 = vmatpush1.bf16.msra.mxu0 %v5507_v11  ;;  %v6720_v10 = vld [vmem:[%s8791_s7 + $0x18] sm:$0xff]  }
 0x25e   :  { %1126 = vmatprep.subr.bf16.mxu1 %v5430_v16  ;;  %1169 = vmatprep.subr.bf16.mxu0 %v5432_v17  ;;  %v6721_v11 = vld [vmem:[%s8791_s7 + $0x98] sm:$0xff]   ;;  %v6726_v16 = vld [vmem:[%s8791_s7 + $0x68] sm:$0xff]  }
 0x25f   :  { %v6727_v17 = vld [vmem:[%s8791_s7 + $0xe8] sm:$0xff]  }
 0x260   :  { %5517 = vmatmul.mubr.msk.bf16.vlgmr.msra.gmra.mrb[8].mxu1 %vm115_vm1, %v7251_v49  ;;  %5518 = vmatmul.mubr.msk.bf16.vlgmr.msra.gmra.mrb[12].mxu0 %vm115_vm1, %v7251_v49 }
 0x261   :  { %1127 = vmatpush1.bf16.msra.mxu1 %v5429_v18  ;;  %1170 = vmatpush1.bf16.msra.mxu0 %v5431_v19  ;;  %v6728_v18 = vld [vmem:[%s8791_s7 + $0x28] sm:$0xff]  }
 0x262   :  { %1128 = vmatprep.subr.bf16.mxu1 %v5446_v26  ;;  %1171 = vmatprep.subr.bf16.mxu0 %v5448_v28  ;;  %v6729_v19 = vld [vmem:[%s8791_s7 + $0xa8] sm:$0xff]   ;;  %v6734_v26 = vld [vmem:[%s8791_s7 + $0x78] sm:$0xff]  }
 0x263   :  { %1158 = vmatprep.mubr.bf16.mxu1 %v7001_v25  ;;  %1201 = vmatprep.mubr.bf16.mxu0 %v7001_v25  ;;  %v6735_v28 = vld [vmem:[%s8791_s7 + $0xf8] sm:$0xff]  }
 0x265   :  { %1129 = vmatpush1.bf16.msra.mxu1 %v5445_v29  ;;  %1172 = vmatpush1.bf16.msra.mxu0 %v5447_v30  ;;  %v6736_v29 = vld [vmem:[%s8791_s7 + $0x38] sm:$0xff]  }
 0x266   :  { %1130 = vmatprep.subr.bf16.mxu1 %v5462_v35  ;;  %1173 = vmatprep.subr.bf16.mxu0 %v5464_v36  ;;  %v6737_v30 = vld [vmem:[%s8791_s7 + $0xb8] sm:$0xff]   ;;  %v7560_v35 = vsub.s32 0, %v7557_v34  ;;  %v7563_v36 = vsub.s32 2, %v7557_v34 }
 0x269   :  { %1131 = vmatpush1.bf16.msra.mxu1 %v5461_v37  ;;  %1174 = vmatpush1.bf16.msra.mxu0 %v5463_v38  ;;  %v7568_v37 = vld [vmem:[%s8794_s6] ss:$2 sm:$0xff]  ;;  %v7571_v38 = vsub.s32 1, %v7557_v34 }
 0x26a   :  { %1132 = vmatprep.subr.bf16.mxu1 %v5478_v42  ;;  %1175 = vmatprep.subr.bf16.mxu0 %v5480_v43  ;;  %v308_v40 = vrot.slane %v7568_v37, %v7560_v35  ;;  %v316_v41 = vrot.slane %v7568_v37, %v7563_v36  ;;  %v320_v42 = vrot.slane %v7568_v37, %v7574_v39 }
 0x26b   :  { %v312_v23 = vrot.slane %v7568_v37, %v7571_v38 }
 0x26d   :  { %1133 = vmatpush1.bf16.msra.mxu1 %v5477_v45  ;;  %1176 = vmatpush1.bf16.msra.mxu0 %v5479_v46 }
 0x26e   :  { %1134 = vmatprep.subr.bf16.mxu1 %v5494_v52  ;;  %1177 = vmatprep.subr.bf16.mxu0 %v5496_v53 }
 0x271   :  { %1135 = vmatpush1.bf16.msra.mxu1 %v5493_v54  ;;  %1178 = vmatpush1.bf16.msra.mxu0 %v5495_v55 }
 0x272   :  { %1136 = vmatprep.subr.bf16.mxu1 %v5510_v56  ;;  %1179 = vmatprep.subr.bf16.mxu0 %v5512_v57 }
 0x275   :  { %1137 = vmatpush1.bf16.msra.mxu1 %v5509_v60  ;;  %1180 = vmatpush1.bf16.msra.mxu0 %v5511_v61 }
 0x276   :  { %6282 = vmatprep.subr.bf16.mxu1 %v6706_v58  ;;  %6304 = vmatprep.subr.bf16.mxu0 %v6707_v59 }
 0x278   :  { %5519 = vmatmul.mubr.msk.bf16.vlgmr.msra.gmra.mrb[12].mxu1 %vm115_vm1, %v7251_v49  ;;  %5520 = vmatmul.mubr.msk.bf16.vlgmr.msra.gmra.mrb[16].mxu0 %vm115_vm1, %v7251_v49  ;;  %v6717_v49 = vld [vmem:[%s8791_s7 + $0x90] sm:$0xff]  }
 0x279   :  { %6283 = vmatpush3.bf16.msra.mxu1 %v6708_v62  ;;  %6305 = vmatpush3.bf16.msra.mxu0 %v6709_v63 }
 0x27a   :  { %6284 = vmatprep.subr.bf16.mxu1 %v6710_v1  ;;  %6306 = vmatprep.subr.bf16.mxu0 %v6711_v2 }
 0x27d   :  { %6285 = vmatpush3.bf16.msra.mxu1 %v6712_v3  ;;  %6307 = vmatpush3.bf16.msra.mxu0 %v6713_v4 }
 0x27e   :  { %6286 = vmatprep.subr.bf16.mxu1 %v6714_v5  ;;  %6308 = vmatprep.subr.bf16.mxu0 %v6715_v6 }
 0x281   :  { %6287 = vmatpush3.bf16.msra.mxu1 %v6716_v7  ;;  %6309 = vmatpush3.bf16.msra.mxu0 %v6717_v49 }
 0x282   :  { %6288 = vmatprep.subr.bf16.mxu1 %v6718_v8  ;;  %6310 = vmatprep.subr.bf16.mxu0 %v6719_v9  ;;  %v6740_v9 = vld [vmem:[%s8791_s7 + $0x100] sm:$0xff]  }
 0x285   :  { %6289 = vmatpush3.bf16.msra.mxu1 %v6720_v10  ;;  %6311 = vmatpush3.bf16.msra.mxu0 %v6721_v11  ;;  %v6741_v10 = vld [vmem:[%s8791_s7 + $0x180] sm:$0xff]   ;;  %v6742_v11 = vld [vmem:[%s8791_s7 + $0x148] sm:$0xff]  }
 0x286   :  { %6290 = vmatprep.subr.bf16.mxu1 %v6722_v12  ;;  %6312 = vmatprep.subr.bf16.mxu0 %v6723_v13  ;;  %v6743_v12 = vld [vmem:[%s8791_s7 + $0x1c8] sm:$0xff]  }
 0x287   :  { %v6744_v13 = vld [vmem:[%s8791_s7 + $0x108] sm:$0xff]  }
 0x289   :  { %6291 = vmatpush3.bf16.msra.mxu1 %v6724_v14  ;;  %6313 = vmatpush3.bf16.msra.mxu0 %v6725_v15  ;;  %v6745_v14 = vld [vmem:[%s8791_s7 + $0x188] sm:$0xff]   ;;  %v6746_v15 = vld [vmem:[%s8791_s7 + $0x150] sm:$0xff]  }
 0x28a   :  { %6292 = vmatprep.subr.bf16.mxu1 %v6726_v16  ;;  %6314 = vmatprep.subr.bf16.mxu0 %v6727_v17  ;;  %v6747_v16 = vld [vmem:[%s8791_s7 + $0x1d0] sm:$0xff]  }
 0x28b   :  { %v6748_v17 = vld [vmem:[%s8791_s7 + $0x110] sm:$0xff]  }
 0x28d   :  { %6293 = vmatpush3.bf16.msra.mxu1 %v6728_v18  ;;  %6315 = vmatpush3.bf16.msra.mxu0 %v6729_v19  ;;  %v6749_v18 = vld [vmem:[%s8791_s7 + $0x190] sm:$0xff]   ;;  %v6750_v19 = vld [vmem:[%s8791_s7 + $0x158] sm:$0xff]  }
 0x28e   :  { %6294 = vmatprep.subr.bf16.mxu1 %v6730_v20  ;;  %6316 = vmatprep.subr.bf16.mxu0 %v6731_v21  ;;  %v6751_v20 = vld [vmem:[%s8791_s7 + $0x1d8] sm:$0xff]   ;;  %v7621_v21 = vsub.s32 4, %v7557_v34 }
 0x291   :  { %6295 = vmatpush3.bf16.msra.mxu1 %v6732_v22  ;;  %6317 = vmatpush3.bf16.msra.mxu0 %v6733_v24  ;;  %v7624_v22 = vsub.s32 6, %v7557_v34  ;;  %v7627_v24 = vsub.s32 5, %v7557_v34 }
 0x292   :  { %6296 = vmatprep.subr.bf16.mxu1 %v6734_v26  ;;  %6318 = vmatprep.subr.bf16.mxu0 %v6735_v28  ;;  %v7630_v26 = vsub.s32 7, %v7557_v34  ;;  %v6752_v28 = vld [vmem:[%s8791_s7 + $0x118] sm:$0xff]  }
 0x293   :  { %v328_v34 = vrot.slane %v7568_v37, %v7627_v24 }
 0x295   :  { %6297 = vmatpush3.bf16.msra.mxu1 %v6736_v29  ;;  %6319 = vmatpush3.bf16.msra.mxu0 %v6737_v30  ;;  %v6753_v29 = vld [vmem:[%s8791_s7 + $0x198] sm:$0xff]   ;;  %v324_v30 = vrot.slane %v7568_v37, %v7621_v21 }
 0x296   :  { %6326 = vmatprep.subr.bf16.mxu1 %v6738_v31  ;;  %6348 = vmatprep.subr.bf16.mxu0 %v6739_v32  ;;  %v332_v31 = vrot.slane %v7568_v37, %v7624_v22  ;;  %v6754_v32 = vld [vmem:[%s8791_s7 + $0x160] sm:$0xff]  }
 0x303   :  { %v902_v43 = vpop.f32.mrb[0].mxu1  ;;  %v945_v45 = vpop.f32.mrb[4].mxu0 }
 0x304   :  { %v903_v46 = vadd.f32 %v902_v43, %v308_v40  ;;  %v946_v47 = vadd.f32 %v945_v45, %v316_v41  ;;  %v904_v48 = vpop.f32.mrb[1].mxu1  ;;  %v947_v50 = vpop.f32.mrb[5].mxu0  ;;  %v6757_v43 = vld [vmem:[%s8791_s7 + $0x1a0] sm:$0xff]  }
 0x305   :  { %v905_v51 = vadd.f32 %v904_v48, %v312_v23  ;;  %v948_v52 = vadd.f32 %v947_v50, %v320_v42  ;;  %v906_v53 = vpop.f32.mrb[2].mxu1  ;;  %v949_v54 = vpop.f32.mrb[6].mxu0  ;;  %v6759_v50 = vld [vmem:[%s8791_s7 + $0x1e8] sm:$0xff]  }
 0x306   :  { %v907_v55 = vadd.f32 %v906_v53, %v308_v40  ;;  %v950_v56 = vadd.f32 %v949_v54, %v316_v41  ;;  %v908_v57 = vpop.f32.mrb[3].mxu1  ;;  %v951_v58 = vpop.f32.mrb[7].mxu0  ;;  %v1212_v61 = vmax.f32 %v903_v46, 0.0  ;;  %v1214_v62 = vmax.f32 %v946_v47, 0.0 }
 0x307   :  { %v909_v59 = vadd.f32 %v908_v57, %v312_v23  ;;  %v952_v60 = vadd.f32 %v951_v58, %v320_v42  ;;  %v1213_v2 = vmax.f32 %v905_v51, 0.0  ;;  %v1215_v3 = vmax.f32 %v948_v52, 0.0  ;;  %v6756_v42 = vld [vmem:[%s8791_s7 + $0x120] sm:$0xff]  }
 0x308   :  { %v1228_v63 = vmax.f32 %v907_v55, 0.0  ;;  %v1230_v1 = vmax.f32 %v950_v56, 0.0  ;;  %v336_v40 = vrot.slane %v7568_v37, %v7630_v26  ;;  %v6758_v37 = vld [vmem:[%s8791_s7 + $0x168] sm:$0xff]  }
 0x309   :  { %v1229_v4 = vmax.f32 %v909_v59, 0.0  ;;  %v1231_v5 = vmax.f32 %v952_v60, 0.0 }
 0x30a   :  { %v1244_v6 = vpack.c.bf16 %v1228_v63, %v1212_v61  ;;  %v1246_v7 = vpack.c.bf16 %v1230_v1, %v1214_v62  ;;  %v6760_v61 = vld [vmem:[%s8791_s7 + $0x128] sm:$0xff]  }
 0x30b   :  { %v1245_v49 = vpack.c.bf16 %v1229_v4, %v1213_v2  ;;  %v1247_v8 = vpack.c.bf16 %v1231_v5, %v1215_v3  ;;  %v6761_v62 = vld [vmem:[%s8791_s7 + $0x1a8] sm:$0xff]   ;;  %v6762_v4 = vld [vmem:[%s8791_s7 + $0x170] sm:$0xff]  }
 0x30c   :  { %v6763_v5 = vld [vmem:[%s8791_s7 + $0x1f0] sm:$0xff]  }
 0x30d   :  { %2321 = vmatprep.mubr.bf16.mxu1 %v1245_v49  ;;  %2362 = vmatprep.mubr.bf16.mxu0 %v1247_v8 }
 0x30e   :  { %2322 = vmatmul.mubr.bf16.vlgmr.msra.gmra.mrb[16].mxu1 %v1244_v6  ;;  %2363 = vmatmul.mubr.bf16.vlgmr.msra.gmra.mrb[20].mxu0 %v1246_v7 }
 0x30f   :  { %6327 = vmatpush3.bf16.msra.mxu1 %v6740_v9  ;;  %6349 = vmatpush3.bf16.msra.mxu0 %v6741_v10 }
 0x310   :  { %6328 = vmatprep.subr.bf16.mxu1 %v6742_v11  ;;  %6350 = vmatprep.subr.bf16.mxu0 %v6743_v12 }
 0x313   :  { %6329 = vmatpush3.bf16.msra.mxu1 %v6744_v13  ;;  %6351 = vmatpush3.bf16.msra.mxu0 %v6745_v14  ;;  %v6764_v13 = vld [vmem:[%s8791_s7 + $0x130] sm:$0xff]  }
 0x314   :  { %6330 = vmatprep.subr.bf16.mxu1 %v6746_v15  ;;  %6352 = vmatprep.subr.bf16.mxu0 %v6747_v16  ;;  %v6765_v14 = vld [vmem:[%s8791_s7 + $0x1b0] sm:$0xff]   ;;  %v6766_v15 = vld [vmem:[%s8791_s7 + $0x178] sm:$0xff]  }
 0x315   :  { %v6767_v16 = vld [vmem:[%s8791_s7 + $0x1f8] sm:$0xff]  }
 0x317   :  { %6331 = vmatpush3.bf16.msra.mxu1 %v6748_v17  ;;  %6353 = vmatpush3.bf16.msra.mxu0 %v6749_v18  ;;  %v6768_v17 = vld [vmem:[%s8791_s7 + $0x138] sm:$0xff]  }
 0x318   :  { %6332 = vmatprep.subr.bf16.mxu1 %v6750_v19  ;;  %6354 = vmatprep.subr.bf16.mxu0 %v6751_v20  ;;  %v6769_v18 = vld [vmem:[%s8791_s7 + $0x1b8] sm:$0xff]   ;;  %v6770_v19 = vld [vmem:[%s8791_s7 + $0x240] sm:$0xff]  }
 0x319   :  { %v6771_v20 = vld [vmem:[%s8791_s7 + $0x2c0] sm:$0xff]  }
 0x31b   :  { %v988_v41 = vpop.f32.mrb[4].mxu1  ;;  %v1031_v23 = vpop.f32.mrb[8].mxu0  ;;  %6333 = vmatpush3.bf16.msra.mxu1 %v6752_v28  ;;  %6355 = vmatpush3.bf16.msra.mxu0 %v6753_v29  ;;  %v6772_v28 = vld [vmem:[%s8791_s7 + $0x200] sm:$0xff]  }
 0x31c   :  { %v989_v45 = vadd.f32 %v988_v41, %v324_v30  ;;  %v1032_v46 = vadd.f32 %v1031_v23, %v332_v31  ;;  %v990_v47 = vpop.f32.mrb[5].mxu1  ;;  %v1033_v48 = vpop.f32.mrb[9].mxu0  ;;  %6334 = vmatprep.subr.bf16.mxu1 %v6754_v32  ;;  %6356 = vmatprep.subr.bf16.mxu0 %v6755_v33  ;;  %v6773_v29 = vld [vmem:[%s8791_s7 + $0x280] sm:$0xff]   ;;  %v7715_v32 = vld [vmem:[%s8794_s6 + $0x10] ss:$2 sm:$0xff]  ;;  %v6776_v33 = vld [vmem:[%s8791_s7 + $0x208] sm:$0xff]  }
 0x31d   :  { %v991_v51 = vadd.f32 %v990_v47, %v328_v34  ;;  %v1034_v52 = vadd.f32 %v1033_v48, %v336_v40  ;;  %v992_v53 = vpop.f32.mrb[6].mxu1  ;;  %v1035_v54 = vpop.f32.mrb[10].mxu0  ;;  %v348_v41 = vrot.slane %v7715_v32, %v7563_v36  ;;  %v6778_v23 = vld [vmem:[%s8791_s7 + $0x250] sm:$0xff]  }
 0x31e   :  { %v993_v55 = vadd.f32 %v992_v53, %v324_v30  ;;  %v1036_v56 = vadd.f32 %v1035_v54, %v332_v31  ;;  %v994_v57 = vpop.f32.mrb[7].mxu1  ;;  %v1037_v58 = vpop.f32.mrb[11].mxu0  ;;  %v1216_v63 = vmax.f32 %v989_v45, 0.0  ;;  %v1218_v1 = vmax.f32 %v1032_v46, 0.0  ;;  %v6774_v30 = vld [vmem:[%s8791_s7 + $0x248] sm:$0xff]   ;;  %v6780_v48 = vld [vmem:[%s8791_s7 + $0x210] sm:$0xff]  }
 0x31f   :  { %v995_v59 = vadd.f32 %v994_v57, %v328_v34  ;;  %v1038_v60 = vadd.f32 %v1037_v58, %v336_v40  ;;  %6335 = vmatpush3.bf16.msra.mxu1 %v6756_v42  ;;  %6357 = vmatpush3.bf16.msra.mxu0 %v6757_v43  ;;  %v1217_v6 = vmax.f32 %v991_v51, 0.0  ;;  %v1219_v7 = vmax.f32 %v1034_v52, 0.0  ;;  %v6775_v31 = vld [vmem:[%s8791_s7 + $0x2c8] sm:$0xff]   ;;  %v6779_v42 = vld [vmem:[%s8791_s7 + $0x2d0] sm:$0xff]   ;;  %v6782_v54 = vld [vmem:[%s8791_s7 + $0x258] sm:$0xff]  }
 0x320   :  { %v1232_v2 = vmax.f32 %v993_v55, 0.0  ;;  %v1234_v3 = vmax.f32 %v1036_v56, 0.0  ;;  %6336 = vmatprep.subr.bf16.mxu1 %v6758_v37  ;;  %6358 = vmatprep.subr.bf16.mxu0 %v6759_v50  ;;  %v6777_v34 = vld [vmem:[%s8791_s7 + $0x288] sm:$0xff]   ;;  %v340_v40 = vrot.slane %v7715_v32, %v7560_v35  ;;  %v344_v43 = vrot.slane %v7715_v32, %v7571_v38  ;;  %v6781_v37 = vld [vmem:[%s8791_s7 + $0x290] sm:$0xff]   ;;  %v6783_v55 = vld [vmem:[%s8791_s7 + $0x2d8] sm:$0xff]  }
 0x321   :  { %v1233_v49 = vmax.f32 %v995_v59, 0.0  ;;  %v1235_v8 = vmax.f32 %v1038_v60, 0.0  ;;  %v352_v45 = vrot.slane %v7715_v32, %v7574_v39 }
 0x322   :  { %v1248_v9 = vpack.c.bf16 %v1232_v2, %v1216_v63  ;;  %v1250_v10 = vpack.c.bf16 %v1234_v3, %v1218_v1  ;;  %v6784_v3 = vld [vmem:[%s8791_s7 + $0x218] sm:$0xff]  }
 0x323   :  { %v1249_v11 = vpack.c.bf16 %v1233_v49, %v1217_v6  ;;  %v1251_v12 = vpack.c.bf16 %v1235_v8, %v1219_v7  ;;  %6337 = vmatpush3.bf16.msra.mxu1 %v6760_v61  ;;  %6359 = vmatpush3.bf16.msra.mxu0 %v6761_v62  ;;  %v6786_v8 = vld [vmem:[%s8791_s7 + $0x260] sm:$0xff]  }
 0x324   :  { %6338 = vmatprep.subr.bf16.mxu1 %v6762_v4  ;;  %6360 = vmatprep.subr.bf16.mxu0 %v6763_v5  ;;  %v6785_v4 = vld [vmem:[%s8791_s7 + $0x298] sm:$0xff]  }
 0x325   :  { %2403 = vmatprep.mubr.bf16.mxu1 %v1249_v11  ;;  %2444 = vmatprep.mubr.bf16.mxu0 %v1251_v12 }
 0x327   :  { %6339 = vmatpush3.bf16.msra.mxu1 %v6764_v13  ;;  %6361 = vmatpush3.bf16.msra.mxu0 %v6765_v14 }
 0x328   :  { %6340 = vmatprep.subr.bf16.mxu1 %v6766_v15  ;;  %6362 = vmatprep.subr.bf16.mxu0 %v6767_v16 }
 0x32b   :  { %6341 = vmatpush3.bf16.msra.mxu1 %v6768_v17  ;;  %6363 = vmatpush3.bf16.msra.mxu0 %v6769_v18  ;;  %v6788_v18 = vld [vmem:[%s8791_s7 + $0x220] sm:$0xff]  }
 0x32c   :  { %6370 = vmatprep.subr.bf16.mxu1 %v6770_v19  ;;  %6392 = vmatprep.subr.bf16.mxu0 %v6771_v20  ;;  %v6789_v19 = vld [vmem:[%s8791_s7 + $0x2a0] sm:$0xff]   ;;  %v6790_v20 = vld [vmem:[%s8791_s7 + $0x268] sm:$0xff]  }
 0x32e   :  { %2404 = vmatmul.mubr.bf16.vlgmr.msra.gmra.mrb[20].mxu1 %v1248_v9  ;;  %2445 = vmatmul.mubr.bf16.vlgmr.msra.gmra.mrb[24].mxu0 %v1250_v10  ;;  %v6787_v9 = vld [vmem:[%s8791_s7 + $0x2e0] sm:$0xff]  }
 0x32f   :  { %6371 = vmatpush3.bf16.msra.mxu1 %v6772_v28  ;;  %6393 = vmatpush3.bf16.msra.mxu0 %v6773_v29  ;;  %v6791_v28 = vld [vmem:[%s8791_s7 + $0x2e8] sm:$0xff]  }
 0x330   :  { %6372 = vmatprep.subr.bf16.mxu1 %v6774_v30  ;;  %6394 = vmatprep.subr.bf16.mxu0 %v6775_v31  ;;  %v6792_v29 = vld [vmem:[%s8791_s7 + $0x228] sm:$0xff]   ;;  %v6794_v31 = vld [vmem:[%s8791_s7 + $0x270] sm:$0xff]  }
 0x331   :  { %v6793_v30 = vld [vmem:[%s8791_s7 + $0x2a8] sm:$0xff]  }
 0x333   :  { %v1074_v46 = vpop.f32.mrb[8].mxu1  ;;  %v1117_v47 = vpop.f32.mrb[12].mxu0  ;;  %6373 = vmatpush3.bf16.msra.mxu1 %v6776_v33  ;;  %6395 = vmatpush3.bf16.msra.mxu0 %v6777_v34  ;;  %v6795_v33 = vld [vmem:[%s8791_s7 + $0x2f0] sm:$0xff]  }
 0x334   :  { %v1075_v50 = vadd.f32 %v1074_v46, %v340_v40  ;;  %v1118_v51 = vadd.f32 %v1117_v47, %v348_v41  ;;  %v1076_v52 = vpop.f32.mrb[9].mxu1  ;;  %v1119_v53 = vpop.f32.mrb[13].mxu0  ;;  %6374 = vmatprep.subr.bf16.mxu1 %v6778_v23  ;;  %6396 = vmatprep.subr.bf16.mxu0 %v6779_v42  ;;  %v6796_v34 = vld [vmem:[%s8791_s7 + $0x230] sm:$0xff]   ;;  %v6799_v23 = vld [vmem:[%s8791_s7 + $0x2f8] sm:$0xff]   ;;  %v364_v46 = vrot.slane %v7715_v32, %v7624_v22  ;;  %v6802_v47 = vld [vmem:[%s8791_s7 + $0x340] sm:$0xff]  }
 0x335   :  { %v1077_v56 = vadd.f32 %v1076_v52, %v344_v43  ;;  %v1120_v57 = vadd.f32 %v1119_v53, %v352_v45  ;;  %v1078_v58 = vpop.f32.mrb[10].mxu1  ;;  %v1121_v59 = vpop.f32.mrb[14].mxu0  ;;  %v6800_v42 = vld [vmem:[%s8791_s7 + $0x238] sm:$0xff]   ;;  %v6804_v53 = vld [vmem:[%s8791_s7 + $0x300] sm:$0xff]  }
 0x336   :  { %v1079_v60 = vadd.f32 %v1078_v58, %v340_v40  ;;  %v1122_v61 = vadd.f32 %v1121_v59, %v348_v41  ;;  %v1080_v62 = vpop.f32.mrb[11].mxu1  ;;  %v1123_v63 = vpop.f32.mrb[15].mxu0  ;;  %v1220_v5 = vmax.f32 %v1075_v50, 0.0  ;;  %v1222_v6 = vmax.f32 %v1118_v51, 0.0  ;;  %v6797_v40 = vld [vmem:[%s8791_s7 + $0x2b0] sm:$0xff]   ;;  %v6798_v41 = vld [vmem:[%s8791_s7 + $0x278] sm:$0xff]  }
 0x337   :  { %v1081_v1 = vadd.f32 %v1080_v62, %v344_v43  ;;  %v1124_v2 = vadd.f32 %v1123_v63, %v352_v45  ;;  %6375 = vmatpush3.bf16.msra.mxu1 %v6780_v48  ;;  %6397 = vmatpush3.bf16.msra.mxu0 %v6781_v37  ;;  %v1221_v10 = vmax.f32 %v1077_v56, 0.0  ;;  %v1223_v11 = vmax.f32 %v1120_v57, 0.0  ;;  %v6801_v43 = vld [vmem:[%s8791_s7 + $0x2b8] sm:$0xff]   ;;  %v6803_v48 = vld [vmem:[%s8791_s7 + $0x3c0] sm:$0xff]   ;;  %v6807_v59 = vld [vmem:[%s8791_s7 + $0x3c8] sm:$0xff]  }
 0x338   :  { %v1236_v7 = vmax.f32 %v1079_v60, 0.0  ;;  %v1238_v49 = vmax.f32 %v1122_v61, 0.0  ;;  %6376 = vmatprep.subr.bf16.mxu1 %v6782_v54  ;;  %6398 = vmatprep.subr.bf16.mxu0 %v6783_v55  ;;  %v356_v45 = vrot.slane %v7715_v32, %v7621_v21  ;;  %v360_v37 = vrot.slane %v7715_v32, %v7627_v24  ;;  %v6805_v54 = vld [vmem:[%s8791_s7 + $0x380] sm:$0xff]  }
 0x339   :  { %v1237_v12 = vmax.f32 %v1081_v1, 0.0  ;;  %v1239_v13 = vmax.f32 %v1124_v2, 0.0  ;;  %v368_v50 = vrot.slane %v7715_v32, %v7630_v26  ;;  %v6806_v32 = vld [vmem:[%s8791_s7 + $0x348] sm:$0xff]  }
 0x33a   :  { %v7761_v14 = vpack.c.bf16 %v1236_v7, %v1220_v5  ;;  %v7763_v15 = vpack.c.bf16 %v1238_v49, %v1222_v6  ;;  %v6808_v7 = vld [vmem:[%s8791_s7 + $0x308] sm:$0xff]  }
 0x33b   :  { %v1253_v16 = vpack.c.bf16 %v1237_v12, %v1221_v10  ;;  %v1255_v17 = vpack.c.bf16 %v1239_v13, %v1223_v11  ;;  %6377 = vmatpush3.bf16.msra.mxu1 %v6784_v3  ;;  %6399 = vmatpush3.bf16.msra.mxu0 %v6785_v4  ;;  %v6809_v49 = vld [vmem:[%s8791_s7 + $0x388] sm:$0xff]   ;;  %v6810_v12 = vld [vmem:[%s8791_s7 + $0x350] sm:$0xff]  }
 0x33c   :  { %6378 = vmatprep.subr.bf16.mxu1 %v6786_v8  ;;  %6400 = vmatprep.subr.bf16.mxu0 %v6787_v9  ;;  %v6811_v13 = vld [vmem:[%s8791_s7 + $0x3d0] sm:$0xff]  }
 0x33d   :  { %2485 = vmatprep.mubr.bf16.mxu1 %v1253_v16  ;;  %2526 = vmatprep.mubr.bf16.mxu0 %v1255_v17 }
 0x33f   :  { %6379 = vmatpush3.bf16.msra.mxu1 %v6788_v18  ;;  %6401 = vmatpush3.bf16.msra.mxu0 %v6789_v19 }
 0x340   :  { %6380 = vmatprep.subr.bf16.mxu1 %v6790_v20  ;;  %6402 = vmatprep.subr.bf16.mxu0 %v6791_v28 }
 0x343   :  { %6381 = vmatpush3.bf16.msra.mxu1 %v6792_v29  ;;  %6403 = vmatpush3.bf16.msra.mxu0 %v6793_v30  ;;  %v6812_v29 = vld [vmem:[%s8791_s7 + $0x310] sm:$0xff]  }
 0x344   :  { %6382 = vmatprep.subr.bf16.mxu1 %v6794_v31  ;;  %6404 = vmatprep.subr.bf16.mxu0 %v6795_v33  ;;  %v6813_v30 = vld [vmem:[%s8791_s7 + $0x390] sm:$0xff]   ;;  %v6814_v31 = vld [vmem:[%s8791_s7 + $0x358] sm:$0xff]  }
 0x345   :  { %v6815_v33 = vld [vmem:[%s8791_s7 + $0x3d8] sm:$0xff]  }
 0x347   :  { %6383 = vmatpush3.bf16.msra.mxu1 %v6796_v34  ;;  %6405 = vmatpush3.bf16.msra.mxu0 %v6797_v40  ;;  %v6816_v34 = vld [vmem:[%s8791_s7 + $0x318] sm:$0xff]  }
 0x348   :  { %6384 = vmatprep.subr.bf16.mxu1 %v6798_v41  ;;  %6406 = vmatprep.subr.bf16.mxu0 %v6799_v23  ;;  %v6817_v40 = vld [vmem:[%s8791_s7 + $0x398] sm:$0xff]   ;;  %v6818_v41 = vld [vmem:[%s8791_s7 + $0x360] sm:$0xff]  }
 0x349   :  { %v6819_v23 = vld [vmem:[%s8791_s7 + $0x3e0] sm:$0xff]  }
 0x34b   :  { %v1160_v51 = vpop.f32.mrb[12].mxu1  ;;  %v1203_v52 = vpop.f32.mrb[16].mxu0  ;;  %6385 = vmatpush3.bf16.msra.mxu1 %v6800_v42  ;;  %6407 = vmatpush3.bf16.msra.mxu0 %v6801_v43  ;;  %v6820_v42 = vld [vmem:[%s8791_s7 + $0x320] sm:$0xff]  }
 0x34c   :  { %v1161_v55 = vadd.f32 %v1160_v51, %v356_v45  ;;  %v1204_v56 = vadd.f32 %v1203_v52, %v364_v46  ;;  %v1162_v57 = vpop.f32.mrb[13].mxu1  ;;  %v1205_v58 = vpop.f32.mrb[17].mxu0  ;;  %6414 = vmatprep.subr.bf16.mxu1 %v6802_v47  ;;  %6436 = vmatprep.subr.bf16.mxu0 %v6803_v48  ;;  %v6821_v43 = vld [vmem:[%s8791_s7 + $0x3a0] sm:$0xff]   ;;  %v6824_v47 = vld [vmem:[%s8791_s7 + $0x328] sm:$0xff]   ;;  %v6828_v51 = vld [vmem:[%s8791_s7 + $0x330] sm:$0xff]  }
 0x34d   :  { %v1163_v60 = vadd.f32 %v1162_v57, %v360_v37  ;;  %v1206_v61 = vadd.f32 %v1205_v58, %v368_v50  ;;  %v1164_v62 = vpop.f32.mrb[14].mxu1  ;;  %v1207_v63 = vpop.f32.mrb[18].mxu0  ;;  %v6825_v48 = vld [vmem:[%s8791_s7 + $0x3a8] sm:$0xff]   ;;  %v6829_v52 = vld [vmem:[%s8791_s7 + $0x3b0] sm:$0xff]  }
 0x34e   :  { %v1165_v1 = vadd.f32 %v1164_v62, %v356_v45  ;;  %v1208_v2 = vadd.f32 %v1207_v63, %v364_v46  ;;  %v1166_v3 = vpop.f32.mrb[15].mxu1  ;;  %v1209_v4 = vpop.f32.mrb[19].mxu0  ;;  %2486 = vmatmul.mubr.bf16.vlgmr.msra.gmra.mrb[24].mxu1 %v7761_v14  ;;  %2527 = vmatmul.mubr.bf16.vlgmr.msra.gmra.mrb[28].mxu0 %v7763_v15  ;;  %v1224_v8 = vmax.f32 %v1161_v55, 0.0  ;;  %v1226_v9 = vmax.f32 %v1204_v56, 0.0  ;;  %v6822_v45 = vld [vmem:[%s8791_s7 + $0x368] sm:$0xff]   ;;  %v6832_v55 = vld [vmem:[%s8791_s7 + $0x338] sm:$0xff]  }
 0x34f   :  { %v1167_v5 = vadd.f32 %v1166_v3, %v360_v37  ;;  %v1210_v6 = vadd.f32 %v1209_v4, %v368_v50  ;;  %6415 = vmatpush3.bf16.msra.mxu1 %v6804_v53  ;;  %6437 = vmatpush3.bf16.msra.mxu0 %v6805_v54  ;;  %v1225_v14 = vmax.f32 %v1163_v60, 0.0  ;;  %v1227_v15 = vmax.f32 %v1206_v61, 0.0  ;;  %v6823_v46 = vld [vmem:[%s8791_s7 + $0x3e8] sm:$0xff]   ;;  %v6826_v37 = vld [vmem:[%s8791_s7 + $0x370] sm:$0xff]   ;;  %v6830_v53 = vld [vmem:[%s8791_s7 + $0x378] sm:$0xff]  }
 0x350   :  { %v1240_v10 = vmax.f32 %v1165_v1, 0.0  ;;  %v1242_v11 = vmax.f32 %v1208_v2, 0.0  ;;  %6416 = vmatprep.subr.bf16.mxu1 %v6806_v32  ;;  %6438 = vmatprep.subr.bf16.mxu0 %v6807_v59  ;;  %v6827_v50 = vld [vmem:[%s8791_s7 + $0x3f0] sm:$0xff]   ;;  %v6831_v54 = vld [vmem:[%s8791_s7 + $0x3f8] sm:$0xff]   ;;  %v5521_v32 = vld [vmem:[%s8795_s8] ss:$0 sm:$0xff] }
 0x351   :  { %v1241_v16 = vmax.f32 %v1167_v5, 0.0  ;;  %v1243_v17 = vmax.f32 %v1210_v6, 0.0  ;;  %v6833_v56 = vld [vmem:[%s8791_s7 + $0x3b8] sm:$0xff]  }
 0x352   :  { %v1256_v18 = vpack.c.bf16 %v1240_v10, %v1224_v8  ;;  %v1258_v19 = vpack.c.bf16 %v1242_v11, %v1226_v9 }
 0x353   :  { %v1257_v20 = vpack.c.bf16 %v1241_v16, %v1225_v14  ;;  %v1259_v28 = vpack.c.bf16 %v1243_v17, %v1227_v15  ;;  %6417 = vmatpush3.bf16.msra.mxu1 %v6808_v7  ;;  %6439 = vmatpush3.bf16.msra.mxu0 %v6809_v49 }
 0x354   :  { %6418 = vmatprep.subr.bf16.mxu1 %v6810_v12  ;;  %6440 = vmatprep.subr.bf16.mxu0 %v6811_v13 }
 0x355   :  { %2567 = vmatprep.mubr.bf16.mxu1 %v1257_v20  ;;  %2608 = vmatprep.mubr.bf16.mxu0 %v1259_v28 }
 0x357   :  { %6419 = vmatpush3.bf16.msra.mxu1 %v6812_v29  ;;  %6441 = vmatpush3.bf16.msra.mxu0 %v6813_v30 }
 0x358   :  { %6420 = vmatprep.subr.bf16.mxu1 %v6814_v31  ;;  %6442 = vmatprep.subr.bf16.mxu0 %v6815_v33 }
 0x35b   :  { %6421 = vmatpush3.bf16.msra.mxu1 %v6816_v34  ;;  %6443 = vmatpush3.bf16.msra.mxu0 %v6817_v40 }
 0x35c   :  { %6422 = vmatprep.subr.bf16.mxu1 %v6818_v41  ;;  %6444 = vmatprep.subr.bf16.mxu0 %v6819_v23 }
 0x35f   :  { %6423 = vmatpush3.bf16.msra.mxu1 %v6820_v42  ;;  %6445 = vmatpush3.bf16.msra.mxu0 %v6821_v43 }
 0x360   :  { %6424 = vmatprep.subr.bf16.mxu1 %v6822_v45  ;;  %6446 = vmatprep.subr.bf16.mxu0 %v6823_v46 }
 0x363   :  { %6425 = vmatpush3.bf16.msra.mxu1 %v6824_v47  ;;  %6447 = vmatpush3.bf16.msra.mxu0 %v6825_v48 }
 0x364   :  { %6426 = vmatprep.subr.bf16.mxu1 %v6826_v37  ;;  %6448 = vmatprep.subr.bf16.mxu0 %v6827_v50 }
 0x367   :  { %6427 = vmatpush3.bf16.msra.mxu1 %v6828_v51  ;;  %6449 = vmatpush3.bf16.msra.mxu0 %v6829_v52 }
 0x368   :  { %6428 = vmatprep.subr.bf16.mxu1 %v6830_v53  ;;  %6450 = vmatprep.subr.bf16.mxu0 %v6831_v54 }
 0x36b   :  { %6429 = vmatpush3.bf16.msra.mxu1 %v6832_v55  ;;  %6451 = vmatpush3.bf16.msra.mxu0 %v6833_v56 }
 0x36c   :  { %6664 = vmatprep.subr.bf16.mxu1 %v6999_v0 }
 0x36e   :  { %2568 = vmatmul.mubr.bf16.vlgmr.msra.gmra.mrb[28].mxu1 %v1256_v18  ;;  %2609 = vmatmul.mubr.bf16.vlgmr.msra.gmra.mrb[32].mxu0 %v1258_v19 }
 0x36f   :  { %6676 = vmatprep.mubr.msk.bf16.mxu1 %vm7000_vm0, %v6999_v0  ;;  %3499 = vmatprep.mubr.bf16.mxu0 %v7001_v25 }
 0x3e1   :  { %v6298_v57 = vpop.f32.mrb[16].mxu1  ;;  %v6320_v58 = vpop.f32.mrb[20].mxu0 }
 0x3e2   :  { %v6299_v59 = vpop.f32.mrb[17].mxu1  ;;  %v6321_v60 = vpop.f32.mrb[21].mxu0 }
 0x3e3   :  { %v6300_v61 = vadd.f32 %v6299_v59, %v6298_v57  ;;  %v6322_v62 = vadd.f32 %v6321_v60, %v6320_v58  ;;  %v6301_v63 = vpop.f32.mrb[18].mxu1  ;;  %v6323_v1 = vpop.f32.mrb[22].mxu0 }
 0x3e4   :  { %v6302_v2 = vpop.f32.mrb[19].mxu1  ;;  %v6324_v3 = vpop.f32.mrb[23].mxu0 }
 0x3e5   :  { %v2324_v4 = vadd.f32 %v6300_v61, %v5521_v32  ;;  %v6303_v5 = vadd.f32 %v6302_v2, %v6301_v63  ;;  %v6325_v6 = vadd.f32 %v6324_v3, %v6323_v1 }
 0x3e7   :  { %v2365_v7 = vadd.f32 %v6322_v62, %v2324_v4  ;;  %v2327_v49 = vadd.f32 %v6303_v5, %v5521_v32 }
 0x3e9   :  { %v2368_v8 = vadd.f32 %v6325_v6, %v2327_v49 }
 0x401   :  { %v6342_v9 = vpop.f32.mrb[20].mxu1  ;;  %v6364_v10 = vpop.f32.mrb[24].mxu0 }
 0x402   :  { %v6343_v11 = vpop.f32.mrb[21].mxu1  ;;  %v6365_v12 = vpop.f32.mrb[25].mxu0 }
 0x403   :  { %v6344_v13 = vadd.f32 %v6343_v11, %v6342_v9  ;;  %v6366_v14 = vadd.f32 %v6365_v12, %v6364_v10  ;;  %v6345_v15 = vpop.f32.mrb[22].mxu1  ;;  %v6367_v16 = vpop.f32.mrb[26].mxu0 }
 0x404   :  { %v6346_v17 = vpop.f32.mrb[23].mxu1  ;;  %v6368_v18 = vpop.f32.mrb[27].mxu0 }
 0x405   :  { %v2406_v19 = vadd.f32 %v6344_v13, %v2365_v7  ;;  %v6347_v20 = vadd.f32 %v6346_v17, %v6345_v15  ;;  %v6369_v28 = vadd.f32 %v6368_v18, %v6367_v16  ;;  %v6835_v18 = vld [vmem:[%s8787_s1 + $0x38] sm:$0xff]  }
 0x407   :  { %v2447_v29 = vadd.f32 %v6366_v14, %v2406_v19  ;;  %v2409_v30 = vadd.f32 %v6347_v20, %v2368_v8  ;;  %v6836_v19 = vld [vmem:[%s8787_s1 + $0x40] sm:$0xff]   ;;  %v6837_v20 = vld [vmem:[%s8787_s1 + $0x48] sm:$0xff]  }
 0x409   :  { %v2450_v31 = vadd.f32 %v6369_v28, %v2409_v30  ;;  %v6838_v28 = vld [vmem:[%s8787_s1 + $0x50] sm:$0xff]  }
 0x421   :  { %v6386_v33 = vpop.f32.mrb[24].mxu1  ;;  %v6408_v34 = vpop.f32.mrb[28].mxu0 }
 0x422   :  { %v6387_v40 = vpop.f32.mrb[25].mxu1  ;;  %v6409_v41 = vpop.f32.mrb[29].mxu0 }
 0x423   :  { %v6388_v23 = vadd.f32 %v6387_v40, %v6386_v33  ;;  %v6410_v42 = vadd.f32 %v6409_v41, %v6408_v34  ;;  %v6389_v43 = vpop.f32.mrb[26].mxu1  ;;  %v6411_v45 = vpop.f32.mrb[30].mxu0 }
 0x424   :  { %v6390_v46 = vpop.f32.mrb[27].mxu1  ;;  %v6412_v47 = vpop.f32.mrb[31].mxu0 }
 0x425   :  { %v2488_v48 = vadd.f32 %v6388_v23, %v2447_v29  ;;  %v6391_v37 = vadd.f32 %v6390_v46, %v6389_v43  ;;  %v6413_v50 = vadd.f32 %v6412_v47, %v6411_v45  ;;  %v6839_v29 = vld [vmem:[%s8787_s1 + $0x58] sm:$0xff]  }
 0x427   :  { %v2529_v51 = vadd.f32 %v6410_v42, %v2488_v48  ;;  %v2491_v52 = vadd.f32 %v6391_v37, %v2450_v31  ;;  %v5650_v42 = vld [vmem:[%s8796_s9] ss:$0 sm:$0xff] }
 0x428   :  { %v5651_v48 = vld [vmem:[%s8797_s10] ss:$0 sm:$0xff] }
 0x429   :  { %v2532_v53 = vadd.f32 %v6413_v50, %v2491_v52 }
 0x441   :  { %v6430_v54 = vpop.f32.mrb[28].mxu1  ;;  %v6452_v55 = vpop.f32.mrb[32].mxu0 }
 0x442   :  { %v6431_v56 = vpop.f32.mrb[29].mxu1  ;;  %v6453_v57 = vpop.f32.mrb[33].mxu0 }
 0x443   :  { %v6432_v58 = vadd.f32 %v6431_v56, %v6430_v54  ;;  %v6454_v32 = vadd.f32 %v6453_v57, %v6452_v55  ;;  %v6433_v59 = vpop.f32.mrb[30].mxu1  ;;  %v6455_v60 = vpop.f32.mrb[34].mxu0 }
 0x444   :  { %v6434_v61 = vpop.f32.mrb[31].mxu1  ;;  %v6456_v62 = vpop.f32.mrb[35].mxu0 }
 0x445   :  { %v2570_v63 = vadd.f32 %v6432_v58, %v2529_v51  ;;  %v6435_v1 = vadd.f32 %v6434_v61, %v6433_v59  ;;  %v6457_v2 = vadd.f32 %v6456_v62, %v6455_v60 }
 0x447   :  { %v2611_v3 = vadd.f32 %v6454_v32, %v2570_v63  ;;  %v2573_v4 = vadd.f32 %v6435_v1, %v2532_v53  ;;  %v5664_v53 = vld [vmem:[%s8789_s2 + $0x1] ss:$0 sm:$0xff] }
 0x449   :  { %v2614_v5 = vadd.f32 %v6457_v2, %v2573_v4  ;;  %v2617_v6 = vadd.f32 %v2611_v3, %v7233_v44 }
 0x44b   :  { %v2621_v7 = vsel %vm115_vm1, %v2617_v6, 0.0  ;;  %v2618_v49 = vadd.f32 %v2614_v5, %v7235_v27  ;;  %v6834_v27 = vld [vmem:[%s8787_s1 + $0x30] sm:$0xff]  }
 0x44c   :  { %2622 = vadd.xlane.f32.xlu0 %v2621_v7  ;;  %6665 = vmatpush3.bf16.msra.mxu1 %v6834_v27  ;;  %v5691_v27 = vld [vmem:[%s8790_s5 + $0x388] sm:$0xff] }
 0x44d   :  { %v2624_v8 = vsel %vm115_vm1, %v2618_v49, 0.0  ;;  %6666 = vmatprep.subr.bf16.mxu1 %v6999_v0 }
 0x44e   :  { %2625 = vadd.xlane.f32.xlu1 %v2624_v8 }
 0x450   :  { %6667 = vmatpush3.bf16.msra.mxu1 %v6835_v18 }
 0x451   :  { %6668 = vmatprep.subr.bf16.mxu1 %v6999_v0 }
 0x454   :  { %6669 = vmatpush3.bf16.msra.mxu1 %v6836_v19  ;;  %v5699_v19 = vld [vmem:[%s8790_s5 + $0x3c8] sm:$0xff] }
 0x455   :  { %6670 = vmatprep.subr.bf16.mxu1 %v6999_v0 }
 0x458   :  { %6671 = vmatpush3.bf16.msra.mxu1 %v6837_v20 }
 0x459   :  { %6672 = vmatprep.subr.bf16.mxu1 %v6999_v0 }
 0x45c   :  { %6673 = vmatpush3.bf16.msra.mxu1 %v6838_v28  ;;  %v5790_v28 = vcombine.low %v5691_v27, %v5699_v19 }
 0x45d   :  { %6674 = vmatprep.subr.bf16.mxu1 %v6999_v0 }
 0x460   :  { %6675 = vmatpush3.bf16.msra.mxu1 %v6839_v29  ;;  %v5791_v29 = vcombine.high %v5691_v27, %v5699_v19 }
 0x4d9   :  { %v2623_v9 = vpop.xlane.xlu0 %2622 }
 0x4da   :  { %v2627_v10 = vmul.f32 0.010416667, %v2623_v9  ;;  %v5674_v9 = vld [vmem:[%s8790_s5 + $0x300] sm:$0xff] }
 0x4db   :  { %v2626_v11 = vpop.xlane.xlu1 %2625 }
 0x4dc   :  { %v2629_v12 = vsub.f32 %v2617_v6, %v2627_v10  ;;  %v2628_v13 = vmul.f32 0.010416667, %v2626_v11  ;;  %v5682_v10 = vld [vmem:[%s8790_s5 + $0x340] sm:$0xff]  ;;  %v5675_v11 = vld [vmem:[%s8790_s5 + $0x308] sm:$0xff] }
 0x4de   :  { %v2630_v14 = vsub.f32 %v2618_v49, %v2628_v13  ;;  %v2631_v15 = vmul.f32 %v2629_v12, %v2629_v12  ;;  %v5683_v13 = vld [vmem:[%s8790_s5 + $0x348] sm:$0xff] }
 0x4e0   :  { %v2633_v16 = vsel %vm115_vm1, %v2631_v15, 0.0  ;;  %v2632_v17 = vmul.f32 %v2630_v14, %v2630_v14  ;;  %v5774_v15 = vcombine.low %v5675_v11, %v5683_v13 }
 0x4e1   :  { %2634 = vadd.xlane.f32.xlu0 %v2633_v16  ;;  %v5775_v16 = vcombine.high %v5675_v11, %v5683_v13 }
 0x4e2   :  { %v2636_v44 = vsel %vm115_vm1, %v2632_v17, 0.0  ;;  %v5690_v17 = vld [vmem:[%s8790_s5 + $0x380] sm:$0xff] }
 0x4e3   :  { %2637 = vadd.xlane.f32.xlu1 %v2636_v44  ;;  %3510 = vmatprep.subr.bf16.mxu1 %v5775_v16  ;;  %v5698_v44 = vld [vmem:[%s8790_s5 + $0x3c0] sm:$0xff] }
 0x4e4   :  { %v5789_v18 = vcombine.high %v5690_v17, %v5698_v44  ;;  %v5788_v20 = vcombine.low %v5690_v17, %v5698_v44 }
 0x56e   :  { %v2635_v30 = vpop.xlane.xlu0 %2634 }
 0x56f   :  { %v2639_v31 = vmul.f32 0.010416667, %v2635_v30  ;;  %v5706_v30 = vld [vmem:[%s8790_s5 + $0x400] sm:$0xff] }
 0x570   :  { %v2638_v33 = vpop.xlane.xlu1 %2637 }
 0x571   :  { %v2641_v34 = vadd.f32 1e-05, %v2639_v31  ;;  %v2640_v40 = vmul.f32 0.010416667, %v2638_v33  ;;  %v5714_v31 = vld [vmem:[%s8790_s5 + $0x440] sm:$0xff]  ;;  %v5707_v33 = vld [vmem:[%s8790_s5 + $0x408] sm:$0xff] }
 0x573   :  { %6979 = vrsqrt.f32 %v2641_v34  ;;  %v2642_v41 = vadd.f32 1e-05, %v2640_v40  ;;  %v5805_v34 = vcombine.high %v5706_v30, %v5714_v31  ;;  %v5715_v40 = vld [vmem:[%s8790_s5 + $0x448] sm:$0xff] }
 0x575   :  { %6981 = vrsqrt.f32 %v2642_v41  ;;  %v5804_v41 = vcombine.low %v5706_v30, %v5714_v31  ;;  %v5673_v30 = vld [vmem:[%s8793_s4 + $0x1] ss:$0 sm:$0xff] }
 0x57d   :  { %v6980_v23 = vpop.eup %6979 }
 0x57e   :  { %v2645_v43 = vmul.f32 %v6980_v23, %v2629_v12  ;;  %v5773_v12 = vcombine.high %v5674_v9, %v5682_v10  ;;  %v5806_v23 = vcombine.low %v5707_v33, %v5715_v40 }
 0x57f   :  { %v6982_v45 = vpop.eup %6981 }
 0x580   :  { %v2651_v46 = vmul.f32 %v5650_v42, %v2645_v43  ;;  %v2646_v47 = vmul.f32 %v6982_v45, %v2630_v14  ;;  %v5772_v14 = vcombine.low %v5674_v9, %v5682_v10  ;;  %3467 = vmatprep.subr.bf16.mxu0 %v5773_v12  ;;  %v5722_v43 = vld [vmem:[%s8790_s5 + $0x480] sm:$0xff]  ;;  %v5685_v9 = vld [vmem:[%s8790_s5 + $0x358] sm:$0xff] }
 0x581   :  { %v5730_v45 = vld [vmem:[%s8790_s5 + $0x4c0] sm:$0xff] }
 0x582   :  { %v2652_v37 = vmul.f32 %v5650_v42, %v2646_v47  ;;  %v2657_v50 = vadd.f32 %v5651_v48, %v2651_v46  ;;  %3468 = vmatpush1.bf16.msra.mxu0 %v5772_v14  ;;  %v5807_v42 = vcombine.high %v5707_v33, %v5715_v40  ;;  %v5723_v46 = vld [vmem:[%s8790_s5 + $0x488] sm:$0xff]  ;;  %v5821_v47 = vcombine.high %v5722_v43, %v5730_v45  ;;  %v5692_v33 = vld [vmem:[%s8790_s5 + $0x390] sm:$0xff] }
 0x583   :  { %3469 = vmatprep.subr.bf16.mxu0 %v5789_v18  ;;  %v5672_v18 = vld [vmem:[%s8792_s3 + $0x1] ss:$0 sm:$0xff] }
 0x584   :  { %v2658_v51 = vadd.f32 %v5651_v48, %v2652_v37  ;;  %v5731_v48 = vld [vmem:[%s8790_s5 + $0x4c8] sm:$0xff]  ;;  %v5820_v37 = vcombine.low %v5722_v43, %v5730_v45  ;;  %v5708_v45 = vld [vmem:[%s8790_s5 + $0x410] sm:$0xff] }
 0x586   :  { %v2659_v52 = vpack.c.bf16 %v2658_v51, %v2657_v50  ;;  %3470 = vmatpush1.bf16.msra.mxu0 %v5788_v20 }
 0x587   :  { %3471 = vmatprep.subr.bf16.mxu0 %v5805_v34  ;;  %v5700_v34 = vld [vmem:[%s8790_s5 + $0x3d0] sm:$0xff] }
 0x588   :  { %6677 = vmatmul.mubr.msk.bf16.vlgmr.msra.gmra.mrb[32].mxu1 %vm115_vm1, %v2659_v52  ;;  %v5738_v52 = vld [vmem:[%s8790_s5 + $0x500] sm:$0xff] }
 0x589   :  { %3542 = vmatprep.mubr.bf16.mxu1 %v7001_v25  ;;  %3511 = vmatpush1.bf16.msra.mxu1 %v5774_v15 }
 0x58a   :  { %3512 = vmatprep.subr.bf16.mxu1 %v5791_v29  ;;  %3472 = vmatpush1.bf16.msra.mxu0 %v5804_v41 }
 0x58b   :  { %3473 = vmatprep.subr.bf16.mxu0 %v5821_v47  ;;  %v5709_v47 = vld [vmem:[%s8790_s5 + $0x418] sm:$0xff] }
 0x58d   :  { %3513 = vmatpush1.bf16.msra.mxu1 %v5790_v28 }
 0x58e   :  { %3514 = vmatprep.subr.bf16.mxu1 %v5807_v42  ;;  %3474 = vmatpush1.bf16.msra.mxu0 %v5820_v37  ;;  %v5793_v42 = vcombine.high %v5692_v33, %v5700_v34  ;;  %v5792_v37 = vcombine.low %v5692_v33, %v5700_v34 }
 0x591   :  { %3515 = vmatpush1.bf16.msra.mxu1 %v5806_v23 }
 0x65b   :  { %v2751_v54 = vpop.f32.mrb[32].mxu1 }
 0x65c   :  { %v2752_v55 = vadd.f32 %v5664_v53, %v2751_v54  ;;  %v6678_v56 = vpop.f32.mrb[33].mxu1  ;;  %v5739_v54 = vld [vmem:[%s8790_s5 + $0x508] sm:$0xff] }
 0x65d   :  { %v2754_v57 = vpop.f32.mrb[34].mxu1  ;;  %v5747_v56 = vld [vmem:[%s8790_s5 + $0x548] sm:$0xff] }
 0x65e   :  { %v2755_v58 = vadd.f32 %v5664_v53, %v2754_v57  ;;  %v6679_v32 = vpop.f32.mrb[35].mxu1  ;;  %v2758_v59 = vadd.f32 %v2752_v55, %v2657_v50  ;;  %v5822_v50 = vcombine.low %v5723_v46, %v5731_v48  ;;  %v5746_v53 = vld [vmem:[%s8790_s5 + $0x540] sm:$0xff] }
 0x65f   :  { %v5837_v55 = vcombine.high %v5738_v52, %v5746_v53  ;;  %v5836_v57 = vcombine.low %v5738_v52, %v5746_v53  ;;  %v5839_v32 = vcombine.high %v5739_v54, %v5747_v56  ;;  %v5724_v53 = vld [vmem:[%s8790_s5 + $0x490] sm:$0xff] }
 0x660   :  { %v2762_v60 = vsel %vm115_vm1, %v2758_v59, 0.0  ;;  %v2759_v61 = vadd.f32 %v2755_v58, %v2658_v51  ;;  %v5823_v51 = vcombine.high %v5723_v46, %v5731_v48  ;;  %v5838_v58 = vcombine.low %v5739_v54, %v5747_v56  ;;  %v5716_v46 = vld [vmem:[%s8790_s5 + $0x450] sm:$0xff]  ;;  %v5717_v48 = vld [vmem:[%s8790_s5 + $0x458] sm:$0xff] }
 0x661   :  { %2763 = vadd.xlane.f32.xlu0 %v2762_v60  ;;  %3475 = vmatprep.subr.bf16.mxu0 %v5837_v55  ;;  %v5762_v60 = vld [vmem:[%s8790_s5 + $0x5c0] sm:$0xff]  ;;  %v5811_v52 = vcombine.high %v5709_v47, %v5717_v48  ;;  %v5732_v54 = vld [vmem:[%s8790_s5 + $0x4d0] sm:$0xff]  ;;  %v5725_v55 = vld [vmem:[%s8790_s5 + $0x498] sm:$0xff] }
 0x662   :  { %v2765_v62 = vsel %vm115_vm1, %v2759_v61, 0.0  ;;  %3516 = vmatprep.subr.bf16.mxu1 %v5823_v51  ;;  %3476 = vmatpush1.bf16.msra.mxu0 %v5836_v57  ;;  %v5809_v51 = vcombine.high %v5708_v45, %v5716_v46  ;;  %v5733_v56 = vld [vmem:[%s8790_s5 + $0x4d8] sm:$0xff]  ;;  %v5808_v57 = vcombine.low %v5708_v45, %v5716_v46  ;;  %v5719_v45 = vld [vmem:[%s8790_s5 + $0x468] sm:$0xff] }
 0x663   :  { %2766 = vadd.xlane.f32.xlu1 %v2765_v62  ;;  %3517 = vmatpush1.bf16.msra.mxu1 %v5822_v50 }
 0x664   :  { %3518 = vmatprep.subr.bf16.mxu1 %v5839_v32  ;;  %v5825_v32 = vcombine.high %v5724_v53, %v5732_v54 }
 0x667   :  { %3519 = vmatpush1.bf16.msra.mxu1 %v5838_v58  ;;  %v5810_v58 = vcombine.low %v5709_v47, %v5717_v48 }
 0x6ee   :  { %v2764_v63 = vpop.xlane.xlu0 %2763 }
 0x6ef   :  { %v2768_v1 = vmul.f32 0.010416667, %v2764_v63  ;;  %v5763_v63 = vld [vmem:[%s8790_s5 + $0x5c8] sm:$0xff] }
 0x6f0   :  { %v2767_v2 = vpop.xlane.xlu1 %2766 }
 0x6f1   :  { %v7962_v3 = vsub.f32 %v2758_v59, %v2768_v1  ;;  %v2769_v4 = vmul.f32 0.010416667, %v2767_v2  ;;  %v5754_v59 = vld [vmem:[%s8790_s5 + $0x580] sm:$0xff] }
 0x6f2   :  { %v5853_v62 = vcombine.high %v5754_v59, %v5762_v60  ;;  %v5852_v1 = vcombine.low %v5754_v59, %v5762_v60  ;;  %v5827_v59 = vcombine.high %v5725_v55, %v5733_v56  ;;  %v5740_v60 = vld [vmem:[%s8790_s5 + $0x510] sm:$0xff] }
 0x6f3   :  { %v7964_v5 = vsub.f32 %v2759_v61, %v2769_v4  ;;  %v2772_v6 = vmul.f32 %v7962_v3, %v7962_v3  ;;  %v5755_v61 = vld [vmem:[%s8790_s5 + $0x588] sm:$0xff] }
 0x6f4   :  { %v5854_v2 = vcombine.low %v5755_v61, %v5763_v63  ;;  %v5855_v4 = vcombine.high %v5755_v61, %v5763_v63  ;;  %3477 = vmatprep.subr.bf16.mxu0 %v5853_v62  ;;  %v5748_v61 = vld [vmem:[%s8790_s5 + $0x550] sm:$0xff]  ;;  %v5741_v62 = vld [vmem:[%s8790_s5 + $0x518] sm:$0xff] }
 0x6f5   :  { %v2774_v7 = vsel %vm115_vm1, %v2772_v6, 0.0  ;;  %v2773_v49 = vmul.f32 %v7964_v5, %v7964_v5  ;;  %3478 = vmatpush1.bf16.msra.mxu0 %v5852_v1  ;;  %v5676_v6 = vld [vmem:[%s8790_s5 + $0x310] sm:$0xff]  ;;  %v5749_v63 = vld [vmem:[%s8790_s5 + $0x558] sm:$0xff]  ;;  %v5824_v1 = vcombine.low %v5724_v53, %v5732_v54  ;;  %v5735_v53 = vld [vmem:[%s8790_s5 + $0x4e8] sm:$0xff] }
 0x6f6   :  { %2775 = vadd.xlane.f32.xlu0 %v2774_v7  ;;  %3520 = vmatprep.subr.bf16.mxu1 %v5855_v4  ;;  %v5684_v7 = vld [vmem:[%s8790_s5 + $0x350] sm:$0xff]  ;;  %v5841_v4 = vcombine.high %v5740_v60, %v5748_v61 }
 0x6f7   :  { %v2777_v8 = vsel %vm115_vm1, %v2773_v49, 0.0  ;;  %v5677_v49 = vld [vmem:[%s8790_s5 + $0x318] sm:$0xff]  ;;  %3521 = vmatpush1.bf16.msra.mxu1 %v5854_v2  ;;  %v5776_v10 = vcombine.low %v5676_v6, %v5684_v7  ;;  %v5826_v2 = vcombine.low %v5725_v55, %v5733_v56 }
 0x6f8   :  { %2778 = vadd.xlane.f32.xlu1 %v2777_v8  ;;  %v5777_v8 = vcombine.high %v5676_v6, %v5684_v7  ;;  %v5778_v11 = vcombine.low %v5677_v49, %v5685_v9  ;;  %v5779_v12 = vcombine.high %v5677_v49, %v5685_v9  ;;  %v5843_v6 = vcombine.high %v5741_v62, %v5749_v63  ;;  %v5756_v7 = vld [vmem:[%s8790_s5 + $0x590] sm:$0xff]  ;;  %v5765_v9 = vld [vmem:[%s8790_s5 + $0x5d8] sm:$0xff] }
 0x6f9   :  { %v5764_v49 = vld [vmem:[%s8790_s5 + $0x5d0] sm:$0xff] }
 0x6fa   :  { %3553 = vmatprep.subr.bf16.mxu0 %v5777_v8  ;;  %3596 = vmatprep.subr.bf16.mxu1 %v5779_v12  ;;  %v5757_v8 = vld [vmem:[%s8790_s5 + $0x598] sm:$0xff]  ;;  %v5857_v12 = vcombine.high %v5756_v7, %v5764_v49 }
 0x783   :  { %v2776_v13 = vpop.xlane.xlu0 %2775 }
 0x784   :  { %v2780_v14 = vmul.f32 0.010416667, %v2776_v13  ;;  %v5859_v13 = vcombine.high %v5757_v8, %v5765_v9 }
 0x785   :  { %v2779_v15 = vpop.xlane.xlu1 %2778 }
 0x786   :  { %v2782_v16 = vadd.f32 1e-05, %v2780_v14  ;;  %v2781_v17 = vmul.f32 0.010416667, %v2779_v15  ;;  %v5678_v14 = vld [vmem:[%s8790_s5 + $0x320] sm:$0xff] }
 0x787   :  { %v5686_v15 = vld [vmem:[%s8790_s5 + $0x360] sm:$0xff] }
 0x788   :  { %6983 = vrsqrt.f32 %v2782_v16  ;;  %v2783_v44 = vadd.f32 1e-05, %v2781_v17  ;;  %v5679_v16 = vld [vmem:[%s8790_s5 + $0x328] sm:$0xff] }
 0x789   :  { %v5687_v17 = vld [vmem:[%s8790_s5 + $0x368] sm:$0xff] }
 0x78a   :  { %6985 = vrsqrt.f32 %v2783_v44  ;;  %v5856_v44 = vcombine.low %v5756_v7, %v5764_v49  ;;  %v5782_v33 = vcombine.low %v5679_v16, %v5687_v17  ;;  %v5767_v7 = vld [vmem:[%s8790_s5 + $0x5e8] sm:$0xff] }
 0x792   :  { %v6984_v27 = vpop.eup %6983 }
 0x793   :  { %v2786_v19 = vmul.f32 %v6984_v27, %v7962_v3  ;;  %v5693_v3 = vld [vmem:[%s8790_s5 + $0x398] sm:$0xff]  ;;  %v5858_v27 = vcombine.low %v5757_v8, %v5765_v9 }
 0x794   :  { %v6986_v20 = vpop.eup %6985 }
 0x795   :  { %v2792_v28 = vmul.f32 %v5672_v18, %v2786_v19  ;;  %v2787_v29 = vmul.f32 %v6986_v20, %v7964_v5  ;;  %v5701_v5 = vld [vmem:[%s8790_s5 + $0x3d8] sm:$0xff]  ;;  %v5783_v19 = vcombine.high %v5679_v16, %v5687_v17  ;;  %v5694_v20 = vld [vmem:[%s8790_s5 + $0x3a0] sm:$0xff] }
 0x796   :  { %v5795_v43 = vcombine.high %v5693_v3, %v5701_v5  ;;  %v5794_v50 = vcombine.low %v5693_v3, %v5701_v5  ;;  %v5710_v5 = vld [vmem:[%s8790_s5 + $0x420] sm:$0xff] }
 0x797   :  { %v2793_v31 = vmul.f32 %v5672_v18, %v2787_v29  ;;  %v8076_v40 = vadd.f32 %v5673_v30, %v2792_v28  ;;  %v5781_v18 = vcombine.high %v5678_v14, %v5686_v15  ;;  %v5702_v28 = vld [vmem:[%s8790_s5 + $0x3e0] sm:$0xff]  ;;  %v5695_v29 = vld [vmem:[%s8790_s5 + $0x3a8] sm:$0xff] }
 0x798   :  { %v5797_v34 = vcombine.high %v5694_v20, %v5702_v28  ;;  %v5796_v46 = vcombine.low %v5694_v20, %v5702_v28  ;;  %v5705_v20 = vld [vmem:[%s8790_s5 + $0x3f8] sm:$0xff] }
 0x799   :  { %v8078_v41 = vadd.f32 %v5673_v30, %v2793_v31  ;;  %v5703_v30 = vld [vmem:[%s8790_s5 + $0x3e8] sm:$0xff]  ;;  %v5780_v31 = vcombine.low %v5678_v14, %v5686_v15  ;;  %v5689_v14 = vld [vmem:[%s8790_s5 + $0x378] sm:$0xff] }
 0x79a   :  { %v5799_v3 = vcombine.high %v5695_v29, %v5703_v30  ;;  %v5798_v47 = vcombine.low %v5695_v29, %v5703_v30 }
 0x79b   :  { %v8082_v23 = vpack.c.bf16 %v8078_v41, %v8076_v40 }
 0x79d   :  { %5868 = vmatmul.mubr.msk.bf16.vlgmr.msra.gmra.mrb[36].mxu0 %vm115_vm1, %v8082_v23  ;;  %5869 = vmatmul.mubr.msk.bf16.vlgmr.msra.gmra.mrb[36].mxu1 %vm115_vm1, %v8082_v23 }
 0x79e   :  { %3554 = vmatpush1.bf16.msra.mxu0 %v5776_v10  ;;  %3597 = vmatpush1.bf16.msra.mxu1 %v5778_v11  ;;  %v5840_v10 = vcombine.low %v5740_v60, %v5748_v61  ;;  %v5842_v11 = vcombine.low %v5741_v62, %v5749_v63  ;;  %v5751_v60 = vld [vmem:[%s8790_s5 + $0x568] sm:$0xff] }
 0x79f   :  { %3555 = vmatprep.subr.bf16.mxu0 %v5793_v42  ;;  %3598 = vmatprep.subr.bf16.mxu1 %v5795_v43  ;;  %v5718_v42 = vld [vmem:[%s8790_s5 + $0x460] sm:$0xff]  ;;  %v5711_v43 = vld [vmem:[%s8790_s5 + $0x428] sm:$0xff] }
 0x7a0   :  { %3585 = vmatprep.mubr.bf16.mxu0 %v7001_v25  ;;  %3628 = vmatprep.mubr.bf16.mxu1 %v7001_v25  ;;  %v5813_v48 = vcombine.high %v5710_v5, %v5718_v42  ;;  %v5812_v54 = vcombine.low %v5710_v5, %v5718_v42  ;;  %v5814_v55 = vcombine.low %v5711_v43, %v5719_v45  ;;  %v5721_v5 = vld [vmem:[%s8790_s5 + $0x478] sm:$0xff] }
 0x7a2   :  { %3556 = vmatpush1.bf16.msra.mxu0 %v5792_v37  ;;  %3599 = vmatpush1.bf16.msra.mxu1 %v5794_v50  ;;  %v5815_v37 = vcombine.high %v5711_v43, %v5719_v45  ;;  %v5726_v50 = vld [vmem:[%s8790_s5 + $0x4a0] sm:$0xff] }
 0x7a3   :  { %3557 = vmatprep.subr.bf16.mxu0 %v5809_v51  ;;  %3600 = vmatprep.subr.bf16.mxu1 %v5811_v52  ;;  %v5734_v51 = vld [vmem:[%s8790_s5 + $0x4e0] sm:$0xff]  ;;  %v5727_v52 = vld [vmem:[%s8790_s5 + $0x4a8] sm:$0xff] }
 0x7a4   :  { %v5829_v56 = vcombine.high %v5726_v50, %v5734_v51  ;;  %v5828_v61 = vcombine.low %v5726_v50, %v5734_v51  ;;  %v5830_v62 = vcombine.low %v5727_v52, %v5735_v53  ;;  %v5737_v50 = vld [vmem:[%s8790_s5 + $0x4f8] sm:$0xff] }
 0x7a6   :  { %3558 = vmatpush1.bf16.msra.mxu0 %v5808_v57  ;;  %3601 = vmatpush1.bf16.msra.mxu1 %v5810_v58  ;;  %v5831_v57 = vcombine.high %v5727_v52, %v5735_v53  ;;  %v5742_v58 = vld [vmem:[%s8790_s5 + $0x520] sm:$0xff] }
 0x7a7   :  { %3559 = vmatprep.subr.bf16.mxu0 %v5825_v32  ;;  %3602 = vmatprep.subr.bf16.mxu1 %v5827_v59  ;;  %v5750_v32 = vld [vmem:[%s8790_s5 + $0x560] sm:$0xff]  ;;  %v5743_v59 = vld [vmem:[%s8790_s5 + $0x528] sm:$0xff] }
 0x7a8   :  { %v5845_v63 = vcombine.high %v5742_v58, %v5750_v32  ;;  %v5844_v49 = vcombine.low %v5742_v58, %v5750_v32  ;;  %v5846_v8 = vcombine.low %v5743_v59, %v5751_v60 }
 0x7aa   :  { %3560 = vmatpush1.bf16.msra.mxu0 %v5824_v1  ;;  %3603 = vmatpush1.bf16.msra.mxu1 %v5826_v2  ;;  %v5847_v1 = vcombine.high %v5743_v59, %v5751_v60  ;;  %v5758_v2 = vld [vmem:[%s8790_s5 + $0x5a0] sm:$0xff] }
 0x7ab   :  { %3561 = vmatprep.subr.bf16.mxu0 %v5841_v4  ;;  %3604 = vmatprep.subr.bf16.mxu1 %v5843_v6  ;;  %v5766_v4 = vld [vmem:[%s8790_s5 + $0x5e0] sm:$0xff]  ;;  %v5759_v6 = vld [vmem:[%s8790_s5 + $0x5a8] sm:$0xff] }
 0x7ac   :  { %v5861_v9 = vcombine.high %v5758_v2, %v5766_v4  ;;  %v5860_v15 = vcombine.low %v5758_v2, %v5766_v4  ;;  %v5862_v16 = vcombine.low %v5759_v6, %v5767_v7 }
 0x7ae   :  { %3562 = vmatpush1.bf16.msra.mxu0 %v5840_v10  ;;  %3605 = vmatpush1.bf16.msra.mxu1 %v5842_v11  ;;  %v5863_v10 = vcombine.high %v5759_v6, %v5767_v7  ;;  %v5680_v11 = vld [vmem:[%s8790_s5 + $0x330] sm:$0xff] }
 0x7af   :  { %3563 = vmatprep.subr.bf16.mxu0 %v5857_v12  ;;  %3606 = vmatprep.subr.bf16.mxu1 %v5859_v13  ;;  %v5688_v12 = vld [vmem:[%s8790_s5 + $0x370] sm:$0xff]  ;;  %v5681_v13 = vld [vmem:[%s8790_s5 + $0x338] sm:$0xff] }
 0x7b0   :  { %v5785_v17 = vcombine.high %v5680_v11, %v5688_v12  ;;  %v5784_v28 = vcombine.low %v5680_v11, %v5688_v12  ;;  %v5786_v29 = vcombine.low %v5681_v13, %v5689_v14  ;;  %v6842_v11 = vld [vmem:[%s8791_s7 + $0x400] sm:$0xff]  }
 0x7b1   :  { %v6843_v12 = vld [vmem:[%s8791_s7 + $0x480] sm:$0xff]  }
 0x7b2   :  { %3564 = vmatpush1.bf16.msra.mxu0 %v5856_v44  ;;  %3607 = vmatpush1.bf16.msra.mxu1 %v5858_v27  ;;  %v5787_v44 = vcombine.high %v5681_v13, %v5689_v14  ;;  %v5696_v27 = vld [vmem:[%s8790_s5 + $0x3b0] sm:$0xff]  ;;  %v6844_v13 = vld [vmem:[%s8791_s7 + $0x448] sm:$0xff]  }
 0x7b3   :  { %3639 = vmatprep.subr.bf16.mxu0 %v5781_v18  ;;  %3682 = vmatprep.subr.bf16.mxu1 %v5783_v19  ;;  %v5704_v18 = vld [vmem:[%s8790_s5 + $0x3f0] sm:$0xff]  ;;  %v5697_v19 = vld [vmem:[%s8790_s5 + $0x3b8] sm:$0xff]  ;;  %v6845_v14 = vld [vmem:[%s8791_s7 + $0x4c8] sm:$0xff]  }
 0x7b4   :  { %v5801_v30 = vcombine.high %v5696_v27, %v5704_v18  ;;  %v5800_v42 = vcombine.low %v5696_v27, %v5704_v18  ;;  %v5802_v43 = vcombine.low %v5697_v19, %v5705_v20  ;;  %v6851_v27 = vld [vmem:[%s8791_s7 + $0x490] sm:$0xff]   ;;  %v6852_v18 = vld [vmem:[%s8791_s7 + $0x458] sm:$0xff]  }
 0x7b5   :  { %5870 = vmatmul.mubr.msk.bf16.vlgmr.msra.gmra.mrb[40].mxu0 %vm115_vm1, %v8082_v23  ;;  %5871 = vmatmul.mubr.msk.bf16.vlgmr.msra.gmra.mrb[40].mxu1 %vm115_vm1, %v8082_v23 }
 0x7b6   :  { %3640 = vmatpush1.bf16.msra.mxu0 %v5780_v31  ;;  %3683 = vmatpush1.bf16.msra.mxu1 %v5782_v33  ;;  %v5803_v31 = vcombine.high %v5697_v19, %v5705_v20  ;;  %v5712_v33 = vld [vmem:[%s8790_s5 + $0x430] sm:$0xff]  ;;  %v6853_v19 = vld [vmem:[%s8791_s7 + $0x4d8] sm:$0xff]  }
 0x7b7   :  { %3641 = vmatprep.subr.bf16.mxu0 %v5797_v34  ;;  %3684 = vmatprep.subr.bf16.mxu1 %v5799_v3  ;;  %v5720_v34 = vld [vmem:[%s8790_s5 + $0x470] sm:$0xff]  ;;  %v5713_v3 = vld [vmem:[%s8790_s5 + $0x438] sm:$0xff] }
 0x7b8   :  { %3671 = vmatprep.mubr.bf16.mxu0 %v7001_v25  ;;  %3714 = vmatprep.mubr.bf16.mxu1 %v7001_v25  ;;  %v5817_v45 = vcombine.high %v5712_v33, %v5720_v34  ;;  %v5816_v51 = vcombine.low %v5712_v33, %v5720_v34  ;;  %v5818_v52 = vcombine.low %v5713_v3, %v5721_v5  ;;  %v6854_v20 = vld [vmem:[%s8791_s7 + $0x418] sm:$0xff]   ;;  %v6859_v33 = vld [vmem:[%s8791_s7 + $0x4a0] sm:$0xff]   ;;  %v6860_v34 = vld [vmem:[%s8791_s7 + $0x468] sm:$0xff]  }
 0x7ba   :  { %3642 = vmatpush1.bf16.msra.mxu0 %v5796_v46  ;;  %3685 = vmatpush1.bf16.msra.mxu1 %v5798_v47  ;;  %v5819_v46 = vcombine.high %v5713_v3, %v5721_v5  ;;  %v5728_v47 = vld [vmem:[%s8790_s5 + $0x4b0] sm:$0xff]  ;;  %v6861_v3 = vld [vmem:[%s8791_s7 + $0x4e8] sm:$0xff]  }
 0x7bb   :  { %3643 = vmatprep.subr.bf16.mxu0 %v5813_v48  ;;  %3686 = vmatprep.subr.bf16.mxu1 %v5815_v37  ;;  %v5736_v48 = vld [vmem:[%s8790_s5 + $0x4f0] sm:$0xff]  ;;  %v5729_v37 = vld [vmem:[%s8790_s5 + $0x4b8] sm:$0xff]  ;;  %v6862_v5 = vld [vmem:[%s8791_s7 + $0x428] sm:$0xff]  }
 0x7bc   :  { %v5833_v53 = vcombine.high %v5728_v47, %v5736_v48  ;;  %v5832_v58 = vcombine.low %v5728_v47, %v5736_v48  ;;  %v5834_v32 = vcombine.low %v5729_v37, %v5737_v50  ;;  %v6867_v47 = vld [vmem:[%s8791_s7 + $0x4b0] sm:$0xff]   ;;  %v6868_v48 = vld [vmem:[%s8791_s7 + $0x478] sm:$0xff]  }
 0x7be   :  { %3644 = vmatpush1.bf16.msra.mxu0 %v5812_v54  ;;  %3687 = vmatpush1.bf16.msra.mxu1 %v5814_v55  ;;  %v5835_v54 = vcombine.high %v5729_v37, %v5737_v50  ;;  %v5744_v55 = vld [vmem:[%s8790_s5 + $0x530] sm:$0xff]  ;;  %v6869_v37 = vld [vmem:[%s8791_s7 + $0x4f8] sm:$0xff]  }
 0x7bf   :  { %3645 = vmatprep.subr.bf16.mxu0 %v5829_v56  ;;  %3688 = vmatprep.subr.bf16.mxu1 %v5831_v57  ;;  %v5752_v56 = vld [vmem:[%s8790_s5 + $0x570] sm:$0xff]  ;;  %v5753_v57 = vld [vmem:[%s8790_s5 + $0x578] sm:$0xff] }
 0x7c0   :  { %v5849_v59 = vcombine.high %v5744_v55, %v5752_v56  ;;  %v5848_v2 = vcombine.low %v5744_v55, %v5752_v56  ;;  %v6870_v50 = vld [vmem:[%s8791_s7 + $0x438] sm:$0xff]  }
 0x7c2   :  { %3646 = vmatpush1.bf16.msra.mxu0 %v5828_v61  ;;  %3689 = vmatpush1.bf16.msra.mxu1 %v5830_v62  ;;  %v5760_v61 = vld [vmem:[%s8790_s5 + $0x5b0] sm:$0xff] }
 0x7c3   :  { %3647 = vmatprep.subr.bf16.mxu0 %v5845_v63  ;;  %3690 = vmatprep.subr.bf16.mxu1 %v5847_v1  ;;  %v5768_v62 = vld [vmem:[%s8790_s5 + $0x5f0] sm:$0xff]  ;;  %v5761_v63 = vld [vmem:[%s8790_s5 + $0x5b8] sm:$0xff] }
 0x7c4   :  { %v5769_v1 = vld [vmem:[%s8790_s5 + $0x5f8] sm:$0xff]  ;;  %v5865_v6 = vcombine.high %v5760_v61, %v5768_v62 }
 0x7c5   :  { %v5867_v7 = vcombine.high %v5761_v63, %v5769_v1 }
 0x7c6   :  { %3648 = vmatpush1.bf16.msra.mxu0 %v5844_v49  ;;  %3691 = vmatpush1.bf16.msra.mxu1 %v5846_v8  ;;  %v5864_v49 = vcombine.low %v5760_v61, %v5768_v62  ;;  %v5866_v8 = vcombine.low %v5761_v63, %v5769_v1 }
 0x7c7   :  { %3649 = vmatprep.subr.bf16.mxu0 %v5861_v9  ;;  %3692 = vmatprep.subr.bf16.mxu1 %v5863_v10  ;;  %v6840_v9 = vld [vmem:[%s8791_s7 + $0x440] sm:$0xff]  }
 0x7c8   :  { %v6841_v10 = vld [vmem:[%s8791_s7 + $0x4c0] sm:$0xff]  }
 0x7ca   :  { %3650 = vmatpush1.bf16.msra.mxu0 %v5860_v15  ;;  %3693 = vmatpush1.bf16.msra.mxu1 %v5862_v16  ;;  %v6846_v15 = vld [vmem:[%s8791_s7 + $0x408] sm:$0xff]  }
 0x7cb   :  { %3725 = vmatprep.subr.bf16.mxu0 %v5785_v17  ;;  %3768 = vmatprep.subr.bf16.mxu1 %v5787_v44  ;;  %v6847_v16 = vld [vmem:[%s8791_s7 + $0x488] sm:$0xff]   ;;  %v6848_v17 = vld [vmem:[%s8791_s7 + $0x450] sm:$0xff]  }
 0x7cc   :  { %v6850_v44 = vld [vmem:[%s8791_s7 + $0x410] sm:$0xff]  }
 0x7cd   :  { %5872 = vmatmul.mubr.msk.bf16.vlgmr.msra.gmra.mrb[44].mxu0 %vm115_vm1, %v8082_v23  ;;  %5873 = vmatmul.mubr.msk.bf16.vlgmr.msra.gmra.mrb[44].mxu1 %vm115_vm1, %v8082_v23 }
 0x7ce   :  { %3726 = vmatpush1.bf16.msra.mxu0 %v5784_v28  ;;  %3769 = vmatpush1.bf16.msra.mxu1 %v5786_v29  ;;  %v6855_v28 = vld [vmem:[%s8791_s7 + $0x498] sm:$0xff]   ;;  %v6856_v29 = vld [vmem:[%s8791_s7 + $0x460] sm:$0xff]  }
 0x7cf   :  { %3727 = vmatprep.subr.bf16.mxu0 %v5801_v30  ;;  %3770 = vmatprep.subr.bf16.mxu1 %v5803_v31  ;;  %v6857_v30 = vld [vmem:[%s8791_s7 + $0x4e0] sm:$0xff]  }
 0x7d0   :  { %3757 = vmatprep.mubr.bf16.mxu0 %v7001_v25  ;;  %3800 = vmatprep.mubr.bf16.mxu1 %v7001_v25  ;;  %v5745_v25 = vld [vmem:[%s8790_s5 + $0x538] sm:$0xff]  ;;  %v6858_v31 = vld [vmem:[%s8791_s7 + $0x420] sm:$0xff]  }
 0x7d1   :  { %v5851_v60 = vcombine.high %v5745_v25, %v5753_v57  ;;  %v5850_v4 = vcombine.low %v5745_v25, %v5753_v57 }
 0x7d2   :  { %3728 = vmatpush1.bf16.msra.mxu0 %v5800_v42  ;;  %3771 = vmatpush1.bf16.msra.mxu1 %v5802_v43  ;;  %v6863_v42 = vld [vmem:[%s8791_s7 + $0x4a8] sm:$0xff]   ;;  %v6864_v43 = vld [vmem:[%s8791_s7 + $0x470] sm:$0xff]  }
 0x7d3   :  { %3729 = vmatprep.subr.bf16.mxu0 %v5817_v45  ;;  %3772 = vmatprep.subr.bf16.mxu1 %v5819_v46  ;;  %v6865_v45 = vld [vmem:[%s8791_s7 + $0x4f0] sm:$0xff]  }
 0x7d4   :  { %v6866_v46 = vld [vmem:[%s8791_s7 + $0x430] sm:$0xff]  }
 0x7d6   :  { %3730 = vmatpush1.bf16.msra.mxu0 %v5816_v51  ;;  %3773 = vmatpush1.bf16.msra.mxu1 %v5818_v52  ;;  %v6871_v51 = vld [vmem:[%s8791_s7 + $0x4b8] sm:$0xff]   ;;  %v6872_v52 = vld [vmem:[%s8791_s7 + $0x540] sm:$0xff]  }
 0x7d7   :  { %3731 = vmatprep.subr.bf16.mxu0 %v5833_v53  ;;  %3774 = vmatprep.subr.bf16.mxu1 %v5835_v54  ;;  %v6873_v53 = vld [vmem:[%s8791_s7 + $0x5c0] sm:$0xff]  }
 0x7d8   :  { %v8403_v54 = vld [vmem:[%s8794_s6 + $0x1] ss:$2 sm:$0xff] }
 0x7d9   :  { %v2907_v55 = vrot.slane %v8403_v54, %v7560_v35  ;;  %v2915_v56 = vrot.slane %v8403_v54, %v7563_v36  ;;  %v2911_v25 = vrot.slane %v8403_v54, %v7571_v38  ;;  %v2919_v57 = vrot.slane %v8403_v54, %v7574_v39 }
 0x7da   :  { %3732 = vmatpush1.bf16.msra.mxu0 %v5832_v58  ;;  %3775 = vmatpush1.bf16.msra.mxu1 %v5834_v32 }
 0x7db   :  { %3733 = vmatprep.subr.bf16.mxu0 %v5849_v59  ;;  %3776 = vmatprep.subr.bf16.mxu1 %v5851_v60 }
 0x7de   :  { %3734 = vmatpush1.bf16.msra.mxu0 %v5848_v2  ;;  %3777 = vmatpush1.bf16.msra.mxu1 %v5850_v4 }
 0x7df   :  { %3735 = vmatprep.subr.bf16.mxu0 %v5865_v6  ;;  %3778 = vmatprep.subr.bf16.mxu1 %v5867_v7 }
 0x7e2   :  { %3736 = vmatpush1.bf16.msra.mxu0 %v5864_v49  ;;  %3779 = vmatpush1.bf16.msra.mxu1 %v5866_v8 }
 0x7e3   :  { %6465 = vmatprep.subr.bf16.mxu0 %v6840_v9  ;;  %6487 = vmatprep.subr.bf16.mxu1 %v6841_v10 }
 0x7e5   :  { %5874 = vmatmul.mubr.msk.bf16.vlgmr.msra.gmra.mrb[48].mxu0 %vm115_vm1, %v8082_v23  ;;  %5875 = vmatmul.mubr.msk.bf16.vlgmr.msra.gmra.mrb[48].mxu1 %vm115_vm1, %v8082_v23  ;;  %v6849_v23 = vld [vmem:[%s8791_s7 + $0x4d0] sm:$0xff]  }
 0x7e6   :  { %6466 = vmatpush3.bf16.msra.mxu0 %v6842_v11  ;;  %6488 = vmatpush3.bf16.msra.mxu1 %v6843_v12 }
 0x7e7   :  { %6467 = vmatprep.subr.bf16.mxu0 %v6844_v13  ;;  %6489 = vmatprep.subr.bf16.mxu1 %v6845_v14 }
 0x7ea   :  { %6468 = vmatpush3.bf16.msra.mxu0 %v6846_v15  ;;  %6490 = vmatpush3.bf16.msra.mxu1 %v6847_v16 }
 0x7eb   :  { %6469 = vmatprep.subr.bf16.mxu0 %v6848_v17  ;;  %6491 = vmatprep.subr.bf16.mxu1 %v6849_v23 }
 0x7ee   :  { %6470 = vmatpush3.bf16.msra.mxu0 %v6850_v44  ;;  %6492 = vmatpush3.bf16.msra.mxu1 %v6851_v27 }
 0x7ef   :  { %6471 = vmatprep.subr.bf16.mxu0 %v6852_v18  ;;  %6493 = vmatprep.subr.bf16.mxu1 %v6853_v19 }
 0x7f2   :  { %6472 = vmatpush3.bf16.msra.mxu0 %v6854_v20  ;;  %6494 = vmatpush3.bf16.msra.mxu1 %v6855_v28  ;;  %v6874_v20 = vld [vmem:[%s8791_s7 + $0x500] sm:$0xff]  }
 0x7f3   :  { %6473 = vmatprep.subr.bf16.mxu0 %v6856_v29  ;;  %6495 = vmatprep.subr.bf16.mxu1 %v6857_v30  ;;  %v6875_v28 = vld [vmem:[%s8791_s7 + $0x580] sm:$0xff]   ;;  %v6876_v29 = vld [vmem:[%s8791_s7 + $0x548] sm:$0xff]  }
 0x7f4   :  { %v6877_v30 = vld [vmem:[%s8791_s7 + $0x5c8] sm:$0xff]  }
 0x7f6   :  { %6474 = vmatpush3.bf16.msra.mxu0 %v6858_v31  ;;  %6496 = vmatpush3.bf16.msra.mxu1 %v6859_v33  ;;  %v6878_v31 = vld [vmem:[%s8791_s7 + $0x508] sm:$0xff]  }
 0x7f7   :  { %6475 = vmatprep.subr.bf16.mxu0 %v6860_v34  ;;  %6497 = vmatprep.subr.bf16.mxu1 %v6861_v3  ;;  %v6879_v33 = vld [vmem:[%s8791_s7 + $0x588] sm:$0xff]   ;;  %v6880_v34 = vld [vmem:[%s8791_s7 + $0x550] sm:$0xff]  }
 0x7f8   :  { %v6881_v3 = vld [vmem:[%s8791_s7 + $0x5d0] sm:$0xff]  }
 0x7fa   :  { %6476 = vmatpush3.bf16.msra.mxu0 %v6862_v5  ;;  %6498 = vmatpush3.bf16.msra.mxu1 %v6863_v42  ;;  %v6882_v5 = vld [vmem:[%s8791_s7 + $0x510] sm:$0xff]  }
 0x7fb   :  { %6477 = vmatprep.subr.bf16.mxu0 %v6864_v43  ;;  %6499 = vmatprep.subr.bf16.mxu1 %v6865_v45  ;;  %v6883_v42 = vld [vmem:[%s8791_s7 + $0x590] sm:$0xff]   ;;  %v6884_v43 = vld [vmem:[%s8791_s7 + $0x558] sm:$0xff]  }
 0x7fc   :  { %v6885_v45 = vld [vmem:[%s8791_s7 + $0x5d8] sm:$0xff]  }
 0x7fe   :  { %6478 = vmatpush3.bf16.msra.mxu0 %v6866_v46  ;;  %6500 = vmatpush3.bf16.msra.mxu1 %v6867_v47  ;;  %v6886_v46 = vld [vmem:[%s8791_s7 + $0x518] sm:$0xff]  }
 0x7ff   :  { %6479 = vmatprep.subr.bf16.mxu0 %v6868_v48  ;;  %6501 = vmatprep.subr.bf16.mxu1 %v6869_v37  ;;  %v6887_v47 = vld [vmem:[%s8791_s7 + $0x598] sm:$0xff]   ;;  %v2923_v48 = vrot.slane %v8403_v54, %v7621_v21  ;;  %v2931_v37 = vrot.slane %v8403_v54, %v7624_v22 }
 0x802   :  { %6480 = vmatpush3.bf16.msra.mxu0 %v6870_v50  ;;  %6502 = vmatpush3.bf16.msra.mxu1 %v6871_v51  ;;  %v6888_v50 = vld [vmem:[%s8791_s7 + $0x560] sm:$0xff]  }
 0x803   :  { %6509 = vmatprep.subr.bf16.mxu0 %v6872_v52  ;;  %6531 = vmatprep.subr.bf16.mxu1 %v6873_v53  ;;  %v6889_v51 = vld [vmem:[%s8791_s7 + $0x5e0] sm:$0xff]   ;;  %v2927_v52 = vrot.slane %v8403_v54, %v7627_v24  ;;  %v2935_v53 = vrot.slane %v8403_v54, %v7630_v26  ;;  %v6892_v54 = vld [vmem:[%s8791_s7 + $0x568] sm:$0xff]  }
 0x870   :  { %v3501_v58 = vpop.f32.mrb[36].mxu0  ;;  %v3544_v32 = vpop.f32.mrb[36].mxu1 }
 0x871   :  { %v3502_v59 = vadd.f32 %v3501_v58, %v2907_v55  ;;  %v3545_v60 = vadd.f32 %v3544_v32, %v2915_v56  ;;  %v3503_v61 = vpop.f32.mrb[37].mxu0  ;;  %v3546_v62 = vpop.f32.mrb[37].mxu1 }
 0x872   :  { %v3504_v63 = vadd.f32 %v3503_v61, %v2911_v25  ;;  %v3547_v1 = vadd.f32 %v3546_v62, %v2919_v57  ;;  %v3505_v2 = vpop.f32.mrb[38].mxu0  ;;  %v3548_v4 = vpop.f32.mrb[38].mxu1  ;;  %v6893_v61 = vld [vmem:[%s8791_s7 + $0x5e8] sm:$0xff]  }
 0x873   :  { %v3506_v6 = vadd.f32 %v3505_v2, %v2907_v55  ;;  %v3549_v7 = vadd.f32 %v3548_v4, %v2915_v56  ;;  %v3507_v49 = vpop.f32.mrb[39].mxu0  ;;  %v3550_v8 = vpop.f32.mrb[39].mxu1  ;;  %v3811_v11 = vmax.f32 %v3502_v59, 0.0  ;;  %v3813_v12 = vmax.f32 %v3545_v60, 0.0 }
 0x874   :  { %v3508_v9 = vadd.f32 %v3507_v49, %v2911_v25  ;;  %v3551_v10 = vadd.f32 %v3550_v8, %v2919_v57  ;;  %v3812_v15 = vmax.f32 %v3504_v63, 0.0  ;;  %v3814_v16 = vmax.f32 %v3547_v1, 0.0  ;;  %v6890_v25 = vld [vmem:[%s8791_s7 + $0x520] sm:$0xff]  }
 0x875   :  { %v3827_v13 = vmax.f32 %v3506_v6, 0.0  ;;  %v3829_v14 = vmax.f32 %v3549_v7, 0.0  ;;  %v6891_v57 = vld [vmem:[%s8791_s7 + $0x5a0] sm:$0xff]  }
 0x876   :  { %v3828_v17 = vmax.f32 %v3508_v9, 0.0  ;;  %v3830_v23 = vmax.f32 %v3551_v10, 0.0  ;;  %v6894_v10 = vld [vmem:[%s8791_s7 + $0x528] sm:$0xff]  }
 0x877   :  { %v3843_v44 = vpack.c.bf16 %v3827_v13, %v3811_v11  ;;  %v3845_v27 = vpack.c.bf16 %v3829_v14, %v3813_v12  ;;  %v6895_v11 = vld [vmem:[%s8791_s7 + $0x5a8] sm:$0xff]  }
 0x878   :  { %v3844_v18 = vpack.c.bf16 %v3828_v17, %v3812_v15  ;;  %v3846_v19 = vpack.c.bf16 %v3830_v23, %v3814_v16  ;;  %v6896_v16 = vld [vmem:[%s8791_s7 + $0x570] sm:$0xff]  }
 0x879   :  { %v6897_v17 = vld [vmem:[%s8791_s7 + $0x5f0] sm:$0xff]  }
 0x87a   :  { %4921 = vmatprep.mubr.bf16.mxu0 %v3844_v18  ;;  %4962 = vmatprep.mubr.bf16.mxu1 %v3846_v19 }
 0x87b   :  { %4922 = vmatmul.mubr.bf16.vlgmr.msra.gmra.mrb[52].mxu0 %v3843_v44  ;;  %4963 = vmatmul.mubr.bf16.vlgmr.msra.gmra.mrb[52].mxu1 %v3845_v27 }
 0x87c   :  { %6510 = vmatpush3.bf16.msra.mxu0 %v6874_v20  ;;  %6532 = vmatpush3.bf16.msra.mxu1 %v6875_v28 }
 0x87d   :  { %6511 = vmatprep.subr.bf16.mxu0 %v6876_v29  ;;  %6533 = vmatprep.subr.bf16.mxu1 %v6877_v30  ;;  %v6898_v30 = vld [vmem:[%s8791_s7 + $0x530] sm:$0xff]  }
 0x880   :  { %6512 = vmatpush3.bf16.msra.mxu0 %v6878_v31  ;;  %6534 = vmatpush3.bf16.msra.mxu1 %v6879_v33  ;;  %v6899_v31 = vld [vmem:[%s8791_s7 + $0x5b0] sm:$0xff]   ;;  %v6900_v33 = vld [vmem:[%s8791_s7 + $0x578] sm:$0xff]  }
 0x881   :  { %6513 = vmatprep.subr.bf16.mxu0 %v6880_v34  ;;  %6535 = vmatprep.subr.bf16.mxu1 %v6881_v3  ;;  %v6901_v34 = vld [vmem:[%s8791_s7 + $0x5f8] sm:$0xff]  }
 0x882   :  { %v6902_v3 = vld [vmem:[%s8791_s7 + $0x538] sm:$0xff]  }
 0x884   :  { %6514 = vmatpush3.bf16.msra.mxu0 %v6882_v5  ;;  %6536 = vmatpush3.bf16.msra.mxu1 %v6883_v42  ;;  %v6903_v5 = vld [vmem:[%s8791_s7 + $0x5b8] sm:$0xff]   ;;  %v6904_v42 = vld [vmem:[%s8791_s7 + $0x640] sm:$0xff]  }
 0x885   :  { %6515 = vmatprep.subr.bf16.mxu0 %v6884_v43  ;;  %6537 = vmatprep.subr.bf16.mxu1 %v6885_v45  ;;  %v6905_v43 = vld [vmem:[%s8791_s7 + $0x6c0] sm:$0xff]  }
 0x886   :  { %v6906_v45 = vld [vmem:[%s8791_s7 + $0x600] sm:$0xff]  }
 0x888   :  { %v3587_v55 = vpop.f32.mrb[40].mxu0  ;;  %v3630_v56 = vpop.f32.mrb[40].mxu1  ;;  %6516 = vmatpush3.bf16.msra.mxu0 %v6886_v46  ;;  %6538 = vmatpush3.bf16.msra.mxu1 %v6887_v47  ;;  %v6907_v46 = vld [vmem:[%s8791_s7 + $0x680] sm:$0xff]   ;;  %v6908_v47 = vld [vmem:[%s8791_s7 + $0x648] sm:$0xff]  }
 0x889   :  { %v3588_v58 = vadd.f32 %v3587_v55, %v2923_v48  ;;  %v3631_v32 = vadd.f32 %v3630_v56, %v2931_v37  ;;  %v3589_v59 = vpop.f32.mrb[41].mxu0  ;;  %v3632_v60 = vpop.f32.mrb[41].mxu1  ;;  %6517 = vmatprep.subr.bf16.mxu0 %v6888_v50  ;;  %6539 = vmatprep.subr.bf16.mxu1 %v6889_v51  ;;  %v6910_v50 = vld [vmem:[%s8791_s7 + $0x608] sm:$0xff]   ;;  %v6912_v55 = vld [vmem:[%s8791_s7 + $0x650] sm:$0xff]  }
 0x88a   :  { %v3590_v62 = vadd.f32 %v3589_v59, %v2927_v52  ;;  %v3633_v63 = vadd.f32 %v3632_v60, %v2935_v53  ;;  %v3591_v1 = vpop.f32.mrb[42].mxu0  ;;  %v3634_v2 = vpop.f32.mrb[42].mxu1  ;;  %v6911_v51 = vld [vmem:[%s8791_s7 + $0x688] sm:$0xff]   ;;  %v6913_v56 = vld [vmem:[%s8791_s7 + $0x6d0] sm:$0xff]  }
 0x88b   :  { %v3592_v4 = vadd.f32 %v3591_v1, %v2923_v48  ;;  %v3635_v6 = vadd.f32 %v3634_v2, %v2931_v37  ;;  %v3593_v7 = vpop.f32.mrb[43].mxu0  ;;  %v3636_v49 = vpop.f32.mrb[43].mxu1  ;;  %v3815_v12 = vmax.f32 %v3588_v58, 0.0  ;;  %v3817_v13 = vmax.f32 %v3631_v32, 0.0  ;;  %v6909_v48 = vld [vmem:[%s8791_s7 + $0x6c8] sm:$0xff]  }
 0x88c   :  { %v3594_v8 = vadd.f32 %v3593_v7, %v2927_v52  ;;  %v3637_v9 = vadd.f32 %v3636_v49, %v2935_v53  ;;  %6518 = vmatpush3.bf16.msra.mxu0 %v6890_v25  ;;  %6540 = vmatpush3.bf16.msra.mxu1 %v6891_v57  ;;  %v3816_v23 = vmax.f32 %v3590_v62, 0.0  ;;  %v3818_v44 = vmax.f32 %v3633_v63, 0.0  ;;  %v8532_v37 = vld [vmem:[%s8794_s6 + $0x11] ss:$2 sm:$0xff] }
 0x88d   :  { %v3831_v14 = vmax.f32 %v3592_v4, 0.0  ;;  %v3833_v15 = vmax.f32 %v3635_v6, 0.0  ;;  %6519 = vmatprep.subr.bf16.mxu0 %v6892_v54  ;;  %6541 = vmatprep.subr.bf16.mxu1 %v6893_v61  ;;  %v2939_v52 = vrot.slane %v8532_v37, %v7560_v35  ;;  %v2947_v53 = vrot.slane %v8532_v37, %v7563_v36  ;;  %v6914_v35 = vld [vmem:[%s8791_s7 + $0x610] sm:$0xff]  }
 0x88e   :  { %v3832_v27 = vmax.f32 %v3594_v8, 0.0  ;;  %v3834_v18 = vmax.f32 %v3637_v9, 0.0  ;;  %v2943_v25 = vrot.slane %v8532_v37, %v7571_v38  ;;  %v2951_v57 = vrot.slane %v8532_v37, %v7574_v39  ;;  %v6915_v36 = vld [vmem:[%s8791_s7 + $0x690] sm:$0xff]   ;;  %v6916_v38 = vld [vmem:[%s8791_s7 + $0x658] sm:$0xff]  }
 0x88f   :  { %v3847_v19 = vpack.c.bf16 %v3831_v14, %v3815_v12  ;;  %v3849_v20 = vpack.c.bf16 %v3833_v15, %v3817_v13  ;;  %v6917_v39 = vld [vmem:[%s8791_s7 + $0x6d8] sm:$0xff]  }
 0x890   :  { %v3848_v28 = vpack.c.bf16 %v3832_v27, %v3816_v23  ;;  %v3850_v29 = vpack.c.bf16 %v3834_v18, %v3818_v44  ;;  %6520 = vmatpush3.bf16.msra.mxu0 %v6894_v10  ;;  %6542 = vmatpush3.bf16.msra.mxu1 %v6895_v11  ;;  %v6918_v10 = vld [vmem:[%s8791_s7 + $0x618] sm:$0xff]  }
 0x891   :  { %6521 = vmatprep.subr.bf16.mxu0 %v6896_v16  ;;  %6543 = vmatprep.subr.bf16.mxu1 %v6897_v17  ;;  %v6919_v11 = vld [vmem:[%s8791_s7 + $0x698] sm:$0xff]   ;;  %v6920_v16 = vld [vmem:[%s8791_s7 + $0x660] sm:$0xff]  }
 0x892   :  { %5003 = vmatprep.mubr.bf16.mxu0 %v3848_v28  ;;  %5044 = vmatprep.mubr.bf16.mxu1 %v3850_v29  ;;  %v6921_v17 = vld [vmem:[%s8791_s7 + $0x6e0] sm:$0xff]  }
 0x894   :  { %6522 = vmatpush3.bf16.msra.mxu0 %v6898_v30  ;;  %6544 = vmatpush3.bf16.msra.mxu1 %v6899_v31  ;;  %v6922_v30 = vld [vmem:[%s8791_s7 + $0x620] sm:$0xff]  }
 0x895   :  { %6523 = vmatprep.subr.bf16.mxu0 %v6900_v33  ;;  %6545 = vmatprep.subr.bf16.mxu1 %v6901_v34  ;;  %v6923_v31 = vld [vmem:[%s8791_s7 + $0x6a0] sm:$0xff]   ;;  %v6924_v33 = vld [vmem:[%s8791_s7 + $0x668] sm:$0xff]  }
 0x896   :  { %v6925_v34 = vld [vmem:[%s8791_s7 + $0x6e8] sm:$0xff]  }
 0x898   :  { %6524 = vmatpush3.bf16.msra.mxu0 %v6902_v3  ;;  %6546 = vmatpush3.bf16.msra.mxu1 %v6903_v5  ;;  %v6926_v3 = vld [vmem:[%s8791_s7 + $0x628] sm:$0xff]  }
 0x899   :  { %6553 = vmatprep.subr.bf16.mxu0 %v6904_v42  ;;  %6575 = vmatprep.subr.bf16.mxu1 %v6905_v43  ;;  %v6927_v5 = vld [vmem:[%s8791_s7 + $0x6a8] sm:$0xff]   ;;  %v6928_v42 = vld [vmem:[%s8791_s7 + $0x670] sm:$0xff]  }
 0x89a   :  { %v6929_v43 = vld [vmem:[%s8791_s7 + $0x6f0] sm:$0xff]  }
 0x89b   :  { %5004 = vmatmul.mubr.bf16.vlgmr.msra.gmra.mrb[56].mxu0 %v3847_v19  ;;  %5045 = vmatmul.mubr.bf16.vlgmr.msra.gmra.mrb[56].mxu1 %v3849_v20 }
 0x89c   :  { %6554 = vmatpush3.bf16.msra.mxu0 %v6906_v45  ;;  %6576 = vmatpush3.bf16.msra.mxu1 %v6907_v46  ;;  %v6930_v45 = vld [vmem:[%s8791_s7 + $0x630] sm:$0xff]  }
 0x89d   :  { %6555 = vmatprep.subr.bf16.mxu0 %v6908_v47  ;;  %6577 = vmatprep.subr.bf16.mxu1 %v6909_v48  ;;  %v6931_v46 = vld [vmem:[%s8791_s7 + $0x6b0] sm:$0xff]   ;;  %v6932_v47 = vld [vmem:[%s8791_s7 + $0x678] sm:$0xff]  }
 0x89e   :  { %v6933_v48 = vld [vmem:[%s8791_s7 + $0x6f8] sm:$0xff]  }
 0x8a0   :  { %v3673_v58 = vpop.f32.mrb[44].mxu0  ;;  %v3716_v32 = vpop.f32.mrb[44].mxu1  ;;  %6556 = vmatpush3.bf16.msra.mxu0 %v6910_v50  ;;  %6578 = vmatpush3.bf16.msra.mxu1 %v6911_v51  ;;  %v6934_v50 = vld [vmem:[%s8791_s7 + $0x638] sm:$0xff]  }
 0x8a1   :  { %v3674_v59 = vadd.f32 %v3673_v58, %v2939_v52  ;;  %v3717_v60 = vadd.f32 %v3716_v32, %v2947_v53  ;;  %v3675_v54 = vpop.f32.mrb[45].mxu0  ;;  %v3718_v61 = vpop.f32.mrb[45].mxu1  ;;  %6557 = vmatprep.subr.bf16.mxu0 %v6912_v55  ;;  %6579 = vmatprep.subr.bf16.mxu1 %v6913_v56  ;;  %v6935_v51 = vld [vmem:[%s8791_s7 + $0x6b8] sm:$0xff]   ;;  %v6936_v55 = vld [vmem:[%s8791_s7 + $0x740] sm:$0xff]  }
 0x8a2   :  { %v3676_v62 = vadd.f32 %v3675_v54, %v2943_v25  ;;  %v3719_v63 = vadd.f32 %v3718_v61, %v2951_v57  ;;  %v3677_v1 = vpop.f32.mrb[46].mxu0  ;;  %v3720_v2 = vpop.f32.mrb[46].mxu1  ;;  %v6937_v56 = vld [vmem:[%s8791_s7 + $0x7c0] sm:$0xff]  }
 0x8a3   :  { %v3678_v4 = vadd.f32 %v3677_v1, %v2939_v52  ;;  %v3721_v6 = vadd.f32 %v3720_v2, %v2947_v53  ;;  %v3679_v7 = vpop.f32.mrb[47].mxu0  ;;  %v3722_v49 = vpop.f32.mrb[47].mxu1  ;;  %v3819_v12 = vmax.f32 %v3674_v59, 0.0  ;;  %v3821_v13 = vmax.f32 %v3717_v60, 0.0 }
 0x8a4   :  { %v3680_v8 = vadd.f32 %v3679_v7, %v2943_v25  ;;  %v3723_v9 = vadd.f32 %v3722_v49, %v2951_v57  ;;  %6558 = vmatpush3.bf16.msra.mxu0 %v6914_v35  ;;  %6580 = vmatpush3.bf16.msra.mxu1 %v6915_v36  ;;  %v3820_v23 = vmax.f32 %v3676_v62, 0.0  ;;  %v3822_v44 = vmax.f32 %v3719_v63, 0.0  ;;  %v6943_v7 = vld [vmem:[%s8791_s7 + $0x788] sm:$0xff]  }
 0x8a5   :  { %v3835_v14 = vmax.f32 %v3678_v4, 0.0  ;;  %v3837_v15 = vmax.f32 %v3721_v6, 0.0  ;;  %6559 = vmatprep.subr.bf16.mxu0 %v6916_v38  ;;  %6581 = vmatprep.subr.bf16.mxu1 %v6917_v39  ;;  %v2955_v52 = vrot.slane %v8532_v37, %v7621_v21  ;;  %v2963_v53 = vrot.slane %v8532_v37, %v7624_v22  ;;  %v6938_v21 = vld [vmem:[%s8791_s7 + $0x700] sm:$0xff]   ;;  %v6942_v6 = vld [vmem:[%s8791_s7 + $0x708] sm:$0xff]  }
 0x8a6   :  { %v3836_v27 = vmax.f32 %v3680_v8, 0.0  ;;  %v3838_v18 = vmax.f32 %v3723_v9, 0.0  ;;  %v2959_v25 = vrot.slane %v8532_v37, %v7627_v24  ;;  %v2967_v57 = vrot.slane %v8532_v37, %v7630_v26  ;;  %v6939_v22 = vld [vmem:[%s8791_s7 + $0x780] sm:$0xff]   ;;  %v6940_v24 = vld [vmem:[%s8791_s7 + $0x748] sm:$0xff]  }
 0x8a7   :  { %v8578_v19 = vpack.c.bf16 %v3835_v14, %v3819_v12  ;;  %v8580_v20 = vpack.c.bf16 %v3837_v15, %v3821_v13  ;;  %v6941_v26 = vld [vmem:[%s8791_s7 + $0x7c8] sm:$0xff]   ;;  %v6945_v12 = vld [vmem:[%s8791_s7 + $0x7d0] sm:$0xff]  }
 0x8a8   :  { %v3852_v28 = vpack.c.bf16 %v3836_v27, %v3820_v23  ;;  %v3854_v29 = vpack.c.bf16 %v3838_v18, %v3822_v44  ;;  %6560 = vmatpush3.bf16.msra.mxu0 %v6918_v10  ;;  %6582 = vmatpush3.bf16.msra.mxu1 %v6919_v11  ;;  %v6944_v11 = vld [vmem:[%s8791_s7 + $0x750] sm:$0xff]  }
 0x8a9   :  { %6561 = vmatprep.subr.bf16.mxu0 %v6920_v16  ;;  %6583 = vmatprep.subr.bf16.mxu1 %v6921_v17  ;;  %v6946_v18 = vld [vmem:[%s8791_s7 + $0x710] sm:$0xff]  }
 0x8aa   :  { %5085 = vmatprep.mubr.bf16.mxu0 %v3852_v28  ;;  %5126 = vmatprep.mubr.bf16.mxu1 %v3854_v29  ;;  %v6949_v28 = vld [vmem:[%s8791_s7 + $0x7d8] sm:$0xff]  }
 0x8ab   :  { %v6950_v29 = vld [vmem:[%s8791_s7 + $0x718] sm:$0xff]  }
 0x8ac   :  { %6562 = vmatpush3.bf16.msra.mxu0 %v6922_v30  ;;  %6584 = vmatpush3.bf16.msra.mxu1 %v6923_v31  ;;  %v6951_v30 = vld [vmem:[%s8791_s7 + $0x798] sm:$0xff]   ;;  %v6952_v31 = vld [vmem:[%s8791_s7 + $0x760] sm:$0xff]  }
 0x8ad   :  { %6563 = vmatprep.subr.bf16.mxu0 %v6924_v33  ;;  %6585 = vmatprep.subr.bf16.mxu1 %v6925_v34  ;;  %v6953_v33 = vld [vmem:[%s8791_s7 + $0x7e0] sm:$0xff]  }
 0x8ae   :  { %v6954_v34 = vld [vmem:[%s8791_s7 + $0x720] sm:$0xff]  }
 0x8b0   :  { %6564 = vmatpush3.bf16.msra.mxu0 %v6926_v3  ;;  %6586 = vmatpush3.bf16.msra.mxu1 %v6927_v5  ;;  %v6955_v3 = vld [vmem:[%s8791_s7 + $0x7a0] sm:$0xff]   ;;  %v6956_v5 = vld [vmem:[%s8791_s7 + $0x768] sm:$0xff]  }
 0x8b1   :  { %6565 = vmatprep.subr.bf16.mxu0 %v6928_v42  ;;  %6587 = vmatprep.subr.bf16.mxu1 %v6929_v43  ;;  %v6957_v42 = vld [vmem:[%s8791_s7 + $0x7e8] sm:$0xff]  }
 0x8b2   :  { %v6958_v43 = vld [vmem:[%s8791_s7 + $0x728] sm:$0xff]  }
 0x8b4   :  { %6566 = vmatpush3.bf16.msra.mxu0 %v6930_v45  ;;  %6588 = vmatpush3.bf16.msra.mxu1 %v6931_v46  ;;  %v6959_v45 = vld [vmem:[%s8791_s7 + $0x7a8] sm:$0xff]   ;;  %v6960_v46 = vld [vmem:[%s8791_s7 + $0x770] sm:$0xff]  }
 0x8b5   :  { %6567 = vmatprep.subr.bf16.mxu0 %v6932_v47  ;;  %6589 = vmatprep.subr.bf16.mxu1 %v6933_v48  ;;  %v6961_v47 = vld [vmem:[%s8791_s7 + $0x7f0] sm:$0xff]  }
 0x8b6   :  { %v6962_v48 = vld [vmem:[%s8791_s7 + $0x730] sm:$0xff]  }
 0x8b8   :  { %v3759_v58 = vpop.f32.mrb[48].mxu0  ;;  %v3802_v32 = vpop.f32.mrb[48].mxu1  ;;  %6568 = vmatpush3.bf16.msra.mxu0 %v6934_v50  ;;  %6590 = vmatpush3.bf16.msra.mxu1 %v6935_v51  ;;  %v6963_v50 = vld [vmem:[%s8791_s7 + $0x7b0] sm:$0xff]   ;;  %v6964_v51 = vld [vmem:[%s8791_s7 + $0x778] sm:$0xff]  }
 0x8b9   :  { %v3760_v35 = vadd.f32 %v3759_v58, %v2955_v52  ;;  %v3803_v36 = vadd.f32 %v3802_v32, %v2963_v53  ;;  %v3761_v59 = vpop.f32.mrb[49].mxu0  ;;  %v3804_v60 = vpop.f32.mrb[49].mxu1  ;;  %6597 = vmatprep.subr.bf16.mxu0 %v6936_v55  ;;  %6619 = vmatprep.subr.bf16.mxu1 %v6937_v56  ;;  %v6967_v55 = vld [vmem:[%s8791_s7 + $0x7b8] sm:$0xff]  }
 0x8ba   :  { %v3762_v37 = vadd.f32 %v3761_v59, %v2959_v25  ;;  %v3805_v54 = vadd.f32 %v3804_v60, %v2967_v57  ;;  %v3763_v61 = vpop.f32.mrb[50].mxu0  ;;  %v3806_v38 = vpop.f32.mrb[50].mxu1 }
 0x8bb   :  { %v3764_v39 = vadd.f32 %v3763_v61, %v2955_v52  ;;  %v3807_v62 = vadd.f32 %v3806_v38, %v2963_v53  ;;  %v3765_v63 = vpop.f32.mrb[51].mxu0  ;;  %v3808_v1 = vpop.f32.mrb[51].mxu1  ;;  %5086 = vmatmul.mubr.bf16.vlgmr.msra.gmra.mrb[60].mxu0 %v8578_v19  ;;  %5127 = vmatmul.mubr.bf16.vlgmr.msra.gmra.mrb[60].mxu1 %v8580_v20  ;;  %v3823_v49 = vmax.f32 %v3760_v35, 0.0  ;;  %v3825_v8 = vmax.f32 %v3803_v36, 0.0  ;;  %v6947_v19 = vld [vmem:[%s8791_s7 + $0x790] sm:$0xff]   ;;  %v6948_v20 = vld [vmem:[%s8791_s7 + $0x758] sm:$0xff]  }
 0x8bc   :  { %v3766_v2 = vadd.f32 %v3765_v63, %v2959_v25  ;;  %v3809_v4 = vadd.f32 %v3808_v1, %v2967_v57  ;;  %6598 = vmatpush3.bf16.msra.mxu0 %v6938_v21  ;;  %6620 = vmatpush3.bf16.msra.mxu1 %v6939_v22  ;;  %v3824_v13 = vmax.f32 %v3762_v37, 0.0  ;;  %v3826_v14 = vmax.f32 %v3805_v54, 0.0  ;;  %v6965_v52 = vld [vmem:[%s8791_s7 + $0x7f8] sm:$0xff]   ;;  %v6132_v57 = vld [vmem:[%s8795_s8 + $0x1] ss:$0 sm:$0xff] }
 0x8bd   :  { %v3839_v9 = vmax.f32 %v3764_v39, 0.0  ;;  %v3841_v10 = vmax.f32 %v3807_v62, 0.0  ;;  %6599 = vmatprep.subr.bf16.mxu0 %v6940_v24  ;;  %6621 = vmatprep.subr.bf16.mxu1 %v6941_v26  ;;  %v6966_v53 = vld [vmem:[%s8791_s7 + $0x738] sm:$0xff]  }
 0x8be   :  { %v3840_v15 = vmax.f32 %v3766_v2, 0.0  ;;  %v3842_v16 = vmax.f32 %v3809_v4, 0.0 }
 0x8bf   :  { %v3855_v17 = vpack.c.bf16 %v3839_v9, %v3823_v49  ;;  %v3857_v23 = vpack.c.bf16 %v3841_v10, %v3825_v8 }
 0x8c0   :  { %v3856_v44 = vpack.c.bf16 %v3840_v15, %v3824_v13  ;;  %v3858_v27 = vpack.c.bf16 %v3842_v16, %v3826_v14  ;;  %6600 = vmatpush3.bf16.msra.mxu0 %v6942_v6  ;;  %6622 = vmatpush3.bf16.msra.mxu1 %v6943_v7 }
 0x8c1   :  { %6601 = vmatprep.subr.bf16.mxu0 %v6944_v11  ;;  %6623 = vmatprep.subr.bf16.mxu1 %v6945_v12 }
 0x8c2   :  { %5167 = vmatprep.mubr.bf16.mxu0 %v3856_v44  ;;  %5208 = vmatprep.mubr.bf16.mxu1 %v3858_v27 }
 0x8c4   :  { %6602 = vmatpush3.bf16.msra.mxu0 %v6946_v18  ;;  %6624 = vmatpush3.bf16.msra.mxu1 %v6947_v19 }
 0x8c5   :  { %6603 = vmatprep.subr.bf16.mxu0 %v6948_v20  ;;  %6625 = vmatprep.subr.bf16.mxu1 %v6949_v28 }
 0x8c8   :  { %6604 = vmatpush3.bf16.msra.mxu0 %v6950_v29  ;;  %6626 = vmatpush3.bf16.msra.mxu1 %v6951_v30 }
 0x8c9   :  { %6605 = vmatprep.subr.bf16.mxu0 %v6952_v31  ;;  %6627 = vmatprep.subr.bf16.mxu1 %v6953_v33 }
 0x8cc   :  { %6606 = vmatpush3.bf16.msra.mxu0 %v6954_v34  ;;  %6628 = vmatpush3.bf16.msra.mxu1 %v6955_v3 }
 0x8cd   :  { %6607 = vmatprep.subr.bf16.mxu0 %v6956_v5  ;;  %6629 = vmatprep.subr.bf16.mxu1 %v6957_v42 }
 0x8d0   :  { %6608 = vmatpush3.bf16.msra.mxu0 %v6958_v43  ;;  %6630 = vmatpush3.bf16.msra.mxu1 %v6959_v45 }
 0x8d1   :  { %6609 = vmatprep.subr.bf16.mxu0 %v6960_v46  ;;  %6631 = vmatprep.subr.bf16.mxu1 %v6961_v47 }
 0x8d4   :  { %6610 = vmatpush3.bf16.msra.mxu0 %v6962_v48  ;;  %6632 = vmatpush3.bf16.msra.mxu1 %v6963_v50 }
 0x8d5   :  { %6611 = vmatprep.subr.bf16.mxu0 %v6964_v51  ;;  %6633 = vmatprep.subr.bf16.mxu1 %v6965_v52 }
 0x8d8   :  { %6612 = vmatpush3.bf16.msra.mxu0 %v6966_v53  ;;  %6634 = vmatpush3.bf16.msra.mxu1 %v6967_v55 }
 0x8d9   :  { %6680 = vmatprep.subr.bf16.mxu0 %v6999_v0 }
 0x8db   :  { %5168 = vmatmul.mubr.bf16.vlgmr.msra.gmra.mrb[64].mxu0 %v3855_v17  ;;  %5209 = vmatmul.mubr.bf16.vlgmr.msra.gmra.mrb[64].mxu1 %v3857_v23 }
 0x8dc   :  { %6692 = vmatprep.mubr.msk.bf16.mxu0 %vm7000_vm0, %v6999_v0 }
 0x94e   :  { %v6481_v56 = vpop.f32.mrb[52].mxu0  ;;  %v6503_v25 = vpop.f32.mrb[52].mxu1 }
 0x94f   :  { %v6482_v58 = vpop.f32.mrb[53].mxu0  ;;  %v6504_v32 = vpop.f32.mrb[53].mxu1 }
 0x950   :  { %v6483_v21 = vadd.f32 %v6482_v58, %v6481_v56  ;;  %v6505_v22 = vadd.f32 %v6504_v32, %v6503_v25  ;;  %v6484_v35 = vpop.f32.mrb[54].mxu0  ;;  %v6506_v36 = vpop.f32.mrb[54].mxu1 }
 0x951   :  { %v6485_v59 = vpop.f32.mrb[55].mxu0  ;;  %v6507_v60 = vpop.f32.mrb[55].mxu1 }
 0x952   :  { %v4924_v24 = vadd.f32 %v6483_v21, %v6132_v57  ;;  %v6486_v26 = vadd.f32 %v6485_v59, %v6484_v35  ;;  %v6508_v37 = vadd.f32 %v6507_v60, %v6506_v36 }
 0x954   :  { %v4965_v54 = vadd.f32 %v6505_v22, %v4924_v24  ;;  %v4927_v61 = vadd.f32 %v6486_v26, %v6132_v57 }
 0x956   :  { %v4968_v38 = vadd.f32 %v6508_v37, %v4927_v61 }
 0x96e   :  { %v6525_v39 = vpop.f32.mrb[56].mxu0  ;;  %v6547_v62 = vpop.f32.mrb[56].mxu1 }
 0x96f   :  { %v6526_v63 = vpop.f32.mrb[57].mxu0  ;;  %v6548_v1 = vpop.f32.mrb[57].mxu1 }
 0x970   :  { %v6527_v2 = vadd.f32 %v6526_v63, %v6525_v39  ;;  %v6549_v4 = vadd.f32 %v6548_v1, %v6547_v62  ;;  %v6528_v6 = vpop.f32.mrb[58].mxu0  ;;  %v6550_v7 = vpop.f32.mrb[58].mxu1  ;;  %v6969_v39 = vld [vmem:[%s8798_s11 + $0x8] sm:$0xff]   ;;  %v6970_v62 = vld [vmem:[%s8798_s11 + $0x10] sm:$0xff]   ;;  %v6971_v63 = vld [vmem:[%s8798_s11 + $0x18] sm:$0xff]  }
 0x971   :  { %v6529_v49 = vpop.f32.mrb[59].mxu0  ;;  %v6551_v8 = vpop.f32.mrb[59].mxu1  ;;  %v6972_v1 = vld [vmem:[%s8798_s11 + $0x20] sm:$0xff]  }
 0x972   :  { %v5006_v9 = vadd.f32 %v6527_v2, %v4965_v54  ;;  %v6530_v10 = vadd.f32 %v6529_v49, %v6528_v6  ;;  %v6552_v11 = vadd.f32 %v6551_v8, %v6550_v7  ;;  %v6973_v2 = vld [vmem:[%s8798_s11 + $0x28] sm:$0xff]  }
 0x974   :  { %v5047_v12 = vadd.f32 %v6549_v4, %v5006_v9  ;;  %v5009_v13 = vadd.f32 %v6530_v10, %v4968_v38 }
 0x976   :  { %v5050_v14 = vadd.f32 %v6552_v11, %v5009_v13  ;;  %v6261_v11 = vld [vmem:[%s8796_s9 + $0x1] ss:$0 sm:$0xff] }
 0x98e   :  { %v6569_v15 = vpop.f32.mrb[60].mxu0  ;;  %v6591_v16 = vpop.f32.mrb[60].mxu1 }
 0x98f   :  { %v6570_v17 = vpop.f32.mrb[61].mxu0  ;;  %v6592_v23 = vpop.f32.mrb[61].mxu1 }
 0x990   :  { %v6571_v44 = vadd.f32 %v6570_v17, %v6569_v15  ;;  %v6593_v27 = vadd.f32 %v6592_v23, %v6591_v16  ;;  %v6572_v18 = vpop.f32.mrb[62].mxu0  ;;  %v6594_v19 = vpop.f32.mrb[62].mxu1  ;;  %v6262_v15 = vld [vmem:[%s8797_s10 + $0x1] ss:$0 sm:$0xff] }
 0x991   :  { %v6573_v20 = vpop.f32.mrb[63].mxu0  ;;  %v6595_v28 = vpop.f32.mrb[63].mxu1 }
 0x992   :  { %v5088_v29 = vadd.f32 %v6571_v44, %v5047_v12  ;;  %v6574_v30 = vadd.f32 %v6573_v20, %v6572_v18  ;;  %v6596_v31 = vadd.f32 %v6595_v28, %v6594_v19  ;;  %v6263_v18 = vld [vmem:[%s8800_s12] ss:$0 sm:$0xff] }
 0x994   :  { %v5129_v33 = vadd.f32 %v6593_v27, %v5088_v29  ;;  %v5091_v34 = vadd.f32 %v6574_v30, %v5050_v14  ;;  %v20_v27 = vstv %s8799_s14  ;;  %v6271_v30 = vld [vmem:[%s8801_s13] ss:$0 sm:$0xff] }
 0x995   :  { %21 = vst [vmem:[#allocation2] sm:$0x1] %v20_v27 }
 0x996   :  { %v5132_v3 = vadd.f32 %v6596_v31, %v5091_v34 }
 0x9ae   :  { %v6613_v5 = vpop.f32.mrb[64].mxu0  ;;  %v6635_v42 = vpop.f32.mrb[64].mxu1 }
 0x9af   :  { %v6614_v43 = vpop.f32.mrb[65].mxu0  ;;  %v6636_v45 = vpop.f32.mrb[65].mxu1 }
 0x9b0   :  { %v6615_v46 = vadd.f32 %v6614_v43, %v6613_v5  ;;  %v6637_v47 = vadd.f32 %v6636_v45, %v6635_v42  ;;  %v6616_v48 = vpop.f32.mrb[66].mxu0  ;;  %v6638_v50 = vpop.f32.mrb[66].mxu1 }
 0x9b1   :  { %v6617_v51 = vpop.f32.mrb[67].mxu0  ;;  %v6639_v52 = vpop.f32.mrb[67].mxu1 }
 0x9b2   :  { %v5170_v53 = vadd.f32 %v6615_v46, %v5129_v33  ;;  %v6618_v55 = vadd.f32 %v6617_v51, %v6616_v48  ;;  %v6640_v56 = vadd.f32 %v6639_v52, %v6638_v50  ;;  %v6272_v46 = vld [vmem:[#allocation2] ss:$0 sm:$0xff] }
 0x9b4   :  { %v5211_v25 = vadd.f32 %v6637_v47, %v5170_v53  ;;  %v5173_v57 = vadd.f32 %v6618_v55, %v5132_v3 }
 0x9b6   :  { %v5214_v58 = vadd.f32 %v6640_v56, %v5173_v57  ;;  %v5217_v32 = vadd.f32 %v5211_v25, %v8076_v40 }
 0x9b8   :  { %v5221_v21 = vsel %vm115_vm1, %v5217_v32, 0.0  ;;  %v5218_v22 = vadd.f32 %v5214_v58, %v8078_v41  ;;  %v6968_v41 = vld [vmem:[%s8798_s11] sm:$0xff]  }
 0x9b9   :  { %5222 = vadd.xlane.f32.xlu0 %v5221_v21  ;;  %6681 = vmatpush3.bf16.msra.mxu0 %v6968_v41 }
 0x9ba   :  { %v5224_v35 = vsel %vm115_vm1, %v5218_v22, 0.0  ;;  %6682 = vmatprep.subr.bf16.mxu0 %v6999_v0 }
 0x9bb   :  { %5225 = vadd.xlane.f32.xlu1 %v5224_v35 }
 0x9bd   :  { %6683 = vmatpush3.bf16.msra.mxu0 %v6969_v39 }
 0x9be   :  { %6684 = vmatprep.subr.bf16.mxu0 %v6999_v0 }
 0x9c1   :  { %6685 = vmatpush3.bf16.msra.mxu0 %v6970_v62 }
 0x9c2   :  { %6686 = vmatprep.subr.bf16.mxu0 %v6999_v0 }
 0x9c5   :  { %6687 = vmatpush3.bf16.msra.mxu0 %v6971_v63 }
 0x9c6   :  { %6688 = vmatprep.subr.bf16.mxu0 %v6999_v0 }
 0x9c9   :  { %6689 = vmatpush3.bf16.msra.mxu0 %v6972_v1 }
 0x9ca   :  { %6690 = vmatprep.subr.bf16.mxu0 %v6999_v0 }
 0x9cd   :  { %6691 = vmatpush3.bf16.msra.mxu0 %v6973_v2 }
 0xa46   :  { %v5223_v36 = vpop.xlane.xlu0 %5222 }
 0xa47   :  { %v5227_v59 = vmul.f32 0.010416667, %v5223_v36 }
 0xa48   :  { %v5226_v60 = vpop.xlane.xlu1 %5225 }
 0xa49   :  { %v5229_v24 = vsub.f32 %v5217_v32, %v5227_v59  ;;  %v5228_v26 = vmul.f32 0.010416667, %v5226_v60 }
 0xa4b   :  { %v5230_v37 = vsub.f32 %v5218_v22, %v5228_v26  ;;  %v5231_v54 = vmul.f32 %v5229_v24, %v5229_v24 }
 0xa4d   :  { %v5233_v61 = vsel %vm115_vm1, %v5231_v54, 0.0  ;;  %v5232_v38 = vmul.f32 %v5230_v37, %v5230_v37 }
 0xa4e   :  { %5234 = vadd.xlane.f32.xlu0 %v5233_v61 }
 0xa4f   :  { %v5236_v40 = vsel %vm115_vm1, %v5232_v38, 0.0 }
 0xa50   :  { %5237 = vadd.xlane.f32.xlu1 %v5236_v40 }
 0xadb   :  { %v5235_v4 = vpop.xlane.xlu0 %5234 }
 0xadc   :  { %v5239_v6 = vmul.f32 0.010416667, %v5235_v4 }
 0xadd   :  { %v5238_v7 = vpop.xlane.xlu1 %5237 }
 0xade   :  { %v5241_v49 = vadd.f32 1e-05, %v5239_v6  ;;  %v5240_v8 = vmul.f32 0.010416667, %v5238_v7 }
 0xae0   :  { %6987 = vrsqrt.f32 %v5241_v49  ;;  %v5242_v9 = vadd.f32 1e-05, %v5240_v8 }
 0xae2   :  { %6989 = vrsqrt.f32 %v5242_v9 }
 0xaea   :  { %v6988_v10 = vpop.eup %6987 }
 0xaeb   :  { %v5245_v12 = vmul.f32 %v6988_v10, %v5229_v24 }
 0xaec   :  { %v6990_v0 = vpop.eup %6989 }
 0xaed   :  { %v5251_v13 = vmul.f32 %v6261_v11, %v5245_v12  ;;  %v5246_v14 = vmul.f32 %v6990_v0, %v5230_v37 }
 0xaef   :  { %v5252_v16 = vmul.f32 %v6261_v11, %v5246_v14  ;;  %v5257_v17 = vadd.f32 %v6262_v15, %v5251_v13 }
 0xaf1   :  { %v5258_v23 = vadd.f32 %v6262_v15, %v5252_v16 }
 0xaf3   :  { %v5259_v44 = vpack.c.bf16 %v5258_v23, %v5257_v17 }
 0xaf5   :  { %6693 = vmatmul.mubr.msk.bf16.vlgmr.msra.gmra.mrb[68].mxu0 %vm115_vm1, %v5259_v44 }
 0xbc8   :  { %v5352_v19 = vpop.f32.mrb[68].mxu0 }
 0xbc9   :  { %v5353_v20 = vadd.f32 %v6263_v18, %v5352_v19  ;;  %v6694_v28 = vpop.f32.mrb[69].mxu0 }
 0xbca   :  { %v5355_v29 = vpop.f32.mrb[70].mxu0 }
 0xbcb   :  { %v5359_v31 = vmax.f32 %v5353_v20, 0.0  ;;  %v5356_v33 = vadd.f32 %v6263_v18, %v5355_v29  ;;  %v6695_v34 = vpop.f32.mrb[71].mxu0 }
 0xbcd   :  { %v5360_v3 = vmax.f32 %v5356_v33, 0.0  ;;  %v5368_v5 = vmul.f32 %v6271_v30, %v5359_v31 }
 0xbcf   :  { %v5371_v42 = vsel %vm5370_vm2, %v5368_v5, 0.0  ;;  %v5369_v43 = vmul.f32 %v6271_v30, %v5360_v3 }
 0xbd0   :  { %5372 = vadd.xlane.f32.xlu0 %v5371_v42 }
 0xbd1   :  { %v5374_v45 = vsel %vm5370_vm2, %v5369_v43, 0.0 }
 0xbd2   :  { %5375 = vadd.xlane.f32.xlu1 %v5374_v45 }
 0xc5d   :  { %v5373_v47 = vpop.xlane.xlu0 %5372 }
 0xc5e   :  { %v5384_v48 = vadd.f32 %v6272_v46, %v5373_v47 }
 0xc5f   :  { %v5376_v50 = vpop.xlane.xlu1 %5375 }
 0xc60   :  { %v6273_v51 = vmul.f32 -1.442695, %v5384_v48  ;;  %v5385_v52 = vadd.f32 %v6272_v46, %v5376_v50 }
 0xc62   :  { %6991 = vpow2.f32 %v6273_v51  ;;  %v6274_v53 = vmul.f32 -1.442695, %v5385_v52 }
 0xc64   :  { %6993 = vpow2.f32 %v6274_v53 }
 0xc6c   :  { %v6992_v55 = vpop.eup %6991 }
 0xc6d   :  { %v5392_v56 = vadd.f32 1.0, %v6992_v55 }
 0xc6e   :  { %v6994_v25 = vpop.eup %6993 }
 0xc6f   :  { %6995 = vrcp.f32 %v5392_v56  ;;  %v5393_v57 = vadd.f32 1.0, %v6994_v25 }
 0xc71   :  { %6997 = vrcp.f32 %v5393_v57 }
 0xc79   :  { %v6996_v58 = vpop.eup %6995 }
 0xc7a   :  { %5399 = vst.msk [vmem:[%s8802_s15] sm:$0xff] %vm5398_vm3, %v6996_v58 }
 0xc7b   :  { %v6998_v32 = vpop.eup %6997 }
 0xc7c   :  { %5400 = vst.msk [vmem:[%s8802_s15 + $0x8] sm:$0xff] %vm5398_vm3, %v6998_v32 }

</bundles_post_ra>
